<compile_context>
chip_gen: v7x
topology: tpu7x:2x2x1
jax: 0.10.0
libtpu: 0.0.40
codegen_flags: <defaults>
</compile_context>

<pallas_src>
import functools

import numpy as np
import jax
import jax.numpy as jnp
from jax.experimental import pallas as pl
from jax.experimental.pallas import tpu as pltpu

IMG_SHAPE = (3, 32, 32)
IN_FEATURES = int(np.prod(IMG_SHAPE))   # 3072
H1 = 512
H2 = 256
OUT = 1
OUT_PAD = 128                           # lane-dense padded logit width
LEAKY_SLOPE = 0.2


# ---------------------------------------------------------------------------
# Kernel: fused 3-layer MLP.  All operands are whole-array VMEM blocks.
#   h1 = leaky(x @ W1t + b1)      (Np, 3072) @ (3072, 512)
#   h2 = leaky(h1 @ W2t + b2)     (Np, 512)  @ (512, 256)
#   o  = h2 @ W3t_pad + b3_pad    (Np, 256)  @ (256, 128)   [col 0 = logit]
# ---------------------------------------------------------------------------
def _mlp_kernel(x_ref, w1_ref, b1_ref, w2_ref, b2_ref, w3_ref, b3_ref, o_ref,
                *, slope):
    h = jnp.dot(x_ref[...], w1_ref[...],
                preferred_element_type=jnp.float32) + b1_ref[...]
    h = jnp.where(h >= 0, h, slope * h)

    h = jnp.dot(h, w2_ref[...],
                preferred_element_type=jnp.float32) + b2_ref[...]
    h = jnp.where(h >= 0, h, slope * h)

    o_ref[...] = (jnp.dot(h, w3_ref[...],
                          preferred_element_type=jnp.float32) + b3_ref[...]
                  ).astype(o_ref.dtype)


def simple_discriminator_forward(img_nchw, prep):
    """img_nchw: (N, C, H, W) float32; prep: pre-transposed/padded params."""
    n = img_nchw.shape[0]
    x = img_nchw.reshape(n, -1)                      # == torch .view(N, -1)
    assert x.shape[1] == IN_FEATURES

    # Pad batch rows up to a multiple of 8 (sublane alignment; padded rows are
    # zeros and are sliced off after the kernel).
    m_pad = max(8, ((n + 7) // 8) * 8)
    x_pad = jnp.zeros((m_pad, IN_FEATURES), jnp.float32).at[:n, :].set(x)

    kernel = functools.partial(_mlp_kernel, slope=LEAKY_SLOPE)
    out = pl.pallas_call(
        kernel,
        out_shape=jax.ShapeDtypeStruct((m_pad, OUT_PAD), jnp.float32),
        grid=(1,),
        in_specs=[
            pl.BlockSpec((m_pad, IN_FEATURES), lambda i: (0, 0)),
            pl.BlockSpec((IN_FEATURES, H1), lambda i: (0, 0)),
            pl.BlockSpec((1, H1), lambda i: (0, 0)),
            pl.BlockSpec((H1, H2), lambda i: (0, 0)),
            pl.BlockSpec((1, H2), lambda i: (0, 0)),
            pl.BlockSpec((H2, OUT_PAD), lambda i: (0, 0)),
            pl.BlockSpec((1, OUT_PAD), lambda i: (0, 0)),
        ],
        out_specs=pl.BlockSpec((m_pad, OUT_PAD), lambda i: (0, 0)),
        compiler_params=pltpu.CompilerParams(
            dimension_semantics=("arbitrary",),
            vmem_limit_bytes=64 * 1024 * 1024,
        ),
    )(x_pad, prep["w1t"], prep["b1"], prep["w2t"], prep["b2"],
      prep["w3t"], prep["b3"])

    return out[:n, :OUT]                             # (N, 1)


# ---------------------------------------------------------------------------
# One-time parameter layout preparation (outside the jitted forward):
#   * PyTorch Linear weights are (out_features, in_features) -> transpose once.
#   * Final 1-wide logit layer padded to 128 lanes (zeros in cols 1..127).
# ---------------------------------------------------------------------------
def prepare_params(p):
    w3t = jnp.zeros((H2, OUT_PAD), jnp.float32).at[:, :OUT].set(
        jnp.transpose(p["w3"]))
    b3 = jnp.zeros((1, OUT_PAD), jnp.float32).at[:, :OUT].set(p["b3"][None, :])
    return {
        "w1t": jnp.transpose(p["w1"]), "b1": p["b1"].reshape(1, H1),
        "w2t": jnp.transpose(p["w2"]), "b2": p["b2"].reshape(1, H2),
        "w3t": w3t, "b3": b3,
    }


# ---------------------------------------------------------------------------
# Deterministic synthetic parameters (PyTorch nn.Linear default init layout).
# ---------------------------------------------------------------------------
def make_torch_params(key):
    ks = jax.random.split(key, 6)

    def lin_init(kw, kb, fan_in, fan_out):
        bound = 1.0 / float(np.sqrt(fan_in))
        w = jax.random.uniform(kw, (fan_out, fan_in),
                               minval=-bound, maxval=bound, dtype=jnp.float32)
        b = jax.random.uniform(kb, (fan_out,),
                               minval=-bound, maxval=bound, dtype=jnp.float32)
        return w, b

    w1, b1 = lin_init(ks[0], ks[1], IN_FEATURES, H1)
    w2, b2 = lin_init(ks[2], ks[3], H1, H2)
    w3, b3 = lin_init(ks[4], ks[5], H2, OUT)
    return {"w1": w1, "b1": b1, "w2": w2, "b2": b2, "w3": w3, "b3": b3}


# ---------------------------------------------------------------------------
# Pure-JAX reference (for a correctness sanity check).
# ---------------------------------------------------------------------------
def _ref_forward(img, p):
    x = img.reshape(img.shape[0], -1)

    def leaky(v):
        return jnp.where(v >= 0, v, LEAKY_SLOPE * v)

    h = leaky(x @ p["w1"].T + p["b1"][None, :])
    h = leaky(h @ p["w2"].T + p["b2"][None, :])
    return h @ p["w3"].T + p["b3"][None, :]          # (N, 1)


if __name__ == "__main__":
    root = jax.random.PRNGKey(0)
    k_in, k_par = jax.random.split(root)

    batch = 2
    img = jax.random.normal(k_in, (batch, *IMG_SHAPE), dtype=jnp.float32)

    torch_params = make_torch_params(k_par)
    prep = prepare_params(torch_params)              # one-time layout prep

    fwd = jax.jit(simple_discriminator_forward)
    y = jax.block_until_ready(fwd(img, prep))

    assert y.shape == (batch, OUT), y.shape
    assert y.dtype == jnp.float32

    y_ref = jax.block_until_ready(jax.jit(_ref_forward)(img, torch_params))
    max_diff = float(jnp.max(jnp.abs(y - y_ref)))
    assert max_diff < 5e-2, f"mismatch vs reference: max|diff|={max_diff}"

    print("KERNEL_OK")
</pallas_src>

<mosaic_0001>
module attributes {stable_mosaic.version = 11 : i64} {
  func.func @_mlp_kernel(%arg0: i32, %arg1: memref<8x3072xf32, #tpu.memory_space<vmem>>, %arg2: memref<3072x512xf32, #tpu.memory_space<vmem>>, %arg3: memref<1x512xf32, #tpu.memory_space<vmem>>, %arg4: memref<512x256xf32, #tpu.memory_space<vmem>>, %arg5: memref<1x256xf32, #tpu.memory_space<vmem>>, %arg6: memref<256x128xf32, #tpu.memory_space<vmem>>, %arg7: memref<1x128xf32, #tpu.memory_space<vmem>>, %arg8: memref<8x128xf32, #tpu.memory_space<vmem>>) attributes {dimension_semantics = [#tpu.dimension_semantics<arbitrary>], iteration_bounds = array<i64: 1>, scalar_prefetch = 0 : i64, scratch_operands = 0 : i64, tpu.core_type = #tpu.core_type<tc>, window_params = [{pipeline_mode = #tpu.pipeline_mode<synchronous>, transform_indices = @transform_0, window_bounds = array<i64: 8, 3072>}, {pipeline_mode = #tpu.pipeline_mode<synchronous>, transform_indices = @transform_1, window_bounds = array<i64: 3072, 512>}, {pipeline_mode = #tpu.pipeline_mode<synchronous>, transform_indices = @transform_2, window_bounds = array<i64: 1, 512>}, {pipeline_mode = #tpu.pipeline_mode<synchronous>, transform_indices = @transform_3, window_bounds = array<i64: 512, 256>}, {pipeline_mode = #tpu.pipeline_mode<synchronous>, transform_indices = @transform_4, window_bounds = array<i64: 1, 256>}, {pipeline_mode = #tpu.pipeline_mode<synchronous>, transform_indices = @transform_5, window_bounds = array<i64: 256, 128>}, {pipeline_mode = #tpu.pipeline_mode<synchronous>, transform_indices = @transform_6, window_bounds = array<i64: 1, 128>}, {pipeline_mode = #tpu.pipeline_mode<synchronous>, transform_indices = @transform_7, window_bounds = array<i64: 8, 128>}]} {
    %c0 = arith.constant 0 : index
    %c0_0 = arith.constant 0 : index
    %0 = vector.load %arg1[%c0, %c0_0] : memref<8x3072xf32, #tpu.memory_space<vmem>>, vector<8x3072xf32>
    %c0_1 = arith.constant 0 : index
    %c0_2 = arith.constant 0 : index
    %1 = vector.load %arg2[%c0_1, %c0_2] : memref<3072x512xf32, #tpu.memory_space<vmem>>, vector<3072x512xf32>
    %cst = arith.constant dense<0.000000e+00> : vector<8x512xf32>
    %2 = tpu.matmul %0, %1, %cst {dimension_numbers = #tpu.dot_dimension_numbers<[1], [0], [0], [1], [0, 0, 1, 1], [], []>} : vector<8x3072xf32>, vector<3072x512xf32>, vector<8x512xf32> -> vector<8x512xf32>
    %c0_3 = arith.constant 0 : index
    %c0_4 = arith.constant 0 : index
    %3 = vector.load %arg3[%c0_3, %c0_4] : memref<1x512xf32, #tpu.memory_space<vmem>>, vector<1x512xf32>
    %4 = vector.broadcast %3 : vector<1x512xf32> to vector<8x512xf32>
    %5 = arith.addf %2, %4 : vector<8x512xf32>
    %cst_5 = arith.constant 0.000000e+00 : f32
    %6 = vector.broadcast %cst_5 : f32 to vector<8x512xf32>
    %7 = arith.cmpf oge, %5, %6 : vector<8x512xf32>
    %cst_6 = arith.constant 2.000000e-01 : f32
    %8 = vector.broadcast %cst_6 : f32 to vector<8x512xf32>
    %9 = arith.mulf %8, %5 : vector<8x512xf32>
    %10 = arith.select %7, %5, %9 : vector<8x512xi1>, vector<8x512xf32>
    %c0_7 = arith.constant 0 : index
    %c0_8 = arith.constant 0 : index
    %11 = vector.load %arg4[%c0_7, %c0_8] : memref<512x256xf32, #tpu.memory_space<vmem>>, vector<512x256xf32>
    %cst_9 = arith.constant dense<0.000000e+00> : vector<8x256xf32>
    %12 = tpu.matmul %10, %11, %cst_9 {dimension_numbers = #tpu.dot_dimension_numbers<[1], [0], [0], [1], [0, 0, 1, 1], [], []>} : vector<8x512xf32>, vector<512x256xf32>, vector<8x256xf32> -> vector<8x256xf32>
    %c0_10 = arith.constant 0 : index
    %c0_11 = arith.constant 0 : index
    %13 = vector.load %arg5[%c0_10, %c0_11] : memref<1x256xf32, #tpu.memory_space<vmem>>, vector<1x256xf32>
    %14 = vector.broadcast %13 : vector<1x256xf32> to vector<8x256xf32>
    %15 = arith.addf %12, %14 : vector<8x256xf32>
    %cst_12 = arith.constant 0.000000e+00 : f32
    %16 = vector.broadcast %cst_12 : f32 to vector<8x256xf32>
    %17 = arith.cmpf oge, %15, %16 : vector<8x256xf32>
    %cst_13 = arith.constant 2.000000e-01 : f32
    %18 = vector.broadcast %cst_13 : f32 to vector<8x256xf32>
    %19 = arith.mulf %18, %15 : vector<8x256xf32>
    %20 = arith.select %17, %15, %19 : vector<8x256xi1>, vector<8x256xf32>
    %c0_14 = arith.constant 0 : index
    %c0_15 = arith.constant 0 : index
    %21 = vector.load %arg6[%c0_14, %c0_15] : memref<256x128xf32, #tpu.memory_space<vmem>>, vector<256x128xf32>
    %cst_16 = arith.constant dense<0.000000e+00> : vector<8x128xf32>
    %22 = tpu.matmul %20, %21, %cst_16 {dimension_numbers = #tpu.dot_dimension_numbers<[1], [0], [0], [1], [0, 0, 1, 1], [], []>} : vector<8x256xf32>, vector<256x128xf32>, vector<8x128xf32> -> vector<8x128xf32>
    %c0_17 = arith.constant 0 : index
    %c0_18 = arith.constant 0 : index
    %23 = vector.load %arg7[%c0_17, %c0_18] : memref<1x128xf32, #tpu.memory_space<vmem>>, vector<1x128xf32>
    %24 = vector.broadcast %23 : vector<1x128xf32> to vector<8x128xf32>
    %25 = arith.addf %22, %24 : vector<8x128xf32>
    %c0_19 = arith.constant 0 : index
    %c0_20 = arith.constant 0 : index
    %26 = vector.load %arg8[%c0_19, %c0_20] : memref<8x128xf32, #tpu.memory_space<vmem>>, vector<8x128xf32>
    tpu.vector_store %arg8[%c0_19, %c0_20], %25 {strides = array<i32>} : memref<8x128xf32, #tpu.memory_space<vmem>>, vector<8x128xf32>,
    return
  }
  func.func @transform_0(%arg0: i32) -> (i32, i32) {
    %c0_i32 = arith.constant 0 : i32
    %c0_i32_0 = arith.constant 0 : i32
    %c0_i32_1 = arith.constant 0 : i32
    return %c0_i32, %c0_i32_0 : i32, i32
  }
  func.func @transform_1(%arg0: i32) -> (i32, i32) {
    %c0_i32 = arith.constant 0 : i32
    %c0_i32_0 = arith.constant 0 : i32
    %c0_i32_1 = arith.constant 0 : i32
    return %c0_i32, %c0_i32_0 : i32, i32
  }
  func.func @transform_2(%arg0: i32) -> (i32, i32) {
    %c0_i32 = arith.constant 0 : i32
    %c0_i32_0 = arith.constant 0 : i32
    %c0_i32_1 = arith.constant 0 : i32
    return %c0_i32, %c0_i32_0 : i32, i32
  }
  func.func @transform_3(%arg0: i32) -> (i32, i32) {
    %c0_i32 = arith.constant 0 : i32
    %c0_i32_0 = arith.constant 0 : i32
    %c0_i32_1 = arith.constant 0 : i32
    return %c0_i32, %c0_i32_0 : i32, i32
  }
  func.func @transform_4(%arg0: i32) -> (i32, i32) {
    %c0_i32 = arith.constant 0 : i32
    %c0_i32_0 = arith.constant 0 : i32
    %c0_i32_1 = arith.constant 0 : i32
    return %c0_i32, %c0_i32_0 : i32, i32
  }
  func.func @transform_5(%arg0: i32) -> (i32, i32) {
    %c0_i32 = arith.constant 0 : i32
    %c0_i32_0 = arith.constant 0 : i32
    %c0_i32_1 = arith.constant 0 : i32
    return %c0_i32, %c0_i32_0 : i32, i32
  }
  func.func @transform_6(%arg0: i32) -> (i32, i32) {
    %c0_i32 = arith.constant 0 : i32
    %c0_i32_0 = arith.constant 0 : i32
    %c0_i32_1 = arith.constant 0 : i32
    return %c0_i32, %c0_i32_0 : i32, i32
  }
  func.func @transform_7(%arg0: i32) -> (i32, i32) {
    %c0_i32 = arith.constant 0 : i32
    %c0_i32_0 = arith.constant 0 : i32
    %c0_i32_1 = arith.constant 0 : i32
    return %c0_i32, %c0_i32_0 : i32, i32
  }
}

</mosaic_0001>

<bundles_post_ra>
// kernel: simple_discriminator_forward.1
= control target key start
LH: loop header
LB: loop body
LE: loop exit
PB: predicated region body
PF: predicated region fallthrough
CT: control target
= control target key end

     0   :  { %12 = vsyncpa [#allocation3], 0  ;;  %s6033_s0 = inlined_call_operand.hbm [shape: f32[8,3072], index: 0, kind: input, shape index: {}]   ;;  %s6034_s1 = inlined_call_operand.hbm [shape: f32[3072,512], index: 1, kind: input, shape index: {}]   ;;  %s6035_s2 = inlined_call_operand.hbm [shape: f32[1,512], index: 2, kind: input, shape index: {}]   ;;  %s6036_s3 = inlined_call_operand.hbm [shape: f32[512,256], index: 3, kind: input, shape index: {}]   ;;  %s6037_s4 = inlined_call_operand.hbm [shape: f32[1,256], index: 4, kind: input, shape index: {}]   ;;  %s6038_s5 = inlined_call_operand.hbm [shape: f32[256,128], index: 5, kind: input, shape index: {}]   ;;  %s6039_s6 = inlined_call_operand.hbm [shape: f32[1,128], index: 6, kind: input, shape index: {}]   ;;  %s6040_s7 = inlined_call_operand.hbm [shape: f32[8,128], index: 7, kind: output, shape index: {}]  }
   0x1   :  { %13 = vsyncpa [#allocation6], 0 }
   0x2   :  { %14 = vsyncpa [#allocation9], 0 }
   0x3   :  { %15 = vsyncpa [#allocation12], 0 }
   0x4   :  { %16 = vsyncpa [#allocation4], 0  ;;  %s5829_s24 = smov [#allocation5]   ;;  %s5643_s28 = scalar_lea.hbm %s6034_s1, 196608 }
   0x5   :  { %s32_s25 = sshll.u32 %s5829_s24, 4  ;;  %p5644_p0 = scmp.ne.s32.totalorder %s6034_s1, %s5643_s28  ;;  %s33_s25 = int_to_ptr.vmem [resolvable:$true] %s32_s25 }
   0x6   :  { %p5647_p1 = scmp.lt.u32.totalorder %s5643_s28, %s6034_s1 }
   0x8   :  { %p5649_p2 = pnand %p5647_p1, %p5644_p0 }
   0xa   :  { %5652 = shalt.err (!%p5649_p2)
}
   0xb   :  { %s5653_s10 = scalar_lea.vmem %s33_s25, 196608  ;;  %p5658_p4 = scmp.lt.s32.totalorder %s33_s25, %s33_s25 }
   0xc   :  { %p5654_p3 = scmp.ne.s32.totalorder %s33_s25, %s5653_s10  ;;  %p5659_p5 = scmp.lt.s32.totalorder %s5653_s10, %s5653_s10 }
   0xe   :  { %p5660_p6 = por %p5659_p5, %p5658_p4 }
  0x10   :  { %p5661_p7 = pnand %p5660_p6, %p5654_p3 }
  0x12   :  { %5664 = shalt.err (!%p5661_p7)
}
  0x13   :  { %s5830_s11 = smov 512   ;;  %s5831_s12 = smov 32  }
  0x14   :  { %38 = dma.hbm_to_vmem [thread:$0]  %s6034_s1, 196608, %s33_s25, [#allocation6], %s5830_s11, %s5830_s11, %s5831_s12  }
  0x15   :  { %s5832_s15 = smov [#allocation8]   ;;  %s5665_s19 = scalar_lea.hbm %s6036_s3, 16384 }
  0x16   :  { %s54_s16 = sshll.u32 %s5832_s15, 4  ;;  %p5666_p8 = scmp.ne.s32.totalorder %s6036_s3, %s5665_s19  ;;  %s55_s16 = int_to_ptr.vmem [resolvable:$true] %s54_s16 }
  0x17   :  { %p5669_p9 = scmp.lt.u32.totalorder %s5665_s19, %s6036_s3 }
  0x19   :  { %p5671_p10 = pnand %p5669_p9, %p5666_p8 }
  0x1b   :  { %5674 = shalt.err (!%p5671_p10)
}
  0x1c   :  { %s5675_s24 = scalar_lea.vmem %s55_s16, 16384  ;;  %p5680_p12 = scmp.lt.s32.totalorder %s55_s16, %s55_s16 }
  0x1d   :  { %p5676_p11 = scmp.ne.s32.totalorder %s55_s16, %s5675_s24  ;;  %p5681_p13 = scmp.lt.s32.totalorder %s5675_s24, %s5675_s24 }
  0x1f   :  { %p5682_p0 = por %p5681_p13, %p5680_p12 }
  0x21   :  { %p5683_p1 = pnand %p5682_p0, %p5676_p11 }
  0x23   :  { %5686 = shalt.err (!%p5683_p1)
}
  0x24   :  { %s5833_s1 = smov 256   ;;  %s5834_s25 = smov 16  }
  0x25   :  { %60 = dma.hbm_to_vmem [thread:$0]  %s6036_s3, 16384, %s55_s16, [#allocation9], %s5833_s1, %s5833_s1, %s5834_s25  }
  0x26   :  { %s5835_s28 = smov [#allocation11]   ;;  %s5687_s9 = scalar_lea.hbm %s6038_s5, 4096 }
  0x27   :  { %s76_s29 = sshll.u32 %s5835_s28, 4  ;;  %p5688_p2 = scmp.ne.s32.totalorder %s6038_s5, %s5687_s9  ;;  %s77_s29 = int_to_ptr.vmem [resolvable:$true] %s76_s29 }
  0x28   :  { %p5691_p3 = scmp.lt.u32.totalorder %s5687_s9, %s6038_s5 }
  0x2a   :  { %p5693_p4 = pnand %p5691_p3, %p5688_p2 }
  0x2c   :  { %5696 = shalt.err (!%p5693_p4)
}
  0x2d   :  { %s5697_s14 = scalar_lea.vmem %s77_s29, 4096  ;;  %p5702_p6 = scmp.lt.s32.totalorder %s77_s29, %s77_s29 }
  0x2e   :  { %p5698_p5 = scmp.ne.s32.totalorder %s77_s29, %s5697_s14  ;;  %p5703_p7 = scmp.lt.s32.totalorder %s5697_s14, %s5697_s14 }
  0x30   :  { %p5704_p8 = por %p5703_p7, %p5702_p6 }
  0x32   :  { %p5705_p9 = pnand %p5704_p8, %p5698_p5 }
  0x34   :  { %5708 = shalt.err (!%p5705_p9)
}
  0x35   :  { %s5836_s3 = smov 128   ;;  %s5837_s15 = smov 8  }
  0x36   :  { %82 = dma.hbm_to_vmem [thread:$0]  %s6038_s5, 4096, %s77_s29, [#allocation12], %s5836_s3, %s5836_s3, %s5837_s15  }
  0x37   :  { %s5838_s18 = smov [#allocation2]   ;;  %s5839_s20 = smov [#allocation7]  }
  0x38   :  { %s23_s19 = sshll.u32 %s5838_s18, 4  ;;  %s45_s21 = sshll.u32 %s5839_s20, 4  ;;  %s24_s19 = int_to_ptr.vmem [resolvable:$true] %s23_s19  ;;  %s46_s21 = int_to_ptr.vmem [resolvable:$true] %s45_s21 }
  0x39   :  { %s5709_s24 = scalar_lea.hbm %s6033_s0, 3072 }
  0x3a   :  { %p5710_p10 = scmp.ne.s32.totalorder %s6033_s0, %s5709_s24  ;;  %p5713_p11 = scmp.lt.u32.totalorder %s5709_s24, %s6033_s0 }
  0x3c   :  { %p5715_p12 = pnand %p5713_p11, %p5710_p10 }
  0x3e   :  { %5718 = shalt.err (!%p5715_p12)
}
  0x3f   :  { %s5719_s5 = scalar_lea.vmem %s24_s19, 3072  ;;  %p5724_p0 = scmp.lt.s32.totalorder %s24_s19, %s24_s19 }
  0x40   :  { %p5720_p13 = scmp.ne.s32.totalorder %s24_s19, %s5719_s5  ;;  %p5725_p1 = scmp.lt.s32.totalorder %s5719_s5, %s5719_s5 }
  0x42   :  { %p5726_p2 = por %p5725_p1, %p5724_p0 }
  0x44   :  { %p5727_p3 = pnand %p5726_p2, %p5720_p13 }
  0x46   :  { %5730 = shalt.err (!%p5727_p3)
}
  0x47   :  { %26 = dma.hbm_to_vmem [thread:$0]  %s6033_s0, 3072, %s24_s19, [#allocation3]  }
  0x48   :  { %s5731_s9 = scalar_lea.hbm %s6035_s2, 64 }
  0x49   :  { %p5732_p4 = scmp.ne.s32.totalorder %s6035_s2, %s5731_s9  ;;  %p5735_p5 = scmp.lt.u32.totalorder %s5731_s9, %s6035_s2 }
  0x4b   :  { %p5737_p6 = pnand %p5735_p5, %p5732_p4 }
  0x4d   :  { %5740 = shalt.err (!%p5737_p6)
}
  0x4e   :  { %s5741_s14 = scalar_lea.vmem %s46_s21, 64  ;;  %p5746_p8 = scmp.lt.s32.totalorder %s46_s21, %s46_s21 }
  0x4f   :  { %p5742_p7 = scmp.ne.s32.totalorder %s46_s21, %s5741_s14  ;;  %p5747_p9 = scmp.lt.s32.totalorder %s5741_s14, %s5741_s14 }
  0x51   :  { %p5748_p10 = por %p5747_p9, %p5746_p8 }
  0x53   :  { %p5749_p11 = pnand %p5748_p10, %p5742_p7 }
  0x55   :  { %5752 = shalt.err (!%p5749_p11)
}
  0x56   :  { %48 = dma.hbm_to_vmem [thread:$0]  %s6035_s2, 64, %s46_s21, [#allocation6]  }
  0x57   :  { %s5840_s15 = smov [#allocation10]   ;;  %s5841_s17 = smov [#allocation13]  }
  0x58   :  { %s67_s16 = sshll.u32 %s5840_s15, 4  ;;  %s89_s18 = sshll.u32 %s5841_s17, 4  ;;  %s68_s16 = int_to_ptr.vmem [resolvable:$true] %s67_s16  ;;  %s90_s18 = int_to_ptr.vmem [resolvable:$true] %s89_s18 }
  0x59   :  { %s5753_s22 = scalar_lea.hbm %s6037_s4, 32 }
  0x5a   :  { %p5754_p12 = scmp.ne.s32.totalorder %s6037_s4, %s5753_s22  ;;  %p5757_p13 = scmp.lt.u32.totalorder %s5753_s22, %s6037_s4 }
  0x5c   :  { %p5759_p0 = pnand %p5757_p13, %p5754_p12 }
  0x5e   :  { %5762 = shalt.err (!%p5759_p0)
}
  0x5f   :  { %s5763_s2 = scalar_lea.vmem %s68_s16, 32  ;;  %p5768_p2 = scmp.lt.s32.totalorder %s68_s16, %s68_s16 }
  0x60   :  { %p5764_p1 = scmp.ne.s32.totalorder %s68_s16, %s5763_s2  ;;  %p5769_p3 = scmp.lt.s32.totalorder %s5763_s2, %s5763_s2 }
  0x62   :  { %p5770_p4 = por %p5769_p3, %p5768_p2 }
  0x64   :  { %p5771_p5 = pnand %p5770_p4, %p5764_p1 }
  0x66   :  { %5774 = shalt.err (!%p5771_p5)
}
  0x67   :  { %70 = dma.hbm_to_vmem [thread:$0]  %s6037_s4, 32, %s68_s16, [#allocation9]  }
  0x68   :  { %s5775_s28 = scalar_lea.hbm %s6039_s6, 16 }
  0x69   :  { %p5776_p6 = scmp.ne.s32.totalorder %s6039_s6, %s5775_s28  ;;  %p5779_p7 = scmp.lt.u32.totalorder %s5775_s28, %s6039_s6 }
  0x6b   :  { %p5781_p8 = pnand %p5779_p7, %p5776_p6 }
  0x6d   :  { %5784 = shalt.err (!%p5781_p8)
}
  0x6e   :  { %s5785_s10 = scalar_lea.vmem %s90_s18, 16  ;;  %s5789_s11 = scalar_lea.vmem %s90_s18, 32 }
  0x6f   :  { %p5786_p9 = scmp.ne.s32.totalorder %s90_s18, %s5785_s10  ;;  %p5790_p10 = scmp.lt.s32.totalorder %s90_s18, %s90_s18 }
  0x70   :  { %p5791_p11 = scmp.lt.s32.totalorder %s5789_s11, %s5785_s10 }
  0x72   :  { %p5792_p12 = por %p5791_p11, %p5790_p10 }
  0x74   :  { %p5793_p13 = pnand %p5792_p12, %p5786_p9 }
  0x76   :  { %5796 = shalt.err (!%p5793_p13)
}
  0x77   :  { %92 = dma.hbm_to_vmem [thread:$0]  %s6039_s6, 16, %s90_s18, [#allocation12]  }
  0x78   :  { %5819 = dma.done.wait [#allocation3], 3072  }
  0x79   :  { %5820 = vsyncadd [#allocation3], 4294964224 }
  0x7a   :  { %5821 = dma.done.wait [#allocation6], 196672  }
  0x7b   :  { %5822 = vsyncadd [#allocation6], 4294770624 }
  0x7c   :  { %5823 = dma.done.wait [#allocation9], 16416  }
  0x7d   :  { %5824 = vsyncadd [#allocation9], 4294950880 }
  0x7e   :  { %5825 = dma.done.wait [#allocation12], 4112  }
  0x7f   :  { %5826 = vsyncadd [#allocation12], 4294963184  ;;  %v139_v0 = vld [vmem:[#allocation5 + $0x8] sm:$0xff]  ;;  %v138_v5 = vld [vmem:[#allocation5] sm:$0xff]  ;;  %s5842_s6 = smov [#allocation14]  }
  0x80   :  { %v143_v1 = vld [vmem:[#allocation5 + $0x28] sm:$0xff]  ;;  %v142_v6 = vld [vmem:[#allocation5 + $0x20] sm:$0xff]  ;;  %s3816_s13 = sshll.u32 %s5842_s6, 4  ;;  %s3817_s13 = int_to_ptr.vmem [resolvable:$true] %s3816_s13 }
  0x81   :  { %v267_v2 = vld [vmem:[#allocation5 + $0x408] sm:$0xff]  ;;  %v3864_v3 = vpack.c.bf16 %v143_v1, %v139_v0  ;;  %v3866_v8 = vpack.c.bf16 %v142_v6, %v138_v5  ;;  %v266_v9 = vld [vmem:[#allocation5 + $0x400] sm:$0xff]  ;;  %s5797_s14 = scalar_lea.vmem %s3817_s13, 128  ;;  %p5802_p1 = scmp.lt.s32.totalorder %s3817_s13, %s3817_s13 }
  0x82   :  { %v271_v4 = vld [vmem:[#allocation5 + $0x428] sm:$0xff]  ;;  %v270_v10 = vld [vmem:[#allocation5 + $0x420] sm:$0xff]  ;;  %p5798_p0 = scmp.ne.s32.totalorder %s3817_s13, %s5797_s14  ;;  %p5803_p2 = scmp.lt.s32.totalorder %s5797_s14, %s5797_s14 }
  0x83   :  { %v3928_v7 = vpack.c.bf16 %v271_v4, %v267_v2  ;;  %v147_v11 = vld [vmem:[#allocation5 + $0x48] sm:$0xff]  ;;  %3865 = vmatprep.subr.bf16.mxu1 %v3864_v3  ;;  %v3930_v12 = vpack.c.bf16 %v270_v10, %v266_v9  ;;  %v146_v18 = vld [vmem:[#allocation5 + $0x40] sm:$0xff] }
  0x84   :  { %v151_v13 = vld [vmem:[#allocation5 + $0x68] sm:$0xff]  ;;  %3867 = vmatpush1.bf16.msra.mxu1 %v3866_v8  ;;  %v150_v19 = vld [vmem:[#allocation5 + $0x60] sm:$0xff]  ;;  %p5804_p3 = por %p5803_p2, %p5802_p1 }
  0x85   :  { %v275_v14 = vld [vmem:[#allocation5 + $0x448] sm:$0xff]  ;;  %3929 = vmatprep.subr.bf16.mxu0 %v3928_v7  ;;  %v3868_v16 = vpack.c.bf16 %v151_v13, %v147_v11  ;;  %v274_v20 = vld [vmem:[#allocation5 + $0x440] sm:$0xff]  ;;  %v3870_v21 = vpack.c.bf16 %v150_v19, %v146_v18 }
  0x86   :  { %v279_v15 = vld [vmem:[#allocation5 + $0x468] sm:$0xff]  ;;  %3931 = vmatpush1.bf16.msra.mxu0 %v3930_v12  ;;  %v278_v22 = vld [vmem:[#allocation5 + $0x460] sm:$0xff]  ;;  %p5805_p4 = pnand %p5804_p3, %p5798_p0 }
  0x87   :  { %v3932_v17 = vpack.c.bf16 %v279_v15, %v275_v14  ;;  %v155_v23 = vld [vmem:[#allocation5 + $0x88] sm:$0xff]  ;;  %3869 = vmatprep.subr.bf16.mxu1 %v3868_v16  ;;  %v3934_v25 = vpack.c.bf16 %v278_v22, %v274_v20  ;;  %v154_v29 = vld [vmem:[#allocation5 + $0x80] sm:$0xff] }
  0x88   :  { %v159_v24 = vld [vmem:[#allocation5 + $0xa8] sm:$0xff]  ;;  %v158_v31 = vld [vmem:[#allocation5 + $0xa0] sm:$0xff]  ;;  %3871 = vmatpush1.bf16.msra.mxu1 %v3870_v21 }
  0x89   :  { %3933 = vmatprep.subr.bf16.mxu0 %v3932_v17  ;;  %v3872_v26 = vpack.c.bf16 %v159_v24, %v155_v23  ;;  %v283_v27 = vld [vmem:[#allocation5 + $0x488] sm:$0xff]  ;;  %v282_v32 = vld [vmem:[#allocation5 + $0x480] sm:$0xff]  ;;  %v3874_v34 = vpack.c.bf16 %v158_v31, %v154_v29 }
  0x8a   :  { %v287_v28 = vld [vmem:[#allocation5 + $0x4a8] sm:$0xff]  ;;  %v286_v33 = vld [vmem:[#allocation5 + $0x4a0] sm:$0xff]  ;;  %3935 = vmatpush1.bf16.msra.mxu0 %v3934_v25 }
  0x8b   :  { %v3936_v30 = vpack.c.bf16 %v287_v28, %v283_v27  ;;  %v163_v35 = vld [vmem:[#allocation5 + $0xc8] sm:$0xff]  ;;  %3873 = vmatprep.subr.bf16.mxu1 %v3872_v26  ;;  %v3938_v38 = vpack.c.bf16 %v286_v33, %v282_v32  ;;  %v162_v41 = vld [vmem:[#allocation5 + $0xc0] sm:$0xff] }
  0x8c   :  { %v167_v36 = vld [vmem:[#allocation5 + $0xe8] sm:$0xff]  ;;  %v166_v42 = vld [vmem:[#allocation5 + $0xe0] sm:$0xff]  ;;  %3875 = vmatpush1.bf16.msra.mxu1 %v3874_v34 }
  0x8d   :  { %v291_v37 = vld [vmem:[#allocation5 + $0x4c8] sm:$0xff]  ;;  %v3876_v39 = vpack.c.bf16 %v167_v36, %v163_v35  ;;  %3937 = vmatprep.subr.bf16.mxu0 %v3936_v30  ;;  %v290_v44 = vld [vmem:[#allocation5 + $0x4c0] sm:$0xff]  ;;  %v3878_v50 = vpack.c.bf16 %v166_v42, %v162_v41 }
  0x8e   :  { %v295_v40 = vld [vmem:[#allocation5 + $0x4e8] sm:$0xff]  ;;  %v294_v45 = vld [vmem:[#allocation5 + $0x4e0] sm:$0xff]  ;;  %3939 = vmatpush1.bf16.msra.mxu0 %v3938_v38 }
  0x8f   :  { %v3940_v43 = vpack.c.bf16 %v295_v40, %v291_v37  ;;  %v171_v46 = vld [vmem:[#allocation5 + $0x108] sm:$0xff]  ;;  %3877 = vmatprep.subr.bf16.mxu1 %v3876_v39  ;;  %v3942_v51 = vpack.c.bf16 %v294_v45, %v290_v44  ;;  %v170_v53 = vld [vmem:[#allocation5 + $0x100] sm:$0xff] }
  0x90   :  { %v175_v47 = vld [vmem:[#allocation5 + $0x128] sm:$0xff]  ;;  %v174_v54 = vld [vmem:[#allocation5 + $0x120] sm:$0xff]  ;;  %3879 = vmatpush1.bf16.msra.mxu1 %v3878_v50 }
  0x91   :  { %v299_v48 = vld [vmem:[#allocation5 + $0x508] sm:$0xff]  ;;  %v3880_v52 = vpack.c.bf16 %v175_v47, %v171_v46  ;;  %v298_v55 = vld [vmem:[#allocation5 + $0x500] sm:$0xff]  ;;  %3941 = vmatprep.subr.bf16.mxu0 %v3940_v43  ;;  %v3882_v62 = vpack.c.bf16 %v174_v54, %v170_v53 }
  0x92   :  { %v303_v49 = vld [vmem:[#allocation5 + $0x528] sm:$0xff]  ;;  %v302_v57 = vld [vmem:[#allocation5 + $0x520] sm:$0xff]  ;;  %3943 = vmatpush1.bf16.msra.mxu0 %v3942_v51 }
  0x93   :  { %v3944_v56 = vpack.c.bf16 %v303_v49, %v299_v48  ;;  %v179_v58 = vld [vmem:[#allocation5 + $0x148] sm:$0xff]  ;;  %3881 = vmatprep.subr.bf16.mxu1 %v3880_v52  ;;  %v3946_v63 = vpack.c.bf16 %v302_v57, %v298_v55  ;;  %v178_v1 = vld [vmem:[#allocation5 + $0x140] sm:$0xff] }
  0x94   :  { %v183_v59 = vld [vmem:[#allocation5 + $0x168] sm:$0xff]  ;;  %v182_v2 = vld [vmem:[#allocation5 + $0x160] sm:$0xff]  ;;  %3883 = vmatpush1.bf16.msra.mxu1 %v3882_v62 }
  0x95   :  { %v307_v60 = vld [vmem:[#allocation5 + $0x548] sm:$0xff]  ;;  %v3884_v0 = vpack.c.bf16 %v183_v59, %v179_v58  ;;  %v306_v3 = vld [vmem:[#allocation5 + $0x540] sm:$0xff]  ;;  %3945 = vmatprep.subr.bf16.mxu0 %v3944_v56  ;;  %v3886_v10 = vpack.c.bf16 %v182_v2, %v178_v1 }
  0x96   :  { %v311_v61 = vld [vmem:[#allocation5 + $0x568] sm:$0xff]  ;;  %v310_v5 = vld [vmem:[#allocation5 + $0x560] sm:$0xff]  ;;  %3947 = vmatpush1.bf16.msra.mxu0 %v3946_v63 }
  0x97   :  { %v3948_v4 = vpack.c.bf16 %v311_v61, %v307_v60  ;;  %v187_v6 = vld [vmem:[#allocation5 + $0x188] sm:$0xff]  ;;  %3885 = vmatprep.subr.bf16.mxu1 %v3884_v0  ;;  %v3950_v11 = vpack.c.bf16 %v310_v5, %v306_v3  ;;  %v186_v13 = vld [vmem:[#allocation5 + $0x180] sm:$0xff] }
  0x98   :  { %v191_v7 = vld [vmem:[#allocation5 + $0x1a8] sm:$0xff]  ;;  %v190_v14 = vld [vmem:[#allocation5 + $0x1a0] sm:$0xff]  ;;  %3887 = vmatpush1.bf16.msra.mxu1 %v3886_v10 }
  0x99   :  { %v315_v8 = vld [vmem:[#allocation5 + $0x588] sm:$0xff]  ;;  %v3888_v12 = vpack.c.bf16 %v191_v7, %v187_v6  ;;  %v314_v15 = vld [vmem:[#allocation5 + $0x580] sm:$0xff]  ;;  %3949 = vmatprep.subr.bf16.mxu0 %v3948_v4  ;;  %v3890_v22 = vpack.c.bf16 %v190_v14, %v186_v13 }
  0x9a   :  { %v319_v9 = vld [vmem:[#allocation5 + $0x5a8] sm:$0xff]  ;;  %v318_v17 = vld [vmem:[#allocation5 + $0x5a0] sm:$0xff]  ;;  %3951 = vmatpush1.bf16.msra.mxu0 %v3950_v11 }
  0x9b   :  { %v3952_v16 = vpack.c.bf16 %v319_v9, %v315_v8  ;;  %v195_v18 = vld [vmem:[#allocation5 + $0x1c8] sm:$0xff]  ;;  %3889 = vmatprep.subr.bf16.mxu1 %v3888_v12  ;;  %v3954_v23 = vpack.c.bf16 %v318_v17, %v314_v15  ;;  %v194_v25 = vld [vmem:[#allocation5 + $0x1c0] sm:$0xff] }
  0x9c   :  { %v199_v19 = vld [vmem:[#allocation5 + $0x1e8] sm:$0xff]  ;;  %v198_v26 = vld [vmem:[#allocation5 + $0x1e0] sm:$0xff]  ;;  %3891 = vmatpush1.bf16.msra.mxu1 %v3890_v22 }
  0x9d   :  { %v323_v20 = vld [vmem:[#allocation5 + $0x5c8] sm:$0xff]  ;;  %v3892_v24 = vpack.c.bf16 %v199_v19, %v195_v18  ;;  %v322_v27 = vld [vmem:[#allocation5 + $0x5c0] sm:$0xff]  ;;  %3953 = vmatprep.subr.bf16.mxu0 %v3952_v16  ;;  %v3894_v34 = vpack.c.bf16 %v198_v26, %v194_v25  ;;  %v5970_v19 = vld [vmem:[#allocation2 + $0x18] sm:$0xff] }
  0x9e   :  { %v327_v21 = vld [vmem:[#allocation5 + $0x5e8] sm:$0xff]  ;;  %v326_v29 = vld [vmem:[#allocation5 + $0x5e0] sm:$0xff]  ;;  %3955 = vmatpush1.bf16.msra.mxu0 %v3954_v23  ;;  %1831 = vmatprep.mubr.f32.mxu0 %v5970_v19 }
  0x9f   :  { %v3956_v28 = vpack.c.bf16 %v327_v21, %v323_v20  ;;  %v203_v30 = vld [vmem:[#allocation5 + $0x208] sm:$0xff]  ;;  %3893 = vmatprep.subr.bf16.mxu1 %v3892_v24  ;;  %v3958_v35 = vpack.c.bf16 %v326_v29, %v322_v27  ;;  %v202_v37 = vld [vmem:[#allocation5 + $0x200] sm:$0xff] }
  0xa0   :  { %v207_v31 = vld [vmem:[#allocation5 + $0x228] sm:$0xff]  ;;  %v206_v38 = vld [vmem:[#allocation5 + $0x220] sm:$0xff]  ;;  %3895 = vmatpush1.bf16.msra.mxu1 %v3894_v34 }
  0xa1   :  { %v331_v32 = vld [vmem:[#allocation5 + $0x608] sm:$0xff]  ;;  %v3896_v36 = vpack.c.bf16 %v207_v31, %v203_v30  ;;  %v330_v39 = vld [vmem:[#allocation5 + $0x600] sm:$0xff]  ;;  %3957 = vmatprep.subr.bf16.mxu0 %v3956_v28  ;;  %v3898_v46 = vpack.c.bf16 %v206_v38, %v202_v37 }
  0xa2   :  { %v335_v33 = vld [vmem:[#allocation5 + $0x628] sm:$0xff]  ;;  %v334_v41 = vld [vmem:[#allocation5 + $0x620] sm:$0xff]  ;;  %3959 = vmatpush1.bf16.msra.mxu0 %v3958_v35 }
  0xa3   :  { %v3960_v40 = vpack.c.bf16 %v335_v33, %v331_v32  ;;  %v211_v42 = vld [vmem:[#allocation5 + $0x248] sm:$0xff]  ;;  %3897 = vmatprep.subr.bf16.mxu1 %v3896_v36  ;;  %v3962_v47 = vpack.c.bf16 %v334_v41, %v330_v39  ;;  %v210_v49 = vld [vmem:[#allocation5 + $0x240] sm:$0xff] }
  0xa4   :  { %v215_v43 = vld [vmem:[#allocation5 + $0x268] sm:$0xff]  ;;  %v214_v50 = vld [vmem:[#allocation5 + $0x260] sm:$0xff]  ;;  %3899 = vmatpush1.bf16.msra.mxu1 %v3898_v46 }
  0xa5   :  { %v339_v44 = vld [vmem:[#allocation5 + $0x648] sm:$0xff]  ;;  %v3900_v48 = vpack.c.bf16 %v215_v43, %v211_v42  ;;  %v338_v51 = vld [vmem:[#allocation5 + $0x640] sm:$0xff]  ;;  %3961 = vmatprep.subr.bf16.mxu0 %v3960_v40  ;;  %v3902_v58 = vpack.c.bf16 %v214_v50, %v210_v49 }
  0xa6   :  { %v343_v45 = vld [vmem:[#allocation5 + $0x668] sm:$0xff]  ;;  %v342_v53 = vld [vmem:[#allocation5 + $0x660] sm:$0xff]  ;;  %3963 = vmatpush1.bf16.msra.mxu0 %v3962_v47 }
  0xa7   :  { %v3964_v52 = vpack.c.bf16 %v343_v45, %v339_v44  ;;  %v219_v54 = vld [vmem:[#allocation5 + $0x288] sm:$0xff]  ;;  %3901 = vmatprep.subr.bf16.mxu1 %v3900_v48  ;;  %v3966_v59 = vpack.c.bf16 %v342_v53, %v338_v51  ;;  %v218_v61 = vld [vmem:[#allocation5 + $0x280] sm:$0xff] }
  0xa8   :  { %v223_v55 = vld [vmem:[#allocation5 + $0x2a8] sm:$0xff]  ;;  %v222_v62 = vld [vmem:[#allocation5 + $0x2a0] sm:$0xff]  ;;  %3903 = vmatpush1.bf16.msra.mxu1 %v3902_v58 }
  0xa9   :  { %v347_v56 = vld [vmem:[#allocation5 + $0x688] sm:$0xff]  ;;  %v3904_v60 = vpack.c.bf16 %v223_v55, %v219_v54  ;;  %v346_v63 = vld [vmem:[#allocation5 + $0x680] sm:$0xff]  ;;  %3965 = vmatprep.subr.bf16.mxu0 %v3964_v52  ;;  %v3906_v6 = vpack.c.bf16 %v222_v62, %v218_v61 }
  0xaa   :  { %v351_v57 = vld [vmem:[#allocation5 + $0x6a8] sm:$0xff]  ;;  %v350_v1 = vld [vmem:[#allocation5 + $0x6a0] sm:$0xff]  ;;  %3967 = vmatpush1.bf16.msra.mxu0 %v3966_v59 }
  0xab   :  { %v3968_v0 = vpack.c.bf16 %v351_v57, %v347_v56  ;;  %v227_v2 = vld [vmem:[#allocation5 + $0x2c8] sm:$0xff]  ;;  %v226_v7 = vld [vmem:[#allocation5 + $0x2c0] sm:$0xff]  ;;  %3905 = vmatprep.subr.bf16.mxu1 %v3904_v60  ;;  %v3970_v8 = vpack.c.bf16 %v350_v1, %v346_v63  ;;  %v145_v1 = vld [vmem:[#allocation5 + $0x38] sm:$0xff] }
  0xac   :  { %v231_v3 = vld [vmem:[#allocation5 + $0x2e8] sm:$0xff]  ;;  %v230_v10 = vld [vmem:[#allocation5 + $0x2e0] sm:$0xff]  ;;  %3907 = vmatpush1.bf16.msra.mxu1 %v3906_v6 }
  0xad   :  { %v355_v4 = vld [vmem:[#allocation5 + $0x6c8] sm:$0xff]  ;;  %v3908_v9 = vpack.c.bf16 %v231_v3, %v227_v2  ;;  %v354_v11 = vld [vmem:[#allocation5 + $0x6c0] sm:$0xff]  ;;  %3969 = vmatprep.subr.bf16.mxu0 %v3968_v0  ;;  %v3910_v20 = vpack.c.bf16 %v230_v10, %v226_v7  ;;  %v141_v0 = vld [vmem:[#allocation5 + $0x18] sm:$0xff] }
  0xae   :  { %v359_v5 = vld [vmem:[#allocation5 + $0x6e8] sm:$0xff]  ;;  %v358_v12 = vld [vmem:[#allocation5 + $0x6e0] sm:$0xff]  ;;  %3971 = vmatpush1.bf16.msra.mxu0 %v3970_v8  ;;  %v4632_v6 = vpack.c.bf16 %v145_v1, %v141_v0  ;;  %v140_v8 = vld [vmem:[#allocation5 + $0x10] sm:$0xff] }
  0xaf   :  { %v3972_v13 = vpack.c.bf16 %v359_v5, %v355_v4  ;;  %v235_v14 = vld [vmem:[#allocation5 + $0x308] sm:$0xff]  ;;  %3909 = vmatprep.subr.bf16.mxu1 %v3908_v9  ;;  %v3974_v21 = vpack.c.bf16 %v358_v12, %v354_v11  ;;  %v234_v23 = vld [vmem:[#allocation5 + $0x300] sm:$0xff]  ;;  %v144_v9 = vld [vmem:[#allocation5 + $0x30] sm:$0xff] }
  0xb0   :  { %v239_v15 = vld [vmem:[#allocation5 + $0x328] sm:$0xff]  ;;  %v238_v24 = vld [vmem:[#allocation5 + $0x320] sm:$0xff]  ;;  %3911 = vmatpush1.bf16.msra.mxu1 %v3910_v20  ;;  %v149_v12 = vld [vmem:[#allocation5 + $0x58] sm:$0xff]  ;;  %v4634_v20 = vpack.c.bf16 %v144_v9, %v140_v8 }
  0xb1   :  { %v5967_v16 = vld [vmem:[#allocation2 + $0x8] sm:$0xff]  ;;  %v3912_v22 = vpack.c.bf16 %v239_v15, %v235_v14  ;;  %v362_v25 = vld [vmem:[#allocation5 + $0x700] sm:$0xff]  ;;  %3973 = vmatprep.subr.bf16.mxu0 %v3972_v13  ;;  %v3914_v32 = vpack.c.bf16 %v238_v24, %v234_v23  ;;  %v153_v13 = vld [vmem:[#allocation5 + $0x78] sm:$0xff] }
  0xb2   :  { %v363_v17 = vld [vmem:[#allocation5 + $0x708] sm:$0xff]  ;;  %1760 = vmatprep.mubr.f32.mxu1 %v5967_v16  ;;  %v366_v27 = vld [vmem:[#allocation5 + $0x720] sm:$0xff]  ;;  %3975 = vmatpush1.bf16.msra.mxu0 %v3974_v21  ;;  %v148_v24 = vld [vmem:[#allocation5 + $0x50] sm:$0xff] }
  0xb3   :  { %v367_v18 = vld [vmem:[#allocation5 + $0x728] sm:$0xff]  ;;  %3913 = vmatprep.subr.bf16.mxu1 %v3912_v22  ;;  %v3978_v33 = vpack.c.bf16 %v366_v27, %v362_v25  ;;  %v242_v35 = vld [vmem:[#allocation5 + $0x340] sm:$0xff]  ;;  %v4636_v22 = vpack.c.bf16 %v153_v13, %v149_v12  ;;  %v152_v25 = vld [vmem:[#allocation5 + $0x70] sm:$0xff] }
  0xb4   :  { %v3976_v26 = vpack.c.bf16 %v367_v18, %v363_v17  ;;  %v243_v28 = vld [vmem:[#allocation5 + $0x348] sm:$0xff]  ;;  %v246_v36 = vld [vmem:[#allocation5 + $0x360] sm:$0xff]  ;;  %3915 = vmatpush1.bf16.msra.mxu1 %v3914_v32  ;;  %v116_v18 = vld [vmem:[#allocation2 + $0x10] sm:$0xff]  ;;  %v4638_v32 = vpack.c.bf16 %v152_v25, %v148_v24 }
  0xb5   :  { %v247_v29 = vld [vmem:[#allocation5 + $0x368] sm:$0xff]  ;;  %v370_v37 = vld [vmem:[#allocation5 + $0x740] sm:$0xff]  ;;  %v3918_v44 = vpack.c.bf16 %v246_v36, %v242_v35  ;;  %v156_v36 = vld [vmem:[#allocation5 + $0x90] sm:$0xff] }
  0xb6   :  { %v371_v30 = vld [vmem:[#allocation5 + $0x748] sm:$0xff]  ;;  %v3916_v34 = vpack.c.bf16 %v247_v29, %v243_v28  ;;  %3977 = vmatprep.subr.bf16.mxu0 %v3976_v26  ;;  %v374_v39 = vld [vmem:[#allocation5 + $0x760] sm:$0xff]  ;;  %v157_v28 = vld [vmem:[#allocation5 + $0x98] sm:$0xff] }
  0xb7   :  { %v375_v31 = vld [vmem:[#allocation5 + $0x768] sm:$0xff]  ;;  %3979 = vmatpush1.bf16.msra.mxu0 %v3978_v33  ;;  %v3982_v45 = vpack.c.bf16 %v374_v39, %v370_v37  ;;  %v250_v47 = vld [vmem:[#allocation5 + $0x380] sm:$0xff]  ;;  %v161_v29 = vld [vmem:[#allocation5 + $0xb8] sm:$0xff] }
  0xb8   :  { %v3980_v38 = vpack.c.bf16 %v375_v31, %v371_v30  ;;  %v251_v40 = vld [vmem:[#allocation5 + $0x388] sm:$0xff]  ;;  %3917 = vmatprep.subr.bf16.mxu1 %v3916_v34  ;;  %v254_v48 = vld [vmem:[#allocation5 + $0x3a0] sm:$0xff]  ;;  %v4640_v34 = vpack.c.bf16 %v161_v29, %v157_v28  ;;  %v160_v37 = vld [vmem:[#allocation5 + $0xb0] sm:$0xff] }
  0xb9   :  { %v255_v41 = vld [vmem:[#allocation5 + $0x3a8] sm:$0xff]  ;;  %v378_v49 = vld [vmem:[#allocation5 + $0x780] sm:$0xff]  ;;  %3919 = vmatpush1.bf16.msra.mxu1 %v3918_v44  ;;  %v3922_v56 = vpack.c.bf16 %v254_v48, %v250_v47  ;;  %v4642_v44 = vpack.c.bf16 %v160_v37, %v156_v36  ;;  %v164_v48 = vld [vmem:[#allocation5 + $0xd0] sm:$0xff] }
  0xba   :  { %v379_v42 = vld [vmem:[#allocation5 + $0x788] sm:$0xff]  ;;  %v3920_v46 = vpack.c.bf16 %v255_v41, %v251_v40  ;;  %3981 = vmatprep.subr.bf16.mxu0 %v3980_v38  ;;  %v382_v51 = vld [vmem:[#allocation5 + $0x7a0] sm:$0xff]  ;;  %v165_v40 = vld [vmem:[#allocation5 + $0xd8] sm:$0xff] }
  0xbb   :  { %v383_v43 = vld [vmem:[#allocation5 + $0x7a8] sm:$0xff]  ;;  %3983 = vmatpush1.bf16.msra.mxu0 %v3982_v45  ;;  %v3986_v57 = vpack.c.bf16 %v382_v51, %v378_v49  ;;  %v258_v59 = vld [vmem:[#allocation5 + $0x3c0] sm:$0xff]  ;;  %v169_v41 = vld [vmem:[#allocation5 + $0xf8] sm:$0xff] }
  0xbc   :  { %v3984_v50 = vpack.c.bf16 %v383_v43, %v379_v42  ;;  %v259_v52 = vld [vmem:[#allocation5 + $0x3c8] sm:$0xff]  ;;  %3921 = vmatprep.subr.bf16.mxu1 %v3920_v46  ;;  %v262_v60 = vld [vmem:[#allocation5 + $0x3e0] sm:$0xff]  ;;  %v4644_v46 = vpack.c.bf16 %v169_v41, %v165_v40  ;;  %v168_v49 = vld [vmem:[#allocation5 + $0xf0] sm:$0xff] }
  0xbd   :  { %v263_v53 = vld [vmem:[#allocation5 + $0x3e8] sm:$0xff]  ;;  %v386_v61 = vld [vmem:[#allocation5 + $0x7c0] sm:$0xff]  ;;  %3923 = vmatpush1.bf16.msra.mxu1 %v3922_v56  ;;  %v3926_v4 = vpack.c.bf16 %v262_v60, %v258_v59  ;;  %v172_v59 = vld [vmem:[#allocation5 + $0x110] sm:$0xff] }
  0xbe   :  { %v387_v54 = vld [vmem:[#allocation5 + $0x7c8] sm:$0xff]  ;;  %v3924_v58 = vpack.c.bf16 %v263_v53, %v259_v52  ;;  %3985 = vmatprep.subr.bf16.mxu0 %v3984_v50  ;;  %v390_v63 = vld [vmem:[#allocation5 + $0x7e0] sm:$0xff]  ;;  %v173_v52 = vld [vmem:[#allocation5 + $0x118] sm:$0xff] }
  0xbf   :  { %v391_v55 = vld [vmem:[#allocation5 + $0x7e8] sm:$0xff]  ;;  %3987 = vmatpush1.bf16.msra.mxu0 %v3986_v57  ;;  %v3990_v5 = vpack.c.bf16 %v390_v63, %v386_v61  ;;  %v394_v7 = vld [vmem:[#allocation5 + $0x800] sm:$0xff]  ;;  %v177_v53 = vld [vmem:[#allocation5 + $0x138] sm:$0xff] }
  0xc0   :  { %v3988_v62 = vpack.c.bf16 %v391_v55, %v387_v54  ;;  %v395_v2 = vld [vmem:[#allocation5 + $0x808] sm:$0xff]  ;;  %3925 = vmatprep.subr.bf16.mxu1 %v3924_v58  ;;  %v398_v11 = vld [vmem:[#allocation5 + $0x820] sm:$0xff]  ;;  %v4648_v57 = vpack.c.bf16 %v177_v53, %v173_v52  ;;  %v176_v60 = vld [vmem:[#allocation5 + $0x130] sm:$0xff] }
  0xc1   :  { %v399_v3 = vld [vmem:[#allocation5 + $0x828] sm:$0xff]  ;;  %3927 = vmatpush1.bf16.msra.mxu1 %v3926_v4  ;;  %v5973_v17 = vld [vmem:[#allocation2] sm:$0xff]  ;;  %v3994_v21 = vpack.c.bf16 %v398_v11, %v394_v7  ;;  %v181_v63 = vld [vmem:[#allocation5 + $0x158] sm:$0xff] }
  0xc2   :  { %3989 = vmatprep.subr.bf16.mxu0 %v3988_v62  ;;  %v3992_v10 = vpack.c.bf16 %v399_v3, %v395_v2  ;;  %v403_v14 = vld [vmem:[#allocation5 + $0x848] sm:$0xff]  ;;  %4633 = vmatprep.subr.bf16.mxu1 %v4632_v6  ;;  %v402_v23 = vld [vmem:[#allocation5 + $0x840] sm:$0xff]  ;;  %v185_v0 = vld [vmem:[#allocation5 + $0x178] sm:$0xff]  ;;  %v4650_v3 = vpack.c.bf16 %v176_v60, %v172_v59 }
  0xc3   :  { %v407_v15 = vld [vmem:[#allocation5 + $0x868] sm:$0xff]  ;;  %3991 = vmatpush1.bf16.msra.mxu0 %v3990_v5  ;;  %v406_v27 = vld [vmem:[#allocation5 + $0x860] sm:$0xff]  ;;  %v4652_v5 = vpack.c.bf16 %v185_v0, %v181_v63  ;;  %v180_v7 = vld [vmem:[#allocation5 + $0x150] sm:$0xff] }
  0xc4   :  { %3993 = vmatprep.subr.bf16.mxu0 %v3992_v10  ;;  %v3996_v26 = vpack.c.bf16 %v407_v15, %v403_v14  ;;  %1761 = vmatmul.mubr.f32.vlgmr.msra.gmra.mrb[0].mxu1 %v5973_v17  ;;  %v411_v30 = vld [vmem:[#allocation5 + $0x888] sm:$0xff]  ;;  %v3998_v33 = vpack.c.bf16 %v406_v27, %v402_v23  ;;  %v410_v35 = vld [vmem:[#allocation5 + $0x880] sm:$0xff]  ;;  %v184_v8 = vld [vmem:[#allocation5 + $0x170] sm:$0xff] }
  0xc5   :  { %v415_v31 = vld [vmem:[#allocation5 + $0x8a8] sm:$0xff]  ;;  %4635 = vmatpush1.bf16.msra.mxu1 %v4634_v20  ;;  %v414_v39 = vld [vmem:[#allocation5 + $0x8a0] sm:$0xff]  ;;  %2612 = vmatprep.mubr.f32.mxu1 %v5967_v16  ;;  %v4646_v16 = vpack.c.bf16 %v168_v49, %v164_v48  ;;  %v189_v11 = vld [vmem:[#allocation5 + $0x198] sm:$0xff]  ;;  %v4654_v15 = vpack.c.bf16 %v184_v8, %v180_v7 }
  0xc6   :  { %1832 = vmatmul.mubr.f32.vlgmr.msra.gmra.mrb[0].mxu0 %v116_v18  ;;  %4637 = vmatprep.subr.bf16.mxu1 %v4636_v22  ;;  %v4000_v38 = vpack.c.bf16 %v415_v31, %v411_v30  ;;  %v419_v42 = vld [vmem:[#allocation5 + $0x8c8] sm:$0xff]  ;;  %v4002_v45 = vpack.c.bf16 %v414_v39, %v410_v35  ;;  %v418_v47 = vld [vmem:[#allocation5 + $0x8c0] sm:$0xff]  ;;  %v193_v12 = vld [vmem:[#allocation5 + $0x1b8] sm:$0xff] }
  0xc7   :  { %3995 = vmatpush1.bf16.msra.mxu0 %v3994_v21  ;;  %v423_v43 = vld [vmem:[#allocation5 + $0x8e8] sm:$0xff]  ;;  %v422_v51 = vld [vmem:[#allocation5 + $0x8e0] sm:$0xff]  ;;  %v4656_v21 = vpack.c.bf16 %v193_v12, %v189_v11  ;;  %v188_v23 = vld [vmem:[#allocation5 + $0x190] sm:$0xff] }
  0xc8   :  { %3997 = vmatprep.subr.bf16.mxu0 %v3996_v26  ;;  %v4004_v50 = vpack.c.bf16 %v423_v43, %v419_v42  ;;  %v427_v54 = vld [vmem:[#allocation5 + $0x908] sm:$0xff]  ;;  %v4006_v56 = vpack.c.bf16 %v422_v51, %v418_v47  ;;  %v426_v58 = vld [vmem:[#allocation5 + $0x900] sm:$0xff]  ;;  %v192_v24 = vld [vmem:[#allocation5 + $0x1b0] sm:$0xff] }
  0xc9   :  { %4639 = vmatpush1.bf16.msra.mxu1 %v4638_v32  ;;  %v431_v55 = vld [vmem:[#allocation5 + $0x928] sm:$0xff]  ;;  %v430_v62 = vld [vmem:[#allocation5 + $0x920] sm:$0xff]  ;;  %v197_v26 = vld [vmem:[#allocation5 + $0x1d8] sm:$0xff]  ;;  %v4658_v31 = vpack.c.bf16 %v192_v24, %v188_v23 }
  0xca   :  { %4641 = vmatprep.subr.bf16.mxu1 %v4640_v34  ;;  %v4008_v61 = vpack.c.bf16 %v431_v55, %v427_v54  ;;  %v435_v1 = vld [vmem:[#allocation5 + $0x948] sm:$0xff]  ;;  %v4010_v4 = vpack.c.bf16 %v430_v62, %v426_v58  ;;  %v434_v6 = vld [vmem:[#allocation5 + $0x940] sm:$0xff]  ;;  %v201_v27 = vld [vmem:[#allocation5 + $0x1f8] sm:$0xff] }
  0xcb   :  { %3999 = vmatpush1.bf16.msra.mxu0 %v3998_v33  ;;  %v439_v2 = vld [vmem:[#allocation5 + $0x968] sm:$0xff]  ;;  %v438_v10 = vld [vmem:[#allocation5 + $0x960] sm:$0xff]  ;;  %v4660_v33 = vpack.c.bf16 %v201_v27, %v197_v26  ;;  %v196_v35 = vld [vmem:[#allocation5 + $0x1d0] sm:$0xff] }
  0xcc   :  { %4001 = vmatprep.subr.bf16.mxu0 %v4000_v38  ;;  %v4012_v9 = vpack.c.bf16 %v439_v2, %v435_v1  ;;  %v443_v13 = vld [vmem:[#allocation5 + $0x988] sm:$0xff]  ;;  %v442_v18 = vld [vmem:[#allocation5 + $0x980] sm:$0xff]  ;;  %v4014_v20 = vpack.c.bf16 %v438_v10, %v434_v6  ;;  %v200_v36 = vld [vmem:[#allocation5 + $0x1f0] sm:$0xff] }
  0xcd   :  { %4643 = vmatpush1.bf16.msra.mxu1 %v4642_v44  ;;  %v447_v14 = vld [vmem:[#allocation5 + $0x9a8] sm:$0xff]  ;;  %v446_v22 = vld [vmem:[#allocation5 + $0x9a0] sm:$0xff]  ;;  %v205_v39 = vld [vmem:[#allocation5 + $0x218] sm:$0xff]  ;;  %v4662_v43 = vpack.c.bf16 %v200_v36, %v196_v35 }
  0xce   :  { %4645 = vmatprep.subr.bf16.mxu1 %v4644_v46  ;;  %v4016_v25 = vpack.c.bf16 %v447_v14, %v443_v13  ;;  %v5977_v28 = vld [vmem:[#allocation2 + $0x28] sm:$0xff]  ;;  %v4018_v32 = vpack.c.bf16 %v446_v22, %v442_v18  ;;  %v450_v34 = vld [vmem:[#allocation5 + $0x9c0] sm:$0xff]  ;;  %v209_v40 = vld [vmem:[#allocation5 + $0x238] sm:$0xff] }
  0xcf   :  { %4003 = vmatpush1.bf16.msra.mxu0 %v4002_v45  ;;  %v451_v29 = vld [vmem:[#allocation5 + $0x9c8] sm:$0xff]  ;;  %1902 = vmatprep.mubr.f32.mxu0 %v5977_v28  ;;  %v454_v38 = vld [vmem:[#allocation5 + $0x9e0] sm:$0xff]  ;;  %v4664_v45 = vpack.c.bf16 %v209_v40, %v205_v39  ;;  %v204_v47 = vld [vmem:[#allocation5 + $0x210] sm:$0xff] }
  0xd0   :  { %4005 = vmatprep.subr.bf16.mxu0 %v4004_v50  ;;  %v455_v30 = vld [vmem:[#allocation5 + $0x9e8] sm:$0xff]  ;;  %v4022_v44 = vpack.c.bf16 %v454_v38, %v450_v34  ;;  %v458_v46 = vld [vmem:[#allocation5 + $0xa00] sm:$0xff]  ;;  %v208_v48 = vld [vmem:[#allocation5 + $0x230] sm:$0xff] }
  0xd1   :  { %4647 = vmatpush1.bf16.msra.mxu1 %v4646_v16  ;;  %v4020_v37 = vpack.c.bf16 %v455_v30, %v451_v29  ;;  %v459_v41 = vld [vmem:[#allocation5 + $0xa08] sm:$0xff]  ;;  %v462_v50 = vld [vmem:[#allocation5 + $0xa20] sm:$0xff]  ;;  %v213_v51 = vld [vmem:[#allocation5 + $0x258] sm:$0xff]  ;;  %v4666_v55 = vpack.c.bf16 %v208_v48, %v204_v47 }
  0xd2   :  { %4649 = vmatprep.subr.bf16.mxu1 %v4648_v57  ;;  %v463_v42 = vld [vmem:[#allocation5 + $0xa28] sm:$0xff]  ;;  %v217_v52 = vld [vmem:[#allocation5 + $0x278] sm:$0xff]  ;;  %v4026_v16 = vpack.c.bf16 %v462_v50, %v458_v46  ;;  %v466_v57 = vld [vmem:[#allocation5 + $0xa40] sm:$0xff] }
  0xd3   :  { %4007 = vmatpush1.bf16.msra.mxu0 %v4006_v56  ;;  %v4024_v49 = vpack.c.bf16 %v463_v42, %v459_v41  ;;  %v467_v53 = vld [vmem:[#allocation5 + $0xa48] sm:$0xff]  ;;  %v4668_v56 = vpack.c.bf16 %v217_v52, %v213_v51  ;;  %v212_v58 = vld [vmem:[#allocation5 + $0x250] sm:$0xff]  ;;  %v221_v62 = vld [vmem:[#allocation5 + $0x298] sm:$0xff] }
  0xd4   :  { %4009 = vmatprep.subr.bf16.mxu0 %v4008_v61  ;;  %v471_v54 = vld [vmem:[#allocation5 + $0xa68] sm:$0xff]  ;;  %v216_v59 = vld [vmem:[#allocation5 + $0x270] sm:$0xff]  ;;  %v470_v61 = vld [vmem:[#allocation5 + $0xa60] sm:$0xff] }
  0xd5   :  { %4651 = vmatpush1.bf16.msra.mxu1 %v4650_v3  ;;  %v4028_v60 = vpack.c.bf16 %v471_v54, %v467_v53  ;;  %v225_v63 = vld [vmem:[#allocation5 + $0x2b8] sm:$0xff]  ;;  %v475_v0 = vld [vmem:[#allocation5 + $0xa88] sm:$0xff]  ;;  %v4670_v2 = vpack.c.bf16 %v216_v59, %v212_v58  ;;  %v4030_v3 = vpack.c.bf16 %v470_v61, %v466_v57  ;;  %v220_v6 = vld [vmem:[#allocation5 + $0x290] sm:$0xff] }
  0xd6   :  { %4653 = vmatprep.subr.bf16.mxu1 %v4652_v5  ;;  %v479_v1 = vld [vmem:[#allocation5 + $0xaa8] sm:$0xff]  ;;  %v474_v5 = vld [vmem:[#allocation5 + $0xa80] sm:$0xff]  ;;  %v224_v7 = vld [vmem:[#allocation5 + $0x2b0] sm:$0xff] }
  0xd7   :  { %4011 = vmatpush1.bf16.msra.mxu0 %v4010_v4  ;;  %v4672_v4 = vpack.c.bf16 %v225_v63, %v221_v62  ;;  %v4032_v8 = vpack.c.bf16 %v479_v1, %v475_v0  ;;  %v229_v10 = vld [vmem:[#allocation5 + $0x2d8] sm:$0xff]  ;;  %v483_v12 = vld [vmem:[#allocation5 + $0xac8] sm:$0xff]  ;;  %v4674_v14 = vpack.c.bf16 %v224_v7, %v220_v6  ;;  %v232_v22 = vld [vmem:[#allocation5 + $0x2f0] sm:$0xff] }
  0xd8   :  { %4013 = vmatprep.subr.bf16.mxu0 %v4012_v9  ;;  %v478_v9 = vld [vmem:[#allocation5 + $0xaa0] sm:$0xff]  ;;  %v233_v11 = vld [vmem:[#allocation5 + $0x2f8] sm:$0xff]  ;;  %v487_v13 = vld [vmem:[#allocation5 + $0xae8] sm:$0xff] }
  0xd9   :  { %4655 = vmatpush1.bf16.msra.mxu1 %v4654_v15  ;;  %v4034_v15 = vpack.c.bf16 %v478_v9, %v474_v5  ;;  %v4676_v18 = vpack.c.bf16 %v233_v11, %v229_v10  ;;  %v4036_v23 = vpack.c.bf16 %v487_v13, %v483_v12  ;;  %v486_v24 = vld [vmem:[#allocation5 + $0xae0] sm:$0xff]  ;;  %v241_v26 = vld [vmem:[#allocation5 + $0x338] sm:$0xff]  ;;  %v491_v27 = vld [vmem:[#allocation5 + $0xb08] sm:$0xff] }
  0xda   :  { %4657 = vmatprep.subr.bf16.mxu1 %v4656_v21  ;;  %v228_v21 = vld [vmem:[#allocation5 + $0x2d0] sm:$0xff]  ;;  %v495_v29 = vld [vmem:[#allocation5 + $0xb28] sm:$0xff]  ;;  %v245_v38 = vld [vmem:[#allocation5 + $0x358] sm:$0xff] }
  0xdb   :  { %4015 = vmatpush1.bf16.msra.mxu0 %v4014_v20  ;;  %v482_v20 = vld [vmem:[#allocation5 + $0xac0] sm:$0xff]  ;;  %v4678_v30 = vpack.c.bf16 %v232_v22, %v228_v21  ;;  %v236_v34 = vld [vmem:[#allocation5 + $0x310] sm:$0xff]  ;;  %v4040_v36 = vpack.c.bf16 %v495_v29, %v491_v27  ;;  %v249_v39 = vld [vmem:[#allocation5 + $0x378] sm:$0xff] }
  0xdc   :  { %4017 = vmatprep.subr.bf16.mxu0 %v4016_v25  ;;  %v237_v25 = vld [vmem:[#allocation5 + $0x318] sm:$0xff]  ;;  %v240_v35 = vld [vmem:[#allocation5 + $0x330] sm:$0xff]  ;;  %v499_v40 = vld [vmem:[#allocation5 + $0xb48] sm:$0xff] }
  0xdd   :  { %4659 = vmatpush1.bf16.msra.mxu1 %v4658_v31  ;;  %v4038_v31 = vpack.c.bf16 %v486_v24, %v482_v20  ;;  %v503_v41 = vld [vmem:[#allocation5 + $0xb68] sm:$0xff]  ;;  %v4682_v42 = vpack.c.bf16 %v240_v35, %v236_v34  ;;  %v244_v46 = vld [vmem:[#allocation5 + $0x350] sm:$0xff]  ;;  %v253_v50 = vld [vmem:[#allocation5 + $0x398] sm:$0xff] }
  0xde   :  { %4661 = vmatprep.subr.bf16.mxu1 %v4660_v33  ;;  %v490_v33 = vld [vmem:[#allocation5 + $0xb00] sm:$0xff]  ;;  %v248_v47 = vld [vmem:[#allocation5 + $0x370] sm:$0xff]  ;;  %v4044_v48 = vpack.c.bf16 %v503_v41, %v499_v40  ;;  %v257_v51 = vld [vmem:[#allocation5 + $0x3b8] sm:$0xff] }
  0xdf   :  { %4019 = vmatpush1.bf16.msra.mxu0 %v4018_v32  ;;  %v4680_v32 = vpack.c.bf16 %v241_v26, %v237_v25  ;;  %v507_v52 = vld [vmem:[#allocation5 + $0xb88] sm:$0xff]  ;;  %v4686_v54 = vpack.c.bf16 %v248_v47, %v244_v46  ;;  %v252_v57 = vld [vmem:[#allocation5 + $0x390] sm:$0xff]  ;;  %v261_v61 = vld [vmem:[#allocation5 + $0x3d8] sm:$0xff] }
  0xe0   :  { %4021 = vmatprep.subr.bf16.mxu0 %v4020_v37  ;;  %v494_v37 = vld [vmem:[#allocation5 + $0xb20] sm:$0xff]  ;;  %v511_v53 = vld [vmem:[#allocation5 + $0xba8] sm:$0xff]  ;;  %v256_v58 = vld [vmem:[#allocation5 + $0x3b0] sm:$0xff] }
  0xe1   :  { %4663 = vmatpush1.bf16.msra.mxu1 %v4662_v43  ;;  %v4042_v43 = vpack.c.bf16 %v494_v37, %v490_v33  ;;  %v4048_v59 = vpack.c.bf16 %v511_v53, %v507_v52  ;;  %v265_v62 = vld [vmem:[#allocation5 + $0x3f8] sm:$0xff]  ;;  %v515_v63 = vld [vmem:[#allocation5 + $0xbc8] sm:$0xff]  ;;  %v4690_v1 = vpack.c.bf16 %v256_v58, %v252_v57  ;;  %v260_v5 = vld [vmem:[#allocation5 + $0x3d0] sm:$0xff] }
  0xe2   :  { %4665 = vmatprep.subr.bf16.mxu1 %v4664_v45  ;;  %v498_v45 = vld [vmem:[#allocation5 + $0xb40] sm:$0xff]  ;;  %v519_v0 = vld [vmem:[#allocation5 + $0xbe8] sm:$0xff]  ;;  %v264_v6 = vld [vmem:[#allocation5 + $0x3f0] sm:$0xff] }
  0xe3   :  { %4023 = vmatpush1.bf16.msra.mxu0 %v4022_v44  ;;  %v4684_v44 = vpack.c.bf16 %v249_v39, %v245_v38  ;;  %v4052_v7 = vpack.c.bf16 %v519_v0, %v515_v63  ;;  %v269_v9 = vld [vmem:[#allocation5 + $0x418] sm:$0xff]  ;;  %v523_v11 = vld [vmem:[#allocation5 + $0xc08] sm:$0xff]  ;;  %v4694_v13 = vpack.c.bf16 %v264_v6, %v260_v5  ;;  %v268_v20 = vld [vmem:[#allocation5 + $0x410] sm:$0xff] }
  0xe4   :  { %4025 = vmatprep.subr.bf16.mxu0 %v4024_v49  ;;  %v502_v49 = vld [vmem:[#allocation5 + $0xb60] sm:$0xff]  ;;  %v273_v10 = vld [vmem:[#allocation5 + $0x438] sm:$0xff]  ;;  %v527_v12 = vld [vmem:[#allocation5 + $0xc28] sm:$0xff] }
  0xe5   :  { %4667 = vmatpush1.bf16.msra.mxu1 %v4666_v55  ;;  %v4046_v55 = vpack.c.bf16 %v502_v49, %v498_v45  ;;  %v272_v21 = vld [vmem:[#allocation5 + $0x430] sm:$0xff]  ;;  %v4056_v22 = vpack.c.bf16 %v527_v12, %v523_v11  ;;  %v277_v24 = vld [vmem:[#allocation5 + $0x458] sm:$0xff]  ;;  %v531_v26 = vld [vmem:[#allocation5 + $0xc48] sm:$0xff] }
  0xe6   :  { %4669 = vmatprep.subr.bf16.mxu1 %v4668_v56  ;;  %v506_v56 = vld [vmem:[#allocation5 + $0xb80] sm:$0xff]  ;;  %v281_v25 = vld [vmem:[#allocation5 + $0x478] sm:$0xff]  ;;  %v535_v27 = vld [vmem:[#allocation5 + $0xc68] sm:$0xff] }
  0xe7   :  { %4027 = vmatpush1.bf16.msra.mxu0 %v4026_v16  ;;  %v4688_v16 = vpack.c.bf16 %v257_v51, %v253_v50  ;;  %v118_v29 = vld [vmem:[#allocation2 + $0x20] sm:$0xff]  ;;  %v276_v34 = vld [vmem:[#allocation5 + $0x450] sm:$0xff]  ;;  %v285_v38 = vld [vmem:[#allocation5 + $0x498] sm:$0xff] }
  0xe8   :  { %4029 = vmatprep.subr.bf16.mxu0 %v4028_v60  ;;  %v510_v60 = vld [vmem:[#allocation5 + $0xba0] sm:$0xff]  ;;  %v280_v35 = vld [vmem:[#allocation5 + $0x470] sm:$0xff]  ;;  %v289_v39 = vld [vmem:[#allocation5 + $0x4b8] sm:$0xff] }
  0xe9   :  { %4671 = vmatpush1.bf16.msra.mxu1 %v4670_v2  ;;  %v4050_v2 = vpack.c.bf16 %v510_v60, %v506_v56  ;;  %v530_v33 = vld [vmem:[#allocation5 + $0xc40] sm:$0xff]  ;;  %v539_v40 = vld [vmem:[#allocation5 + $0xc88] sm:$0xff]  ;;  %v4704_v45 = vpack.c.bf16 %v289_v39, %v285_v38  ;;  %v284_v47 = vld [vmem:[#allocation5 + $0x490] sm:$0xff] }
  0xea   :  { %4673 = vmatprep.subr.bf16.mxu1 %v4672_v4  ;;  %v514_v4 = vld [vmem:[#allocation5 + $0xbc0] sm:$0xff]  ;;  %v543_v41 = vld [vmem:[#allocation5 + $0xca8] sm:$0xff]  ;;  %v293_v51 = vld [vmem:[#allocation5 + $0x4d8] sm:$0xff] }
  0xeb   :  { %4031 = vmatpush1.bf16.msra.mxu0 %v4030_v3  ;;  %v4692_v3 = vpack.c.bf16 %v265_v62, %v261_v61  ;;  %v534_v37 = vld [vmem:[#allocation5 + $0xc60] sm:$0xff]  ;;  %v4064_v49 = vpack.c.bf16 %v543_v41, %v539_v40  ;;  %v297_v52 = vld [vmem:[#allocation5 + $0x4f8] sm:$0xff]  ;;  %v551_v53 = vld [vmem:[#allocation5 + $0xce8] sm:$0xff] }
  0xec   :  { %4033 = vmatprep.subr.bf16.mxu0 %v4032_v8  ;;  %v518_v8 = vld [vmem:[#allocation5 + $0xbe0] sm:$0xff]  ;;  %v292_v57 = vld [vmem:[#allocation5 + $0x4d0] sm:$0xff]  ;;  %v301_v61 = vld [vmem:[#allocation5 + $0x518] sm:$0xff] }
  0xed   :  { %4675 = vmatpush1.bf16.msra.mxu1 %v4674_v14  ;;  %v4054_v14 = vpack.c.bf16 %v518_v8, %v514_v4  ;;  %v538_v46 = vld [vmem:[#allocation5 + $0xc80] sm:$0xff]  ;;  %v296_v58 = vld [vmem:[#allocation5 + $0x4f0] sm:$0xff]  ;;  %v305_v62 = vld [vmem:[#allocation5 + $0x538] sm:$0xff] }
  0xee   :  { %4677 = vmatprep.subr.bf16.mxu1 %v4676_v18  ;;  %v522_v18 = vld [vmem:[#allocation5 + $0xc00] sm:$0xff]  ;;  %v555_v63 = vld [vmem:[#allocation5 + $0xd08] sm:$0xff]  ;;  %v300_v4 = vld [vmem:[#allocation5 + $0x510] sm:$0xff] }
  0xef   :  { %4035 = vmatpush1.bf16.msra.mxu0 %v4034_v15  ;;  %v4696_v15 = vpack.c.bf16 %v273_v10, %v269_v9  ;;  %v542_v50 = vld [vmem:[#allocation5 + $0xca0] sm:$0xff]  ;;  %v559_v0 = vld [vmem:[#allocation5 + $0xd28] sm:$0xff]  ;;  %v304_v5 = vld [vmem:[#allocation5 + $0x530] sm:$0xff] }
  0xf0   :  { %4037 = vmatprep.subr.bf16.mxu0 %v4036_v23  ;;  %v526_v23 = vld [vmem:[#allocation5 + $0xc20] sm:$0xff]  ;;  %v4072_v6 = vpack.c.bf16 %v559_v0, %v555_v63  ;;  %v309_v8 = vld [vmem:[#allocation5 + $0x558] sm:$0xff]  ;;  %v563_v10 = vld [vmem:[#allocation5 + $0xd48] sm:$0xff]  ;;  %v4714_v12 = vpack.c.bf16 %v304_v5, %v300_v4 }
  0xf1   :  { %4679 = vmatpush1.bf16.msra.mxu1 %v4678_v30  ;;  %v4698_v30 = vpack.c.bf16 %v272_v21, %v268_v20  ;;  %v546_v56 = vld [vmem:[#allocation5 + $0xcc0] sm:$0xff]  ;;  %v313_v9 = vld [vmem:[#allocation5 + $0x578] sm:$0xff]  ;;  %v567_v11 = vld [vmem:[#allocation5 + $0xd68] sm:$0xff] }
  0xf2   :  { %4681 = vmatprep.subr.bf16.mxu1 %v4680_v32  ;;  %v4700_v32 = vpack.c.bf16 %v281_v25, %v277_v24  ;;  %v550_v60 = vld [vmem:[#allocation5 + $0xce0] sm:$0xff]  ;;  %v312_v20 = vld [vmem:[#allocation5 + $0x570] sm:$0xff]  ;;  %v4076_v21 = vpack.c.bf16 %v567_v11, %v563_v10  ;;  %v321_v24 = vld [vmem:[#allocation5 + $0x5b8] sm:$0xff] }
  0xf3   :  { %4039 = vmatpush1.bf16.msra.mxu0 %v4038_v31  ;;  %v4058_v31 = vpack.c.bf16 %v526_v23, %v522_v18  ;;  %v308_v18 = vld [vmem:[#allocation5 + $0x550] sm:$0xff]  ;;  %v317_v23 = vld [vmem:[#allocation5 + $0x598] sm:$0xff]  ;;  %v571_v25 = vld [vmem:[#allocation5 + $0xd88] sm:$0xff] }
  0xf4   :  { %4041 = vmatprep.subr.bf16.mxu0 %v4040_v36  ;;  %v4060_v36 = vpack.c.bf16 %v535_v27, %v531_v26  ;;  %v575_v26 = vld [vmem:[#allocation5 + $0xda8] sm:$0xff]  ;;  %v4718_v27 = vpack.c.bf16 %v312_v20, %v308_v18  ;;  %v598_v4 = vld [vmem:[#allocation5 + $0xe60] sm:$0xff]  ;;  %v349_v5 = vld [vmem:[#allocation5 + $0x698] sm:$0xff] }
  0xf5   :  { %4683 = vmatpush1.bf16.msra.mxu1 %v4682_v42  ;;  %v121_v42 = vld [vmem:[#allocation2 + $0x38] sm:$0xff]  ;;  %v579_v38 = vld [vmem:[#allocation5 + $0xdc8] sm:$0xff]  ;;  %v606_v18 = vld [vmem:[#allocation5 + $0xea0] sm:$0xff] }
  0xf6   :  { %4685 = vmatprep.subr.bf16.mxu1 %v4684_v44  ;;  %v4062_v44 = vpack.c.bf16 %v534_v37, %v530_v33  ;;  %v320_v33 = vld [vmem:[#allocation5 + $0x5b0] sm:$0xff]  ;;  %v329_v37 = vld [vmem:[#allocation5 + $0x5f8] sm:$0xff]  ;;  %v583_v39 = vld [vmem:[#allocation5 + $0xde8] sm:$0xff] }
  0xf7   :  { %4043 = vmatpush1.bf16.msra.mxu0 %v4042_v43  ;;  %v4702_v43 = vpack.c.bf16 %v280_v35, %v276_v34  ;;  %v4080_v34 = vpack.c.bf16 %v575_v26, %v571_v25  ;;  %v574_v35 = vld [vmem:[#allocation5 + $0xda0] sm:$0xff]  ;;  %v357_v20 = vld [vmem:[#allocation5 + $0x6d8] sm:$0xff] }
  0xf8   :  { %4045 = vmatprep.subr.bf16.mxu0 %v4044_v48  ;;  %v288_v48 = vld [vmem:[#allocation5 + $0x4b0] sm:$0xff] }
  0xf9   :  { %4687 = vmatpush1.bf16.msra.mxu1 %v4686_v54  ;;  %v4706_v54 = vpack.c.bf16 %v288_v48, %v284_v47  ;;  %v582_v47 = vld [vmem:[#allocation5 + $0xde0] sm:$0xff]  ;;  %v333_v48 = vld [vmem:[#allocation5 + $0x618] sm:$0xff] }
  0xfa   :  { %4689 = vmatprep.subr.bf16.mxu1 %v4688_v16  ;;  %v4708_v16 = vpack.c.bf16 %v297_v52, %v293_v51  ;;  %v591_v51 = vld [vmem:[#allocation5 + $0xe28] sm:$0xff] }
  0xfb   :  { %4047 = vmatpush1.bf16.msra.mxu0 %v4046_v55  ;;  %v4066_v55 = vpack.c.bf16 %v542_v50, %v538_v46  ;;  %v4084_v46 = vpack.c.bf16 %v583_v39, %v579_v38  ;;  %v587_v50 = vld [vmem:[#allocation5 + $0xe08] sm:$0xff] }
  0xfc   :  { %4049 = vmatprep.subr.bf16.mxu0 %v4048_v59 }
  0xfd   :  { %4691 = vmatpush1.bf16.msra.mxu1 %v4690_v1  ;;  %v4710_v1 = vpack.c.bf16 %v296_v58, %v292_v57  ;;  %v590_v57 = vld [vmem:[#allocation5 + $0xe20] sm:$0xff]  ;;  %v341_v58 = vld [vmem:[#allocation5 + $0x658] sm:$0xff] }
  0xfe   :  { %4693 = vmatprep.subr.bf16.mxu1 %v4692_v3  ;;  %v554_v3 = vld [vmem:[#allocation5 + $0xd00] sm:$0xff] }
  0xff   :  { %4051 = vmatpush1.bf16.msra.mxu0 %v4050_v2  ;;  %v4712_v2 = vpack.c.bf16 %v305_v62, %v301_v61  ;;  %v599_v61 = vld [vmem:[#allocation5 + $0xe68] sm:$0xff] }
 0x100   :  { %4053 = vmatprep.subr.bf16.mxu0 %v4052_v7  ;;  %v558_v7 = vld [vmem:[#allocation5 + $0xd20] sm:$0xff] }
 0x101   :  { %4695 = vmatpush1.bf16.msra.mxu1 %v4694_v13  ;;  %v4074_v13 = vpack.c.bf16 %v558_v7, %v554_v3  ;;  %v603_v7 = vld [vmem:[#allocation5 + $0xe88] sm:$0xff] }
 0x102   :  { %4697 = vmatprep.subr.bf16.mxu1 %v4696_v15  ;;  %v562_v15 = vld [vmem:[#allocation5 + $0xd40] sm:$0xff] }
 0x103   :  { %4055 = vmatpush1.bf16.msra.mxu0 %v4054_v14  ;;  %v4716_v14 = vpack.c.bf16 %v313_v9, %v309_v8  ;;  %v607_v8 = vld [vmem:[#allocation5 + $0xea8] sm:$0xff] }
 0x104   :  { %4057 = vmatprep.subr.bf16.mxu0 %v4056_v22  ;;  %2613 = vmatmul.mubr.f32.vlgmr.msra.gmra.mrb[2].mxu1 %v5973_v17  ;;  %v547_v17 = vld [vmem:[#allocation5 + $0xcc8] sm:$0xff]  ;;  %v566_v22 = vld [vmem:[#allocation5 + $0xd60] sm:$0xff] }
 0x105   :  { %4699 = vmatpush1.bf16.msra.mxu1 %v4698_v30  ;;  %2683 = vmatprep.mubr.f32.mxu1 %v5970_v19  ;;  %v4068_v59 = vpack.c.bf16 %v551_v53, %v547_v17  ;;  %v4070_v19 = vpack.c.bf16 %v550_v60, %v546_v56  ;;  %v4720_v30 = vpack.c.bf16 %v321_v24, %v317_v23  ;;  %v595_v60 = vld [vmem:[#allocation5 + $0xe48] sm:$0xff] }
 0x106   :  { %1903 = vmatmul.mubr.f32.vlgmr.msra.gmra.mrb[0].mxu0 %v118_v29  ;;  %4701 = vmatprep.subr.bf16.mxu1 %v4700_v32  ;;  %v4078_v29 = vpack.c.bf16 %v566_v22, %v562_v15  ;;  %v316_v32 = vld [vmem:[#allocation5 + $0x590] sm:$0xff]  ;;  %v4088_v56 = vpack.c.bf16 %v591_v51, %v587_v50  ;;  %v4092_v3 = vpack.c.bf16 %v599_v61, %v595_v60  ;;  %v611_v22 = vld [vmem:[#allocation5 + $0xec8] sm:$0xff] }
 0x107   :  { %4059 = vmatpush1.bf16.msra.mxu0 %v4058_v31  ;;  %1973 = vmatprep.mubr.f32.mxu0 %v121_v42  ;;  %v570_v31 = vld [vmem:[#allocation5 + $0xd80] sm:$0xff]  ;;  %v4722_v40 = vpack.c.bf16 %v320_v33, %v316_v32  ;;  %v4096_v15 = vpack.c.bf16 %v607_v8, %v603_v7  ;;  %v615_v23 = vld [vmem:[#allocation5 + $0xee8] sm:$0xff]  ;;  %v365_v33 = vld [vmem:[#allocation5 + $0x718] sm:$0xff] }
 0x108   :  { %4061 = vmatprep.subr.bf16.mxu0 %v4060_v36  ;;  %v325_v36 = vld [vmem:[#allocation5 + $0x5d8] sm:$0xff]  ;;  %v4082_v41 = vpack.c.bf16 %v574_v35, %v570_v31  ;;  %v4100_v31 = vpack.c.bf16 %v615_v23, %v611_v22  ;;  %v614_v32 = vld [vmem:[#allocation5 + $0xee0] sm:$0xff]  ;;  %v619_v35 = vld [vmem:[#allocation5 + $0xf08] sm:$0xff] }
 0x109   :  { %4703 = vmatpush1.bf16.msra.mxu1 %v4702_v43  ;;  %v4724_v42 = vpack.c.bf16 %v329_v37, %v325_v36  ;;  %v578_v43 = vld [vmem:[#allocation5 + $0xdc0] sm:$0xff]  ;;  %v623_v36 = vld [vmem:[#allocation5 + $0xf28] sm:$0xff] }
 0x10a   :  { %4705 = vmatprep.subr.bf16.mxu1 %v4704_v45  ;;  %v328_v45 = vld [vmem:[#allocation5 + $0x5f0] sm:$0xff]  ;;  %v4086_v17 = vpack.c.bf16 %v582_v47, %v578_v43  ;;  %v4104_v43 = vpack.c.bf16 %v623_v36, %v619_v35  ;;  %v627_v47 = vld [vmem:[#allocation5 + $0xf48] sm:$0xff] }
 0x10b   :  { %4063 = vmatpush1.bf16.msra.mxu0 %v4062_v44  ;;  %v324_v44 = vld [vmem:[#allocation5 + $0x5d0] sm:$0xff] }
 0x10c   :  { %4065 = vmatprep.subr.bf16.mxu0 %v4064_v49  ;;  %v337_v49 = vld [vmem:[#allocation5 + $0x638] sm:$0xff]  ;;  %v4726_v52 = vpack.c.bf16 %v328_v45, %v324_v44  ;;  %v622_v44 = vld [vmem:[#allocation5 + $0xf20] sm:$0xff] }
 0x10d   :  { %4707 = vmatpush1.bf16.msra.mxu1 %v4706_v54  ;;  %v4728_v53 = vpack.c.bf16 %v337_v49, %v333_v48  ;;  %v586_v54 = vld [vmem:[#allocation5 + $0xe00] sm:$0xff]  ;;  %v373_v45 = vld [vmem:[#allocation5 + $0x758] sm:$0xff]  ;;  %v631_v48 = vld [vmem:[#allocation5 + $0xf68] sm:$0xff] }
 0x10e   :  { %4709 = vmatprep.subr.bf16.mxu1 %v4708_v16  ;;  %v336_v16 = vld [vmem:[#allocation5 + $0x630] sm:$0xff]  ;;  %v4090_v63 = vpack.c.bf16 %v590_v57, %v586_v54  ;;  %v4108_v54 = vpack.c.bf16 %v631_v48, %v627_v47  ;;  %v635_v57 = vld [vmem:[#allocation5 + $0xf88] sm:$0xff] }
 0x10f   :  { %4067 = vmatpush1.bf16.msra.mxu0 %v4066_v55  ;;  %v332_v55 = vld [vmem:[#allocation5 + $0x610] sm:$0xff]  ;;  %v671_v47 = vld [vmem:[#allocation5 + $0x10a8] sm:$0xff] }
 0x110   :  { %4069 = vmatprep.subr.bf16.mxu0 %v4068_v59  ;;  %v345_v59 = vld [vmem:[#allocation5 + $0x678] sm:$0xff]  ;;  %v4730_v62 = vpack.c.bf16 %v336_v16, %v332_v55  ;;  %v630_v55 = vld [vmem:[#allocation5 + $0xf60] sm:$0xff]  ;;  %v123_v48 = vld [vmem:[#allocation2 + $0x48] sm:$0xff] }
 0x111   :  { %4711 = vmatpush1.bf16.msra.mxu1 %v4710_v1  ;;  %v4732_v0 = vpack.c.bf16 %v345_v59, %v341_v58  ;;  %v594_v1 = vld [vmem:[#allocation5 + $0xe40] sm:$0xff]  ;;  %v381_v16 = vld [vmem:[#allocation5 + $0x798] sm:$0xff]  ;;  %v639_v58 = vld [vmem:[#allocation5 + $0xfa8] sm:$0xff] }
 0x112   :  { %4713 = vmatprep.subr.bf16.mxu1 %v4712_v2  ;;  %v344_v2 = vld [vmem:[#allocation5 + $0x670] sm:$0xff]  ;;  %v4094_v10 = vpack.c.bf16 %v598_v4, %v594_v1  ;;  %v4112_v1 = vpack.c.bf16 %v639_v58, %v635_v57  ;;  %v643_v4 = vld [vmem:[#allocation5 + $0xfc8] sm:$0xff] }
 0x113   :  { %4071 = vmatpush1.bf16.msra.mxu0 %v4070_v19  ;;  %v340_v19 = vld [vmem:[#allocation5 + $0x650] sm:$0xff]  ;;  %v675_v57 = vld [vmem:[#allocation5 + $0x10c8] sm:$0xff] }
 0x114   :  { %4073 = vmatprep.subr.bf16.mxu0 %v4072_v6  ;;  %v353_v6 = vld [vmem:[#allocation5 + $0x6b8] sm:$0xff]  ;;  %v4734_v9 = vpack.c.bf16 %v344_v2, %v340_v19  ;;  %v638_v19 = vld [vmem:[#allocation5 + $0xfa0] sm:$0xff]  ;;  %v679_v58 = vld [vmem:[#allocation5 + $0x10e8] sm:$0xff] }
 0x115   :  { %4715 = vmatpush1.bf16.msra.mxu1 %v4714_v12  ;;  %v4736_v11 = vpack.c.bf16 %v353_v6, %v349_v5  ;;  %v602_v12 = vld [vmem:[#allocation5 + $0xe80] sm:$0xff]  ;;  %v389_v2 = vld [vmem:[#allocation5 + $0x7d8] sm:$0xff]  ;;  %v647_v5 = vld [vmem:[#allocation5 + $0xfe8] sm:$0xff] }
 0x116   :  { %4717 = vmatprep.subr.bf16.mxu1 %v4716_v14  ;;  %v352_v14 = vld [vmem:[#allocation5 + $0x6b0] sm:$0xff]  ;;  %v4098_v25 = vpack.c.bf16 %v606_v18, %v602_v12  ;;  %v4116_v12 = vpack.c.bf16 %v647_v5, %v643_v4  ;;  %v651_v18 = vld [vmem:[#allocation5 + $0x1008] sm:$0xff] }
 0x117   :  { %4075 = vmatpush1.bf16.msra.mxu0 %v4074_v13  ;;  %v348_v13 = vld [vmem:[#allocation5 + $0x690] sm:$0xff]  ;;  %v683_v4 = vld [vmem:[#allocation5 + $0x1108] sm:$0xff] }
 0x118   :  { %4077 = vmatprep.subr.bf16.mxu0 %v4076_v21  ;;  %v361_v21 = vld [vmem:[#allocation5 + $0x6f8] sm:$0xff]  ;;  %v4738_v24 = vpack.c.bf16 %v352_v14, %v348_v13  ;;  %v646_v13 = vld [vmem:[#allocation5 + $0xfe0] sm:$0xff]  ;;  %v687_v5 = vld [vmem:[#allocation5 + $0x1128] sm:$0xff] }
 0x119   :  { %4719 = vmatpush1.bf16.msra.mxu1 %v4718_v27  ;;  %v4740_v26 = vpack.c.bf16 %v361_v21, %v357_v20  ;;  %v610_v27 = vld [vmem:[#allocation5 + $0xec0] sm:$0xff]  ;;  %v397_v14 = vld [vmem:[#allocation5 + $0x818] sm:$0xff]  ;;  %v655_v20 = vld [vmem:[#allocation5 + $0x1028] sm:$0xff] }
 0x11a   :  { %4721 = vmatprep.subr.bf16.mxu1 %v4720_v30  ;;  %v360_v30 = vld [vmem:[#allocation5 + $0x6f0] sm:$0xff]  ;;  %v4102_v38 = vpack.c.bf16 %v614_v32, %v610_v27  ;;  %v4120_v27 = vpack.c.bf16 %v655_v20, %v651_v18  ;;  %v659_v32 = vld [vmem:[#allocation5 + $0x1048] sm:$0xff] }
 0x11b   :  { %4079 = vmatpush1.bf16.msra.mxu0 %v4078_v29  ;;  %v356_v29 = vld [vmem:[#allocation5 + $0x6d0] sm:$0xff]  ;;  %v695_v18 = vld [vmem:[#allocation5 + $0x1168] sm:$0xff] }
 0x11c   :  { %4081 = vmatprep.subr.bf16.mxu0 %v4080_v34  ;;  %v369_v34 = vld [vmem:[#allocation5 + $0x738] sm:$0xff]  ;;  %v4742_v37 = vpack.c.bf16 %v360_v30, %v356_v29  ;;  %v654_v29 = vld [vmem:[#allocation5 + $0x1020] sm:$0xff] }
 0x11d   :  { %4723 = vmatpush1.bf16.msra.mxu1 %v4722_v40  ;;  %v4744_v39 = vpack.c.bf16 %v369_v34, %v365_v33  ;;  %v618_v40 = vld [vmem:[#allocation5 + $0xf00] sm:$0xff]  ;;  %v405_v30 = vld [vmem:[#allocation5 + $0x858] sm:$0xff]  ;;  %v663_v33 = vld [vmem:[#allocation5 + $0x1068] sm:$0xff] }
 0x11e   :  { %4725 = vmatprep.subr.bf16.mxu1 %v4724_v42  ;;  %v368_v42 = vld [vmem:[#allocation5 + $0x730] sm:$0xff]  ;;  %v4106_v50 = vpack.c.bf16 %v622_v44, %v618_v40  ;;  %v417_v44 = vld [vmem:[#allocation5 + $0x8b8] sm:$0xff] }
 0x11f   :  { %4083 = vmatpush1.bf16.msra.mxu0 %v4082_v41  ;;  %v364_v41 = vld [vmem:[#allocation5 + $0x710] sm:$0xff] }
 0x120   :  { %4085 = vmatprep.subr.bf16.mxu0 %v4084_v46  ;;  %v377_v46 = vld [vmem:[#allocation5 + $0x778] sm:$0xff]  ;;  %v4746_v49 = vpack.c.bf16 %v368_v42, %v364_v41  ;;  %v120_v34 = vld [vmem:[#allocation2 + $0x30] sm:$0xff]  ;;  %v4124_v41 = vpack.c.bf16 %v663_v33, %v659_v32  ;;  %v662_v42 = vld [vmem:[#allocation5 + $0x1060] sm:$0xff] }
 0x121   :  { %4727 = vmatpush1.bf16.msra.mxu1 %v4726_v52  ;;  %v4748_v51 = vpack.c.bf16 %v377_v46, %v373_v45  ;;  %v626_v52 = vld [vmem:[#allocation5 + $0xf40] sm:$0xff]  ;;  %v408_v40 = vld [vmem:[#allocation5 + $0x870] sm:$0xff]  ;;  %v667_v46 = vld [vmem:[#allocation5 + $0x1088] sm:$0xff] }
 0x122   :  { %4729 = vmatprep.subr.bf16.mxu1 %v4728_v53  ;;  %v376_v53 = vld [vmem:[#allocation5 + $0x770] sm:$0xff]  ;;  %v4110_v60 = vpack.c.bf16 %v630_v55, %v626_v52  ;;  %v666_v52 = vld [vmem:[#allocation5 + $0x1080] sm:$0xff]  ;;  %v703_v32 = vld [vmem:[#allocation5 + $0x11a8] sm:$0xff] }
 0x123   :  { %4087 = vmatpush1.bf16.msra.mxu0 %v4086_v17  ;;  %v372_v17 = vld [vmem:[#allocation5 + $0x750] sm:$0xff]  ;;  %v670_v55 = vld [vmem:[#allocation5 + $0x10a0] sm:$0xff] }
 0x124   :  { %4089 = vmatprep.subr.bf16.mxu0 %v4088_v56  ;;  %v385_v56 = vld [vmem:[#allocation5 + $0x7b8] sm:$0xff]  ;;  %v4750_v59 = vpack.c.bf16 %v376_v53, %v372_v17  ;;  %v5626_v45 = vld [vmem:[#allocation2 + $0x10] sm:$0xff] }
 0x125   :  { %4731 = vmatpush1.bf16.msra.mxu1 %v4730_v62  ;;  %v4752_v61 = vpack.c.bf16 %v385_v56, %v381_v16  ;;  %v634_v62 = vld [vmem:[#allocation5 + $0xf80] sm:$0xff]  ;;  %v412_v17 = vld [vmem:[#allocation5 + $0x890] sm:$0xff]  ;;  %v421_v16 = vld [vmem:[#allocation5 + $0x8d8] sm:$0xff] }
 0x126   :  { %4733 = vmatprep.subr.bf16.mxu1 %v4732_v0  ;;  %v384_v0 = vld [vmem:[#allocation5 + $0x7b0] sm:$0xff]  ;;  %v4114_v7 = vpack.c.bf16 %v638_v19, %v634_v62  ;;  %v425_v56 = vld [vmem:[#allocation5 + $0x8f8] sm:$0xff]  ;;  %v674_v62 = vld [vmem:[#allocation5 + $0x10c0] sm:$0xff] }
 0x127   :  { %4091 = vmatpush1.bf16.msra.mxu0 %v4090_v63  ;;  %v380_v63 = vld [vmem:[#allocation5 + $0x790] sm:$0xff]  ;;  %v678_v19 = vld [vmem:[#allocation5 + $0x10e0] sm:$0xff] }
 0x128   :  { %4093 = vmatprep.subr.bf16.mxu0 %v4092_v3  ;;  %v393_v3 = vld [vmem:[#allocation5 + $0x7f8] sm:$0xff]  ;;  %v4754_v6 = vpack.c.bf16 %v384_v0, %v380_v63  ;;  %v416_v53 = vld [vmem:[#allocation5 + $0x8b0] sm:$0xff] }
 0x129   :  { %4735 = vmatpush1.bf16.msra.mxu1 %v4734_v9  ;;  %v4756_v8 = vpack.c.bf16 %v393_v3, %v389_v2  ;;  %v642_v9 = vld [vmem:[#allocation5 + $0xfc0] sm:$0xff]  ;;  %v420_v63 = vld [vmem:[#allocation5 + $0x8d0] sm:$0xff]  ;;  %v429_v2 = vld [vmem:[#allocation5 + $0x918] sm:$0xff] }
 0x12a   :  { %4737 = vmatprep.subr.bf16.mxu1 %v4736_v11  ;;  %v392_v11 = vld [vmem:[#allocation5 + $0x7f0] sm:$0xff]  ;;  %v4118_v22 = vpack.c.bf16 %v646_v13, %v642_v9  ;;  %v433_v3 = vld [vmem:[#allocation5 + $0x938] sm:$0xff] }
 0x12b   :  { %4095 = vmatpush1.bf16.msra.mxu0 %v4094_v10  ;;  %v388_v10 = vld [vmem:[#allocation5 + $0x7d0] sm:$0xff]  ;;  %v437_v13 = vld [vmem:[#allocation5 + $0x958] sm:$0xff] }
 0x12c   :  { %4097 = vmatprep.subr.bf16.mxu0 %v4096_v15  ;;  %v401_v15 = vld [vmem:[#allocation5 + $0x838] sm:$0xff]  ;;  %v4758_v21 = vpack.c.bf16 %v392_v11, %v388_v10  ;;  %v424_v0 = vld [vmem:[#allocation5 + $0x8f0] sm:$0xff]  ;;  %v4136_v11 = vpack.c.bf16 %v687_v5, %v683_v4  ;;  %v722_v5 = vld [vmem:[#allocation5 + $0x1240] sm:$0xff] }
 0x12d   :  { %4739 = vmatpush1.bf16.msra.mxu1 %v4738_v24  ;;  %v4760_v23 = vpack.c.bf16 %v401_v15, %v397_v14  ;;  %v650_v24 = vld [vmem:[#allocation5 + $0x1000] sm:$0xff]  ;;  %v428_v9 = vld [vmem:[#allocation5 + $0x910] sm:$0xff]  ;;  %v441_v14 = vld [vmem:[#allocation5 + $0x978] sm:$0xff] }
 0x12e   :  { %4741 = vmatprep.subr.bf16.mxu1 %v4740_v26  ;;  %v400_v26 = vld [vmem:[#allocation5 + $0x830] sm:$0xff]  ;;  %v4122_v36 = vpack.c.bf16 %v654_v29, %v650_v24  ;;  %v691_v15 = vld [vmem:[#allocation5 + $0x1148] sm:$0xff]  ;;  %v445_v29 = vld [vmem:[#allocation5 + $0x998] sm:$0xff] }
 0x12f   :  { %4099 = vmatpush1.bf16.msra.mxu0 %v4098_v25  ;;  %v396_v25 = vld [vmem:[#allocation5 + $0x810] sm:$0xff] }
 0x130   :  { %4101 = vmatprep.subr.bf16.mxu0 %v4100_v31  ;;  %v409_v31 = vld [vmem:[#allocation5 + $0x878] sm:$0xff]  ;;  %v4762_v35 = vpack.c.bf16 %v400_v26, %v396_v25  ;;  %v432_v10 = vld [vmem:[#allocation5 + $0x930] sm:$0xff]  ;;  %v4140_v26 = vpack.c.bf16 %v695_v18, %v691_v15  ;;  %v730_v18 = vld [vmem:[#allocation5 + $0x1280] sm:$0xff] }
 0x131   :  { %4743 = vmatpush1.bf16.msra.mxu1 %v4742_v37  ;;  %v4764_v37 = vpack.c.bf16 %v409_v31, %v405_v30  ;;  %v4778_v20 = vpack.c.bf16 %v432_v10, %v428_v9  ;;  %v436_v24 = vld [vmem:[#allocation5 + $0x950] sm:$0xff]  ;;  %v449_v30 = vld [vmem:[#allocation5 + $0x9b8] sm:$0xff]  ;;  %v699_v31 = vld [vmem:[#allocation5 + $0x1188] sm:$0xff] }
 0x132   :  { %4745 = vmatprep.subr.bf16.mxu1 %v4744_v39  ;;  %v404_v39 = vld [vmem:[#allocation5 + $0x850] sm:$0xff]  ;;  %v477_v9 = vld [vmem:[#allocation5 + $0xa98] sm:$0xff] }
 0x133   :  { %4103 = vmatpush1.bf16.msra.mxu0 %v4102_v38  ;;  %v658_v38 = vld [vmem:[#allocation5 + $0x1040] sm:$0xff]  ;;  %v440_v25 = vld [vmem:[#allocation5 + $0x970] sm:$0xff]  ;;  %v481_v10 = vld [vmem:[#allocation5 + $0xab8] sm:$0xff] }
 0x134   :  { %4105 = vmatprep.subr.bf16.mxu0 %v4104_v43  ;;  %v413_v43 = vld [vmem:[#allocation5 + $0x898] sm:$0xff]  ;;  %v4782_v33 = vpack.c.bf16 %v440_v25, %v436_v24  ;;  %v4800_v15 = vpack.c.bf16 %v481_v10, %v477_v9 }
 0x135   :  { %4747 = vmatpush1.bf16.msra.mxu1 %v4746_v49  ;;  %v4766_v49 = vpack.c.bf16 %v408_v40, %v404_v39  ;;  %v4144_v39 = vpack.c.bf16 %v703_v32, %v699_v31  ;;  %v702_v40 = vld [vmem:[#allocation5 + $0x11a0] sm:$0xff]  ;;  %v485_v24 = vld [vmem:[#allocation5 + $0xad8] sm:$0xff] }
 0x136   :  { %4749 = vmatprep.subr.bf16.mxu1 %v4748_v51  ;;  %v4768_v51 = vpack.c.bf16 %v417_v44, %v413_v43  ;;  %v707_v43 = vld [vmem:[#allocation5 + $0x11c8] sm:$0xff]  ;;  %v489_v25 = vld [vmem:[#allocation5 + $0xaf8] sm:$0xff]  ;;  %v738_v32 = vld [vmem:[#allocation5 + $0x12c0] sm:$0xff] }
 0x137   :  { %4107 = vmatpush1.bf16.msra.mxu0 %v4106_v50  ;;  %v4126_v50 = vpack.c.bf16 %v662_v42, %v658_v38  ;;  %v448_v38 = vld [vmem:[#allocation5 + $0x9b0] sm:$0xff]  ;;  %v457_v42 = vld [vmem:[#allocation5 + $0x9f8] sm:$0xff]  ;;  %v711_v44 = vld [vmem:[#allocation5 + $0x11e8] sm:$0xff]  ;;  %v4804_v31 = vpack.c.bf16 %v489_v25, %v485_v24 }
 0x138   :  { %4109 = vmatprep.subr.bf16.mxu0 %v4108_v54  ;;  %v4128_v54 = vpack.c.bf16 %v671_v47, %v667_v46 }
 0x139   :  { %4751 = vmatpush1.bf16.msra.mxu1 %v4750_v59  ;;  %v4770_v59 = vpack.c.bf16 %v416_v53, %v412_v17  ;;  %v461_v17 = vld [vmem:[#allocation5 + $0xa18] sm:$0xff] }
 0x13a   :  { %4753 = vmatprep.subr.bf16.mxu1 %v4752_v61  ;;  %v4772_v61 = vpack.c.bf16 %v425_v56, %v421_v16  ;;  %v465_v53 = vld [vmem:[#allocation5 + $0xa38] sm:$0xff] }
 0x13b   :  { %4111 = vmatpush1.bf16.msra.mxu0 %v4110_v60  ;;  %v4130_v60 = vpack.c.bf16 %v670_v55, %v666_v52  ;;  %v710_v52 = vld [vmem:[#allocation5 + $0x11e0] sm:$0xff]  ;;  %v719_v55 = vld [vmem:[#allocation5 + $0x1228] sm:$0xff] }
 0x13c   :  { %4113 = vmatprep.subr.bf16.mxu0 %v4112_v1  ;;  %v4132_v1 = vpack.c.bf16 %v679_v58, %v675_v57  ;;  %v4792_v57 = vpack.c.bf16 %v465_v53, %v461_v17  ;;  %v714_v58 = vld [vmem:[#allocation5 + $0x1200] sm:$0xff] }
 0x13d   :  { %4755 = vmatpush1.bf16.msra.mxu1 %v4754_v6  ;;  %v4774_v6 = vpack.c.bf16 %v424_v0, %v420_v63  ;;  %v469_v63 = vld [vmem:[#allocation5 + $0xa58] sm:$0xff] }
 0x13e   :  { %4757 = vmatprep.subr.bf16.mxu1 %v4756_v8  ;;  %v682_v8 = vld [vmem:[#allocation5 + $0x1100] sm:$0xff]  ;;  %v473_v0 = vld [vmem:[#allocation5 + $0xa78] sm:$0xff] }
 0x13f   :  { %4115 = vmatpush1.bf16.msra.mxu0 %v4114_v7  ;;  %v4776_v7 = vpack.c.bf16 %v433_v3, %v429_v2  ;;  %v4796_v4 = vpack.c.bf16 %v473_v0, %v469_v63 }
 0x140   :  { %4117 = vmatprep.subr.bf16.mxu0 %v4116_v12  ;;  %v686_v12 = vld [vmem:[#allocation5 + $0x1120] sm:$0xff] }
 0x141   :  { %4759 = vmatpush1.bf16.msra.mxu1 %v4758_v21  ;;  %v4138_v21 = vpack.c.bf16 %v686_v12, %v682_v8  ;;  %v726_v8 = vld [vmem:[#allocation5 + $0x1260] sm:$0xff]  ;;  %v735_v12 = vld [vmem:[#allocation5 + $0x12a8] sm:$0xff] }
 0x142   :  { %4761 = vmatprep.subr.bf16.mxu1 %v4760_v23  ;;  %v690_v23 = vld [vmem:[#allocation5 + $0x1140] sm:$0xff] }
 0x143   :  { %4119 = vmatpush1.bf16.msra.mxu0 %v4118_v22  ;;  %v4780_v22 = vpack.c.bf16 %v441_v14, %v437_v13  ;;  %v4158_v14 = vpack.c.bf16 %v726_v8, %v722_v5  ;;  %v766_v5 = vld [vmem:[#allocation5 + $0x13a0] sm:$0xff]  ;;  %v775_v8 = vld [vmem:[#allocation5 + $0x13e8] sm:$0xff] }
 0x144   :  { %4121 = vmatprep.subr.bf16.mxu0 %v4120_v27  ;;  %2684 = vmatmul.mubr.f32.vlgmr.msra.gmra.mrb[2].mxu1 %v5626_v45  ;;  %v694_v27 = vld [vmem:[#allocation5 + $0x1160] sm:$0xff] }
 0x145   :  { %4763 = vmatpush1.bf16.msra.mxu1 %v4762_v35  ;;  %2754 = vmatprep.mubr.f32.mxu1 %v5977_v28  ;;  %v4134_v28 = vpack.c.bf16 %v678_v19, %v674_v62  ;;  %v4784_v35 = vpack.c.bf16 %v449_v30, %v445_v29  ;;  %v718_v62 = vld [vmem:[#allocation5 + $0x1220] sm:$0xff]  ;;  %v727_v19 = vld [vmem:[#allocation5 + $0x1268] sm:$0xff] }
 0x146   :  { %1974 = vmatmul.mubr.f32.vlgmr.msra.gmra.mrb[0].mxu0 %v120_v34  ;;  %4765 = vmatprep.subr.bf16.mxu1 %v4764_v37  ;;  %v4142_v34 = vpack.c.bf16 %v694_v27, %v690_v23  ;;  %v444_v37 = vld [vmem:[#allocation5 + $0x990] sm:$0xff]  ;;  %v4154_v3 = vpack.c.bf16 %v718_v62, %v714_v58  ;;  %v734_v23 = vld [vmem:[#allocation5 + $0x12a0] sm:$0xff]  ;;  %v743_v27 = vld [vmem:[#allocation5 + $0x12e8] sm:$0xff] }
 0x147   :  { %4123 = vmatpush1.bf16.msra.mxu0 %v4122_v36  ;;  %2044 = vmatprep.mubr.f32.mxu0 %v123_v48  ;;  %v698_v36 = vld [vmem:[#allocation5 + $0x1180] sm:$0xff]  ;;  %v4786_v45 = vpack.c.bf16 %v448_v38, %v444_v37  ;;  %v4162_v30 = vpack.c.bf16 %v734_v23, %v730_v18  ;;  %v493_v37 = vld [vmem:[#allocation5 + $0xb18] sm:$0xff]  ;;  %v767_v62 = vld [vmem:[#allocation5 + $0x13a8] sm:$0xff] }
 0x148   :  { %4125 = vmatprep.subr.bf16.mxu0 %v4124_v41  ;;  %v453_v41 = vld [vmem:[#allocation5 + $0x9d8] sm:$0xff]  ;;  %v4146_v46 = vpack.c.bf16 %v702_v40, %v698_v36  ;;  %v706_v48 = vld [vmem:[#allocation5 + $0x11c0] sm:$0xff]  ;;  %v751_v40 = vld [vmem:[#allocation5 + $0x1328] sm:$0xff] }
 0x149   :  { %4767 = vmatpush1.bf16.msra.mxu1 %v4766_v49  ;;  %v4788_v47 = vpack.c.bf16 %v457_v42, %v453_v41  ;;  %v452_v49 = vld [vmem:[#allocation5 + $0x9d0] sm:$0xff]  ;;  %v4150_v56 = vpack.c.bf16 %v710_v52, %v706_v48  ;;  %v742_v36 = vld [vmem:[#allocation5 + $0x12e0] sm:$0xff]  ;;  %v497_v38 = vld [vmem:[#allocation5 + $0xb38] sm:$0xff] }
 0x14a   :  { %4769 = vmatprep.subr.bf16.mxu1 %v4768_v51  ;;  %v4148_v51 = vpack.c.bf16 %v711_v44, %v707_v43  ;;  %v4166_v42 = vpack.c.bf16 %v742_v36, %v738_v32  ;;  %v4808_v43 = vpack.c.bf16 %v497_v38, %v493_v37  ;;  %v746_v44 = vld [vmem:[#allocation5 + $0x1300] sm:$0xff]  ;;  %v759_v52 = vld [vmem:[#allocation5 + $0x1368] sm:$0xff] }
 0x14b   :  { %4127 = vmatpush1.bf16.msra.mxu0 %v4126_v50  ;;  %v456_v50 = vld [vmem:[#allocation5 + $0x9f0] sm:$0xff]  ;;  %v750_v48 = vld [vmem:[#allocation5 + $0x1320] sm:$0xff]  ;;  %v783_v23 = vld [vmem:[#allocation5 + $0x1428] sm:$0xff] }
 0x14c   :  { %4129 = vmatprep.subr.bf16.mxu0 %v4128_v54  ;;  %v715_v54 = vld [vmem:[#allocation5 + $0x1208] sm:$0xff]  ;;  %v4790_v16 = vpack.c.bf16 %v456_v50, %v452_v49  ;;  %v501_v49 = vld [vmem:[#allocation5 + $0xb58] sm:$0xff]  ;;  %v4170_v53 = vpack.c.bf16 %v750_v48, %v746_v44  ;;  %v758_v58 = vld [vmem:[#allocation5 + $0x1360] sm:$0xff] }
 0x14d   :  { %4771 = vmatpush1.bf16.msra.mxu1 %v4770_v59  ;;  %v460_v59 = vld [vmem:[#allocation5 + $0xa10] sm:$0xff]  ;;  %v505_v50 = vld [vmem:[#allocation5 + $0xb78] sm:$0xff]  ;;  %v774_v18 = vld [vmem:[#allocation5 + $0x13e0] sm:$0xff] }
 0x14e   :  { %4773 = vmatprep.subr.bf16.mxu1 %v4772_v61  ;;  %v4152_v61 = vpack.c.bf16 %v719_v55, %v715_v54  ;;  %v4812_v54 = vpack.c.bf16 %v505_v50, %v501_v49  ;;  %v754_v55 = vld [vmem:[#allocation5 + $0x1340] sm:$0xff]  ;;  %v791_v36 = vld [vmem:[#allocation5 + $0x1468] sm:$0xff] }
 0x14f   :  { %4131 = vmatpush1.bf16.msra.mxu0 %v4130_v60  ;;  %v464_v60 = vld [vmem:[#allocation5 + $0xa30] sm:$0xff]  ;;  %v4174_v0 = vpack.c.bf16 %v758_v58, %v754_v55  ;;  %v782_v32 = vld [vmem:[#allocation5 + $0x1420] sm:$0xff]  ;;  %v795_v49 = vld [vmem:[#allocation5 + $0x1488] sm:$0xff] }
 0x150   :  { %4133 = vmatprep.subr.bf16.mxu0 %v4132_v1  ;;  %v723_v1 = vld [vmem:[#allocation5 + $0x1248] sm:$0xff]  ;;  %v4794_v2 = vpack.c.bf16 %v464_v60, %v460_v59  ;;  %v509_v59 = vld [vmem:[#allocation5 + $0xb98] sm:$0xff]  ;;  %v122_v37 = vld [vmem:[#allocation2 + $0x40] sm:$0xff] }
 0x151   :  { %4775 = vmatpush1.bf16.msra.mxu1 %v4774_v6  ;;  %v468_v6 = vld [vmem:[#allocation5 + $0xa50] sm:$0xff]  ;;  %v513_v60 = vld [vmem:[#allocation5 + $0xbb8] sm:$0xff]  ;;  %v5627_v48 = vld [vmem:[#allocation2 + $0x20] sm:$0xff] }
 0x152   :  { %4777 = vmatprep.subr.bf16.mxu1 %v4776_v7  ;;  %v4156_v7 = vpack.c.bf16 %v727_v19, %v723_v1  ;;  %v4816_v1 = vpack.c.bf16 %v513_v60, %v509_v59  ;;  %v762_v19 = vld [vmem:[#allocation5 + $0x1380] sm:$0xff]  ;;  %v799_v50 = vld [vmem:[#allocation5 + $0x14a8] sm:$0xff]  ;;  %v540_v55 = vld [vmem:[#allocation5 + $0xc90] sm:$0xff] }
 0x153   :  { %4135 = vmatpush1.bf16.msra.mxu0 %v4134_v28  ;;  %v472_v28 = vld [vmem:[#allocation5 + $0xa70] sm:$0xff]  ;;  %v4178_v10 = vpack.c.bf16 %v766_v5, %v762_v19  ;;  %v549_v58 = vld [vmem:[#allocation5 + $0xcd8] sm:$0xff]  ;;  %v803_v60 = vld [vmem:[#allocation5 + $0x14c8] sm:$0xff] }
 0x154   :  { %4137 = vmatprep.subr.bf16.mxu0 %v4136_v11  ;;  %v731_v11 = vld [vmem:[#allocation5 + $0x1288] sm:$0xff]  ;;  %v4798_v13 = vpack.c.bf16 %v472_v28, %v468_v6  ;;  %v517_v6 = vld [vmem:[#allocation5 + $0xbd8] sm:$0xff]  ;;  %v802_v19 = vld [vmem:[#allocation5 + $0x14c0] sm:$0xff] }
 0x155   :  { %4779 = vmatpush1.bf16.msra.mxu1 %v4778_v20  ;;  %v476_v20 = vld [vmem:[#allocation5 + $0xa90] sm:$0xff]  ;;  %v521_v28 = vld [vmem:[#allocation5 + $0xbf8] sm:$0xff]  ;;  %v806_v5 = vld [vmem:[#allocation5 + $0x14e0] sm:$0xff] }
 0x156   :  { %4781 = vmatprep.subr.bf16.mxu1 %v4780_v22  ;;  %v4160_v22 = vpack.c.bf16 %v735_v12, %v731_v11  ;;  %v4820_v11 = vpack.c.bf16 %v521_v28, %v517_v6  ;;  %v770_v12 = vld [vmem:[#allocation5 + $0x13c0] sm:$0xff]  ;;  %v553_v59 = vld [vmem:[#allocation5 + $0xcf8] sm:$0xff] }
 0x157   :  { %4139 = vmatpush1.bf16.msra.mxu0 %v4138_v21  ;;  %v480_v21 = vld [vmem:[#allocation5 + $0xab0] sm:$0xff]  ;;  %v4182_v25 = vpack.c.bf16 %v774_v18, %v770_v12  ;;  %v557_v6 = vld [vmem:[#allocation5 + $0xd18] sm:$0xff]  ;;  %v810_v12 = vld [vmem:[#allocation5 + $0x1500] sm:$0xff] }
 0x158   :  { %4141 = vmatprep.subr.bf16.mxu0 %v4140_v26  ;;  %v739_v26 = vld [vmem:[#allocation5 + $0x12c8] sm:$0xff]  ;;  %v4802_v29 = vpack.c.bf16 %v480_v21, %v476_v20  ;;  %v525_v20 = vld [vmem:[#allocation5 + $0xc18] sm:$0xff]  ;;  %v814_v18 = vld [vmem:[#allocation5 + $0x1520] sm:$0xff] }
 0x159   :  { %4783 = vmatpush1.bf16.msra.mxu1 %v4782_v33  ;;  %v484_v33 = vld [vmem:[#allocation5 + $0xad0] sm:$0xff]  ;;  %v529_v21 = vld [vmem:[#allocation5 + $0xc38] sm:$0xff] }
 0x15a   :  { %4785 = vmatprep.subr.bf16.mxu1 %v4784_v35  ;;  %v4164_v35 = vpack.c.bf16 %v743_v27, %v739_v26  ;;  %v4824_v26 = vpack.c.bf16 %v529_v21, %v525_v20  ;;  %v778_v27 = vld [vmem:[#allocation5 + $0x1400] sm:$0xff]  ;;  %v561_v28 = vld [vmem:[#allocation5 + $0xd38] sm:$0xff] }
 0x15b   :  { %4143 = vmatpush1.bf16.msra.mxu0 %v4142_v34  ;;  %v488_v34 = vld [vmem:[#allocation5 + $0xaf0] sm:$0xff]  ;;  %v565_v20 = vld [vmem:[#allocation5 + $0xd58] sm:$0xff] }
 0x15c   :  { %4145 = vmatprep.subr.bf16.mxu0 %v4144_v39  ;;  %v747_v39 = vld [vmem:[#allocation5 + $0x1308] sm:$0xff]  ;;  %v4806_v41 = vpack.c.bf16 %v488_v34, %v484_v33  ;;  %v533_v33 = vld [vmem:[#allocation5 + $0xc58] sm:$0xff] }
 0x15d   :  { %4787 = vmatpush1.bf16.msra.mxu1 %v4786_v45  ;;  %v492_v45 = vld [vmem:[#allocation5 + $0xb10] sm:$0xff]  ;;  %v537_v34 = vld [vmem:[#allocation5 + $0xc78] sm:$0xff] }
 0x15e   :  { %4789 = vmatprep.subr.bf16.mxu1 %v4788_v47  ;;  %v4168_v47 = vpack.c.bf16 %v751_v40, %v747_v39  ;;  %v4186_v39 = vpack.c.bf16 %v782_v32, %v778_v27  ;;  %v4828_v40 = vpack.c.bf16 %v537_v34, %v533_v33  ;;  %v569_v21 = vld [vmem:[#allocation5 + $0xd78] sm:$0xff]  ;;  %v818_v27 = vld [vmem:[#allocation5 + $0x1540] sm:$0xff] }
 0x15f   :  { %4147 = vmatpush1.bf16.msra.mxu0 %v4146_v46  ;;  %v496_v46 = vld [vmem:[#allocation5 + $0xb30] sm:$0xff]  ;;  %v822_v32 = vld [vmem:[#allocation5 + $0x1560] sm:$0xff]  ;;  %v573_v33 = vld [vmem:[#allocation5 + $0xd98] sm:$0xff] }
 0x160   :  { %4149 = vmatprep.subr.bf16.mxu0 %v4148_v51  ;;  %v755_v51 = vld [vmem:[#allocation5 + $0x1348] sm:$0xff]  ;;  %v4810_v17 = vpack.c.bf16 %v496_v46, %v492_v45  ;;  %v790_v45 = vld [vmem:[#allocation5 + $0x1460] sm:$0xff]  ;;  %v541_v46 = vld [vmem:[#allocation5 + $0xc98] sm:$0xff] }
 0x161   :  { %4791 = vmatpush1.bf16.msra.mxu1 %v4790_v16  ;;  %v500_v16 = vld [vmem:[#allocation5 + $0xb50] sm:$0xff]  ;;  %v577_v34 = vld [vmem:[#allocation5 + $0xdb8] sm:$0xff] }
 0x162   :  { %4793 = vmatprep.subr.bf16.mxu1 %v4792_v57  ;;  %v4172_v57 = vpack.c.bf16 %v759_v52, %v755_v51  ;;  %v125_v51 = vld [vmem:[#allocation2 + $0x58] sm:$0xff] }
 0x163   :  { %4151 = vmatpush1.bf16.msra.mxu0 %v4150_v56  ;;  %v504_v56 = vld [vmem:[#allocation5 + $0xb70] sm:$0xff] }
 0x164   :  { %4153 = vmatprep.subr.bf16.mxu0 %v4152_v61  ;;  %v763_v61 = vld [vmem:[#allocation5 + $0x1388] sm:$0xff]  ;;  %v4814_v63 = vpack.c.bf16 %v504_v56, %v500_v16  ;;  %v544_v16 = vld [vmem:[#allocation5 + $0xcb0] sm:$0xff]  ;;  %v4192_v56 = vpack.c.bf16 %v799_v50, %v795_v49 }
 0x165   :  { %4795 = vmatpush1.bf16.msra.mxu1 %v4794_v2  ;;  %v508_v2 = vld [vmem:[#allocation5 + $0xb90] sm:$0xff]  ;;  %v835_v49 = vld [vmem:[#allocation5 + $0x15c8] sm:$0xff] }
 0x166   :  { %4797 = vmatprep.subr.bf16.mxu1 %v4796_v4  ;;  %v4176_v4 = vpack.c.bf16 %v767_v62, %v763_v61  ;;  %v807_v61 = vld [vmem:[#allocation5 + $0x14e8] sm:$0xff]  ;;  %v5628_v62 = vld [vmem:[#allocation2 + $0x38] sm:$0xff] }
 0x167   :  { %4155 = vmatpush1.bf16.msra.mxu0 %v4154_v3  ;;  %v512_v3 = vld [vmem:[#allocation5 + $0xbb0] sm:$0xff]  ;;  %v839_v50 = vld [vmem:[#allocation5 + $0x15e8] sm:$0xff] }
 0x168   :  { %4157 = vmatprep.subr.bf16.mxu0 %v4156_v7  ;;  %v771_v7 = vld [vmem:[#allocation5 + $0x13c8] sm:$0xff]  ;;  %v4818_v9 = vpack.c.bf16 %v512_v3, %v508_v2  ;;  %v548_v2 = vld [vmem:[#allocation5 + $0xcd0] sm:$0xff] }
 0x169   :  { %4799 = vmatpush1.bf16.msra.mxu1 %v4798_v13  ;;  %v516_v13 = vld [vmem:[#allocation5 + $0xbd0] sm:$0xff] }
 0x16a   :  { %4801 = vmatprep.subr.bf16.mxu1 %v4800_v15  ;;  %v4180_v15 = vpack.c.bf16 %v775_v8, %v771_v7  ;;  %v552_v3 = vld [vmem:[#allocation5 + $0xcf0] sm:$0xff]  ;;  %v811_v7 = vld [vmem:[#allocation5 + $0x1508] sm:$0xff] }
 0x16b   :  { %4159 = vmatpush1.bf16.msra.mxu0 %v4158_v14  ;;  %v520_v14 = vld [vmem:[#allocation5 + $0xbf0] sm:$0xff]  ;;  %v815_v8 = vld [vmem:[#allocation5 + $0x1528] sm:$0xff] }
 0x16c   :  { %4161 = vmatprep.subr.bf16.mxu0 %v4160_v22  ;;  %v779_v22 = vld [vmem:[#allocation5 + $0x1408] sm:$0xff]  ;;  %v4822_v24 = vpack.c.bf16 %v520_v14, %v516_v13  ;;  %v556_v13 = vld [vmem:[#allocation5 + $0xd10] sm:$0xff] }
 0x16d   :  { %4803 = vmatpush1.bf16.msra.mxu1 %v4802_v29  ;;  %v524_v29 = vld [vmem:[#allocation5 + $0xc10] sm:$0xff] }
 0x16e   :  { %4805 = vmatprep.subr.bf16.mxu1 %v4804_v31  ;;  %v4184_v31 = vpack.c.bf16 %v783_v23, %v779_v22  ;;  %v560_v14 = vld [vmem:[#allocation5 + $0xd30] sm:$0xff]  ;;  %v819_v22 = vld [vmem:[#allocation5 + $0x1548] sm:$0xff] }
 0x16f   :  { %4163 = vmatpush1.bf16.msra.mxu0 %v4162_v30  ;;  %v528_v30 = vld [vmem:[#allocation5 + $0xc30] sm:$0xff]  ;;  %v823_v23 = vld [vmem:[#allocation5 + $0x1568] sm:$0xff] }
 0x170   :  { %4165 = vmatprep.subr.bf16.mxu0 %v4164_v35  ;;  %v787_v35 = vld [vmem:[#allocation5 + $0x1448] sm:$0xff]  ;;  %v4826_v38 = vpack.c.bf16 %v528_v30, %v524_v29  ;;  %v564_v29 = vld [vmem:[#allocation5 + $0xd50] sm:$0xff] }
 0x171   :  { %4807 = vmatpush1.bf16.msra.mxu1 %v4806_v41  ;;  %v786_v41 = vld [vmem:[#allocation5 + $0x1440] sm:$0xff]  ;;  %v4188_v44 = vpack.c.bf16 %v791_v36, %v787_v35  ;;  %v568_v30 = vld [vmem:[#allocation5 + $0xd70] sm:$0xff]  ;;  %v827_v35 = vld [vmem:[#allocation5 + $0x1588] sm:$0xff] }
 0x172   :  { %4809 = vmatprep.subr.bf16.mxu1 %v4808_v43  ;;  %v536_v43 = vld [vmem:[#allocation5 + $0xc70] sm:$0xff]  ;;  %v831_v36 = vld [vmem:[#allocation5 + $0x15a8] sm:$0xff] }
 0x173   :  { %4167 = vmatpush1.bf16.msra.mxu0 %v4166_v42  ;;  %v532_v42 = vld [vmem:[#allocation5 + $0xc50] sm:$0xff] }
 0x174   :  { %4169 = vmatprep.subr.bf16.mxu0 %v4168_v47  ;;  %v545_v47 = vld [vmem:[#allocation5 + $0xcb8] sm:$0xff]  ;;  %v4830_v52 = vpack.c.bf16 %v536_v43, %v532_v42  ;;  %v576_v42 = vld [vmem:[#allocation5 + $0xdb0] sm:$0xff] }
 0x175   :  { %4811 = vmatpush1.bf16.msra.mxu1 %v4810_v17  ;;  %v4190_v17 = vpack.c.bf16 %v790_v45, %v786_v41  ;;  %v572_v41 = vld [vmem:[#allocation5 + $0xd90] sm:$0xff]  ;;  %v830_v45 = vld [vmem:[#allocation5 + $0x15a0] sm:$0xff] }
 0x176   :  { %4813 = vmatprep.subr.bf16.mxu1 %v4812_v54  ;;  %v794_v54 = vld [vmem:[#allocation5 + $0x1480] sm:$0xff] }
 0x177   :  { %4171 = vmatpush1.bf16.msra.mxu0 %v4170_v53  ;;  %v4832_v53 = vpack.c.bf16 %v545_v47, %v541_v46  ;;  %v581_v46 = vld [vmem:[#allocation5 + $0xdd8] sm:$0xff] }
 0x178   :  { %4173 = vmatprep.subr.bf16.mxu0 %v4172_v57  ;;  %v798_v57 = vld [vmem:[#allocation5 + $0x14a0] sm:$0xff]  ;;  %v585_v47 = vld [vmem:[#allocation5 + $0xdf8] sm:$0xff] }
 0x179   :  { %4815 = vmatpush1.bf16.msra.mxu1 %v4814_v63  ;;  %v4834_v63 = vpack.c.bf16 %v544_v16, %v540_v55  ;;  %v584_v55 = vld [vmem:[#allocation5 + $0xdf0] sm:$0xff]  ;;  %v4212_v16 = vpack.c.bf16 %v839_v50, %v835_v49 }
 0x17a   :  { %4817 = vmatprep.subr.bf16.mxu1 %v4816_v1  ;;  %v4836_v1 = vpack.c.bf16 %v553_v59, %v549_v58  ;;  %v593_v58 = vld [vmem:[#allocation5 + $0xe38] sm:$0xff]  ;;  %v843_v59 = vld [vmem:[#allocation5 + $0x1608] sm:$0xff] }
 0x17b   :  { %4175 = vmatpush1.bf16.msra.mxu0 %v4174_v0  ;;  %v4194_v0 = vpack.c.bf16 %v798_v57, %v794_v54  ;;  %v580_v54 = vld [vmem:[#allocation5 + $0xdd0] sm:$0xff]  ;;  %v589_v57 = vld [vmem:[#allocation5 + $0xe18] sm:$0xff] }
 0x17c   :  { %4177 = vmatprep.subr.bf16.mxu0 %v4176_v4  ;;  %v4196_v4 = vpack.c.bf16 %v807_v61, %v803_v60  ;;  %v847_v60 = vld [vmem:[#allocation5 + $0x1628] sm:$0xff]  ;;  %v4854_v61 = vpack.c.bf16 %v584_v55, %v580_v54  ;;  %v878_v55 = vld [vmem:[#allocation5 + $0x1720] sm:$0xff] }
 0x17d   :  { %4819 = vmatpush1.bf16.msra.mxu1 %v4818_v9  ;;  %v4838_v9 = vpack.c.bf16 %v552_v3, %v548_v2  ;;  %v4216_v2 = vpack.c.bf16 %v847_v60, %v843_v59  ;;  %v846_v3 = vld [vmem:[#allocation5 + $0x1620] sm:$0xff] }
 0x17e   :  { %4821 = vmatprep.subr.bf16.mxu1 %v4820_v11  ;;  %v4840_v11 = vpack.c.bf16 %v561_v28, %v557_v6  ;;  %v851_v6 = vld [vmem:[#allocation5 + $0x1648] sm:$0xff] }
 0x17f   :  { %4179 = vmatpush1.bf16.msra.mxu0 %v4178_v10  ;;  %v4198_v10 = vpack.c.bf16 %v806_v5, %v802_v19  ;;  %v592_v19 = vld [vmem:[#allocation5 + $0xe30] sm:$0xff]  ;;  %v601_v5 = vld [vmem:[#allocation5 + $0xe78] sm:$0xff]  ;;  %v855_v28 = vld [vmem:[#allocation5 + $0x1668] sm:$0xff] }
 0x180   :  { %4181 = vmatprep.subr.bf16.mxu0 %v4180_v15  ;;  %v4200_v15 = vpack.c.bf16 %v815_v8, %v811_v7 }
 0x181   :  { %4823 = vmatpush1.bf16.msra.mxu1 %v4822_v24  ;;  %v4842_v24 = vpack.c.bf16 %v560_v14, %v556_v13  ;;  %v4220_v13 = vpack.c.bf16 %v855_v28, %v851_v6  ;;  %v854_v14 = vld [vmem:[#allocation5 + $0x1660] sm:$0xff] }
 0x182   :  { %4825 = vmatprep.subr.bf16.mxu1 %v4824_v26  ;;  %v4844_v26 = vpack.c.bf16 %v569_v21, %v565_v20  ;;  %v859_v20 = vld [vmem:[#allocation5 + $0x1688] sm:$0xff] }
 0x183   :  { %4183 = vmatpush1.bf16.msra.mxu0 %v4182_v25  ;;  %v4202_v25 = vpack.c.bf16 %v814_v18, %v810_v12  ;;  %v600_v12 = vld [vmem:[#allocation5 + $0xe70] sm:$0xff]  ;;  %v609_v18 = vld [vmem:[#allocation5 + $0xeb8] sm:$0xff]  ;;  %v863_v21 = vld [vmem:[#allocation5 + $0x16a8] sm:$0xff] }
 0x184   :  { %4185 = vmatprep.subr.bf16.mxu0 %v4184_v31  ;;  %2755 = vmatmul.mubr.f32.vlgmr.msra.gmra.mrb[2].mxu1 %v5627_v48  ;;  %v4204_v31 = vpack.c.bf16 %v823_v23, %v819_v22 }
 0x185   :  { %4827 = vmatpush1.bf16.msra.mxu1 %v4826_v38  ;;  %2825 = vmatprep.mubr.f32.mxu1 %v5628_v62  ;;  %v4206_v38 = vpack.c.bf16 %v822_v32, %v818_v27  ;;  %v608_v27 = vld [vmem:[#allocation5 + $0xeb0] sm:$0xff]  ;;  %v617_v32 = vld [vmem:[#allocation5 + $0xef8] sm:$0xff] }
 0x186   :  { %2045 = vmatmul.mubr.f32.vlgmr.msra.gmra.mrb[0].mxu0 %v122_v37  ;;  %4829 = vmatprep.subr.bf16.mxu1 %v4828_v40  ;;  %v4846_v37 = vpack.c.bf16 %v568_v30, %v564_v29  ;;  %v826_v40 = vld [vmem:[#allocation5 + $0x1580] sm:$0xff]  ;;  %v4224_v29 = vpack.c.bf16 %v863_v21, %v859_v20 }
 0x187   :  { %4187 = vmatpush1.bf16.msra.mxu0 %v4186_v39  ;;  %2115 = vmatprep.mubr.f32.mxu0 %v125_v51  ;;  %v4848_v39 = vpack.c.bf16 %v577_v34, %v573_v33  ;;  %v4850_v51 = vpack.c.bf16 %v576_v42, %v572_v41  ;;  %v862_v30 = vld [vmem:[#allocation5 + $0x16a0] sm:$0xff]  ;;  %v867_v33 = vld [vmem:[#allocation5 + $0x16c8] sm:$0xff] }
 0x188   :  { %4189 = vmatprep.subr.bf16.mxu0 %v4188_v44  ;;  %v4208_v44 = vpack.c.bf16 %v831_v36, %v827_v35  ;;  %v871_v34 = vld [vmem:[#allocation5 + $0x16e8] sm:$0xff]  ;;  %v870_v42 = vld [vmem:[#allocation5 + $0x16e0] sm:$0xff] }
 0x189   :  { %4831 = vmatpush1.bf16.msra.mxu1 %v4830_v52  ;;  %v4210_v52 = vpack.c.bf16 %v830_v45, %v826_v40  ;;  %v616_v40 = vld [vmem:[#allocation5 + $0xef0] sm:$0xff]  ;;  %v4228_v41 = vpack.c.bf16 %v871_v34, %v867_v33  ;;  %v625_v45 = vld [vmem:[#allocation5 + $0xf38] sm:$0xff] }
 0x18a   :  { %4833 = vmatprep.subr.bf16.mxu1 %v4832_v53  ;;  %v834_v53 = vld [vmem:[#allocation5 + $0x15c0] sm:$0xff] }
 0x18b   :  { %4191 = vmatpush1.bf16.msra.mxu0 %v4190_v17  ;;  %v4852_v17 = vpack.c.bf16 %v585_v47, %v581_v46  ;;  %v875_v46 = vld [vmem:[#allocation5 + $0x1708] sm:$0xff] }
 0x18c   :  { %4193 = vmatprep.subr.bf16.mxu0 %v4192_v56  ;;  %v838_v56 = vld [vmem:[#allocation5 + $0x15e0] sm:$0xff]  ;;  %v879_v47 = vld [vmem:[#allocation5 + $0x1728] sm:$0xff] }
 0x18d   :  { %4835 = vmatpush1.bf16.msra.mxu1 %v4834_v63  ;;  %v4214_v62 = vpack.c.bf16 %v838_v56, %v834_v53  ;;  %v4856_v63 = vpack.c.bf16 %v593_v58, %v589_v57  ;;  %v624_v53 = vld [vmem:[#allocation5 + $0xf30] sm:$0xff]  ;;  %v4232_v54 = vpack.c.bf16 %v879_v47, %v875_v46  ;;  %v633_v56 = vld [vmem:[#allocation5 + $0xf78] sm:$0xff]  ;;  %v883_v57 = vld [vmem:[#allocation5 + $0x1748] sm:$0xff] }
 0x18e   :  { %4837 = vmatprep.subr.bf16.mxu1 %v4836_v1  ;;  %v588_v1 = vld [vmem:[#allocation5 + $0xe10] sm:$0xff]  ;;  %v887_v58 = vld [vmem:[#allocation5 + $0x1768] sm:$0xff] }
 0x18f   :  { %4195 = vmatpush1.bf16.msra.mxu0 %v4194_v0  ;;  %v842_v0 = vld [vmem:[#allocation5 + $0x1600] sm:$0xff]  ;;  %v4858_v7 = vpack.c.bf16 %v592_v19, %v588_v1  ;;  %v4236_v1 = vpack.c.bf16 %v887_v58, %v883_v57  ;;  %v124_v46 = vld [vmem:[#allocation2 + $0x50] sm:$0xff]  ;;  %v923_v57 = vld [vmem:[#allocation5 + $0x1888] sm:$0xff] }
 0x190   :  { %4197 = vmatprep.subr.bf16.mxu0 %v4196_v4  ;;  %v597_v4 = vld [vmem:[#allocation5 + $0xe58] sm:$0xff]  ;;  %v4218_v8 = vpack.c.bf16 %v846_v3, %v842_v0  ;;  %v632_v0 = vld [vmem:[#allocation5 + $0xf70] sm:$0xff]  ;;  %v886_v19 = vld [vmem:[#allocation5 + $0x1760] sm:$0xff] }
 0x191   :  { %4839 = vmatpush1.bf16.msra.mxu1 %v4838_v9  ;;  %v4860_v9 = vpack.c.bf16 %v601_v5, %v597_v4  ;;  %v641_v3 = vld [vmem:[#allocation5 + $0xfb8] sm:$0xff]  ;;  %v891_v4 = vld [vmem:[#allocation5 + $0x1788] sm:$0xff] }
 0x192   :  { %4841 = vmatprep.subr.bf16.mxu1 %v4840_v11  ;;  %v596_v11 = vld [vmem:[#allocation5 + $0xe50] sm:$0xff]  ;;  %v895_v5 = vld [vmem:[#allocation5 + $0x17a8] sm:$0xff] }
 0x193   :  { %4199 = vmatpush1.bf16.msra.mxu0 %v4198_v10  ;;  %v850_v10 = vld [vmem:[#allocation5 + $0x1640] sm:$0xff]  ;;  %v4862_v22 = vpack.c.bf16 %v600_v12, %v596_v11  ;;  %v4240_v11 = vpack.c.bf16 %v895_v5, %v891_v4  ;;  %v927_v58 = vld [vmem:[#allocation5 + $0x18a8] sm:$0xff]  ;;  %v681_v4 = vld [vmem:[#allocation5 + $0x10f8] sm:$0xff] }
 0x194   :  { %4201 = vmatprep.subr.bf16.mxu0 %v4200_v15  ;;  %v605_v15 = vld [vmem:[#allocation5 + $0xe98] sm:$0xff]  ;;  %v4222_v23 = vpack.c.bf16 %v854_v14, %v850_v10  ;;  %v640_v10 = vld [vmem:[#allocation5 + $0xfb0] sm:$0xff]  ;;  %v894_v12 = vld [vmem:[#allocation5 + $0x17a0] sm:$0xff] }
 0x195   :  { %4843 = vmatpush1.bf16.msra.mxu1 %v4842_v24  ;;  %v4864_v24 = vpack.c.bf16 %v609_v18, %v605_v15  ;;  %v649_v14 = vld [vmem:[#allocation5 + $0xff8] sm:$0xff]  ;;  %v899_v15 = vld [vmem:[#allocation5 + $0x17c8] sm:$0xff] }
 0x196   :  { %4845 = vmatprep.subr.bf16.mxu1 %v4844_v26  ;;  %v604_v26 = vld [vmem:[#allocation5 + $0xe90] sm:$0xff]  ;;  %v903_v18 = vld [vmem:[#allocation5 + $0x17e8] sm:$0xff] }
 0x197   :  { %4203 = vmatpush1.bf16.msra.mxu0 %v4202_v25  ;;  %v5983_v43 = vpop.f32.mrb[0].mxu1  ;;  %v858_v25 = vld [vmem:[#allocation5 + $0x1680] sm:$0xff]  ;;  %v4866_v35 = vpack.c.bf16 %v608_v27, %v604_v26  ;;  %v4244_v26 = vpack.c.bf16 %v903_v18, %v899_v15  ;;  %v931_v5 = vld [vmem:[#allocation5 + $0x18c8] sm:$0xff]  ;;  %v685_v15 = vld [vmem:[#allocation5 + $0x1118] sm:$0xff] }
 0x198   :  { %4205 = vmatprep.subr.bf16.mxu0 %v4204_v31  ;;  %v5985_v48 = vpop.f32.mrb[1].mxu1  ;;  %v613_v31 = vld [vmem:[#allocation5 + $0xed8] sm:$0xff]  ;;  %v4226_v36 = vpack.c.bf16 %v862_v30, %v858_v25  ;;  %v648_v25 = vld [vmem:[#allocation5 + $0xff0] sm:$0xff]  ;;  %v902_v27 = vld [vmem:[#allocation5 + $0x17e0] sm:$0xff] }
 0x199   :  { %4847 = vmatpush1.bf16.msra.mxu1 %v4846_v37  ;;  %v4868_v37 = vpack.c.bf16 %v617_v32, %v613_v31  ;;  %v657_v30 = vld [vmem:[#allocation5 + $0x1038] sm:$0xff]  ;;  %v907_v31 = vld [vmem:[#allocation5 + $0x1808] sm:$0xff] }
 0x19a   :  { %4849 = vmatprep.subr.bf16.mxu1 %v4848_v39  ;;  %v612_v39 = vld [vmem:[#allocation5 + $0xed0] sm:$0xff]  ;;  %v911_v32 = vld [vmem:[#allocation5 + $0x1828] sm:$0xff]  ;;  %v689_v18 = vld [vmem:[#allocation5 + $0x1138] sm:$0xff] }
 0x19b   :  { %4207 = vmatpush1.bf16.msra.mxu0 %v4206_v38  ;;  %v866_v38 = vld [vmem:[#allocation5 + $0x16c0] sm:$0xff]  ;;  %v4870_v49 = vpack.c.bf16 %v616_v40, %v612_v39  ;;  %v4248_v39 = vpack.c.bf16 %v911_v32, %v907_v31  ;;  %v693_v31 = vld [vmem:[#allocation5 + $0x1158] sm:$0xff] }
 0x19c   :  { %4209 = vmatprep.subr.bf16.mxu0 %v4208_v44  ;;  %v621_v44 = vld [vmem:[#allocation5 + $0xf18] sm:$0xff]  ;;  %v4230_v50 = vpack.c.bf16 %v870_v42, %v866_v38  ;;  %v656_v38 = vld [vmem:[#allocation5 + $0x1030] sm:$0xff]  ;;  %v910_v40 = vld [vmem:[#allocation5 + $0x1820] sm:$0xff] }
 0x19d   :  { %4851 = vmatpush1.bf16.msra.mxu1 %v4850_v51  ;;  %v4872_v51 = vpack.c.bf16 %v625_v45, %v621_v44  ;;  %v665_v42 = vld [vmem:[#allocation5 + $0x1078] sm:$0xff]  ;;  %v915_v44 = vld [vmem:[#allocation5 + $0x1848] sm:$0xff] }
 0x19e   :  { %4853 = vmatprep.subr.bf16.mxu1 %v4852_v17  ;;  %v620_v17 = vld [vmem:[#allocation5 + $0xf10] sm:$0xff]  ;;  %v919_v45 = vld [vmem:[#allocation5 + $0x1868] sm:$0xff]  ;;  %v697_v32 = vld [vmem:[#allocation5 + $0x1178] sm:$0xff] }
 0x19f   :  { %4211 = vmatpush1.bf16.msra.mxu0 %v4210_v52  ;;  %v874_v52 = vld [vmem:[#allocation5 + $0x1700] sm:$0xff]  ;;  %v4874_v59 = vpack.c.bf16 %v624_v53, %v620_v17  ;;  %v664_v17 = vld [vmem:[#allocation5 + $0x1070] sm:$0xff]  ;;  %v4252_v53 = vpack.c.bf16 %v919_v45, %v915_v44  ;;  %v701_v44 = vld [vmem:[#allocation5 + $0x1198] sm:$0xff] }
 0x1a0   :  { %4213 = vmatprep.subr.bf16.mxu0 %v4212_v16  ;;  %v629_v16 = vld [vmem:[#allocation5 + $0xf58] sm:$0xff]  ;;  %v4234_v60 = vpack.c.bf16 %v878_v55, %v874_v52  ;;  %v660_v52 = vld [vmem:[#allocation5 + $0x1050] sm:$0xff] }
 0x1a1   :  { %4855 = vmatpush1.bf16.msra.mxu1 %v4854_v61  ;;  %v4876_v61 = vpack.c.bf16 %v633_v56, %v629_v16  ;;  %v669_v55 = vld [vmem:[#allocation5 + $0x1098] sm:$0xff]  ;;  %v5629_v56 = vld [vmem:[#allocation2 + $0x30] sm:$0xff] }
 0x1a2   :  { %4857 = vmatprep.subr.bf16.mxu1 %v4856_v63  ;;  %v628_v63 = vld [vmem:[#allocation5 + $0xf50] sm:$0xff]  ;;  %v673_v16 = vld [vmem:[#allocation5 + $0x10b8] sm:$0xff] }
 0x1a3   :  { %4215 = vmatpush1.bf16.msra.mxu0 %v4214_v62  ;;  %v882_v62 = vld [vmem:[#allocation5 + $0x1740] sm:$0xff]  ;;  %v4878_v6 = vpack.c.bf16 %v632_v0, %v628_v63  ;;  %v668_v0 = vld [vmem:[#allocation5 + $0x1090] sm:$0xff]  ;;  %v705_v45 = vld [vmem:[#allocation5 + $0x11b8] sm:$0xff] }
 0x1a4   :  { %4217 = vmatprep.subr.bf16.mxu0 %v4216_v2  ;;  %v637_v2 = vld [vmem:[#allocation5 + $0xf98] sm:$0xff]  ;;  %v4238_v28 = vpack.c.bf16 %v886_v19, %v882_v62  ;;  %v4896_v62 = vpack.c.bf16 %v673_v16, %v669_v55  ;;  %v922_v63 = vld [vmem:[#allocation5 + $0x1880] sm:$0xff]  ;;  %v4256_v19 = vpack.c.bf16 %v927_v58, %v923_v57  ;;  %v963_v57 = vld [vmem:[#allocation5 + $0x19c8] sm:$0xff] }
 0x1a5   :  { %4859 = vmatpush1.bf16.msra.mxu1 %v4858_v7  ;;  %v4880_v7 = vpack.c.bf16 %v641_v3, %v637_v2  ;;  %v926_v2 = vld [vmem:[#allocation5 + $0x18a0] sm:$0xff]  ;;  %v677_v3 = vld [vmem:[#allocation5 + $0x10d8] sm:$0xff]  ;;  %v967_v58 = vld [vmem:[#allocation5 + $0x19e8] sm:$0xff] }
 0x1a6   :  { %4861 = vmatprep.subr.bf16.mxu1 %v4860_v9  ;;  %v636_v9 = vld [vmem:[#allocation5 + $0xf90] sm:$0xff]  ;;  %v958_v55 = vld [vmem:[#allocation5 + $0x19a0] sm:$0xff]  ;;  %v709_v16 = vld [vmem:[#allocation5 + $0x11d8] sm:$0xff] }
 0x1a7   :  { %4219 = vmatpush1.bf16.msra.mxu0 %v4218_v8  ;;  %v890_v8 = vld [vmem:[#allocation5 + $0x1780] sm:$0xff]  ;;  %v4882_v20 = vpack.c.bf16 %v640_v10, %v636_v9  ;;  %v4900_v9 = vpack.c.bf16 %v681_v4, %v677_v3  ;;  %v721_v3 = vld [vmem:[#allocation5 + $0x1238] sm:$0xff]  ;;  %v971_v4 = vld [vmem:[#allocation5 + $0x1a08] sm:$0xff] }
 0x1a8   :  { %4221 = vmatprep.subr.bf16.mxu0 %v4220_v13  ;;  %v645_v13 = vld [vmem:[#allocation5 + $0xfd8] sm:$0xff]  ;;  %v4242_v21 = vpack.c.bf16 %v894_v12, %v890_v8  ;;  %v4258_v8 = vpack.c.bf16 %v926_v2, %v922_v63  ;;  %v930_v10 = vld [vmem:[#allocation5 + $0x18c0] sm:$0xff]  ;;  %v680_v12 = vld [vmem:[#allocation5 + $0x10f0] sm:$0xff] }
 0x1a9   :  { %4863 = vmatpush1.bf16.msra.mxu1 %v4862_v22  ;;  %v4884_v22 = vpack.c.bf16 %v649_v14, %v645_v13  ;;  %v934_v14 = vld [vmem:[#allocation5 + $0x18e0] sm:$0xff]  ;;  %v708_v63 = vld [vmem:[#allocation5 + $0x11d0] sm:$0xff]  ;;  %v717_v2 = vld [vmem:[#allocation5 + $0x1218] sm:$0xff] }
 0x1aa   :  { %4865 = vmatprep.subr.bf16.mxu1 %v4864_v24  ;;  %v644_v24 = vld [vmem:[#allocation5 + $0xfd0] sm:$0xff] }
 0x1ab   :  { %4223 = vmatpush1.bf16.msra.mxu0 %v4222_v23  ;;  %v898_v23 = vld [vmem:[#allocation5 + $0x17c0] sm:$0xff]  ;;  %v4886_v33 = vpack.c.bf16 %v648_v25, %v644_v24  ;;  %v4904_v24 = vpack.c.bf16 %v689_v18, %v685_v15  ;;  %v979_v15 = vld [vmem:[#allocation5 + $0x1a48] sm:$0xff] }
 0x1ac   :  { %4225 = vmatprep.subr.bf16.mxu0 %v4224_v29  ;;  %v653_v29 = vld [vmem:[#allocation5 + $0x1018] sm:$0xff]  ;;  %v4246_v34 = vpack.c.bf16 %v902_v27, %v898_v23  ;;  %v4262_v23 = vpack.c.bf16 %v934_v14, %v930_v10  ;;  %v938_v25 = vld [vmem:[#allocation5 + $0x1900] sm:$0xff]  ;;  %v688_v27 = vld [vmem:[#allocation5 + $0x1130] sm:$0xff] }
 0x1ad   :  { %4867 = vmatpush1.bf16.msra.mxu1 %v4866_v35  ;;  %v4888_v35 = vpack.c.bf16 %v657_v30, %v653_v29  ;;  %v942_v30 = vld [vmem:[#allocation5 + $0x1920] sm:$0xff]  ;;  %v720_v10 = vld [vmem:[#allocation5 + $0x1230] sm:$0xff]  ;;  %v729_v14 = vld [vmem:[#allocation5 + $0x1278] sm:$0xff] }
 0x1ae   :  { %4869 = vmatprep.subr.bf16.mxu1 %v4868_v37  ;;  %v652_v37 = vld [vmem:[#allocation5 + $0x1010] sm:$0xff]  ;;  %v983_v18 = vld [vmem:[#allocation5 + $0x1a68] sm:$0xff] }
 0x1af   :  { %4227 = vmatpush1.bf16.msra.mxu0 %v4226_v36  ;;  %v906_v36 = vld [vmem:[#allocation5 + $0x1800] sm:$0xff]  ;;  %v4890_v47 = vpack.c.bf16 %v656_v38, %v652_v37  ;;  %v4908_v37 = vpack.c.bf16 %v697_v32, %v693_v31  ;;  %v987_v31 = vld [vmem:[#allocation5 + $0x1a88] sm:$0xff] }
 0x1b0   :  { %4229 = vmatprep.subr.bf16.mxu0 %v4228_v41  ;;  %v661_v41 = vld [vmem:[#allocation5 + $0x1058] sm:$0xff]  ;;  %v946_v38 = vld [vmem:[#allocation5 + $0x1940] sm:$0xff]  ;;  %v991_v32 = vld [vmem:[#allocation5 + $0x1aa8] sm:$0xff] }
 0x1b1   :  { %4871 = vmatpush1.bf16.msra.mxu1 %v4870_v49  ;;  %v4250_v49 = vpack.c.bf16 %v910_v40, %v906_v36  ;;  %v4266_v36 = vpack.c.bf16 %v942_v30, %v938_v25  ;;  %v696_v40 = vld [vmem:[#allocation5 + $0x1170] sm:$0xff]  ;;  %v737_v30 = vld [vmem:[#allocation5 + $0x12b8] sm:$0xff] }
 0x1b2   :  { %4873 = vmatprep.subr.bf16.mxu1 %v4872_v51  ;;  %v914_v51 = vld [vmem:[#allocation5 + $0x1840] sm:$0xff]  ;;  %v728_v25 = vld [vmem:[#allocation5 + $0x1270] sm:$0xff] }
 0x1b3   :  { %4231 = vmatpush1.bf16.msra.mxu0 %v4230_v50  ;;  %v4892_v50 = vpack.c.bf16 %v665_v42, %v661_v41  ;;  %v950_v42 = vld [vmem:[#allocation5 + $0x1960] sm:$0xff] }
 0x1b4   :  { %4233 = vmatprep.subr.bf16.mxu0 %v4232_v54  ;;  %v918_v54 = vld [vmem:[#allocation5 + $0x1860] sm:$0xff] }
 0x1b5   :  { %4875 = vmatpush1.bf16.msra.mxu1 %v4874_v59  ;;  %v127_v59 = vld [vmem:[#allocation2 + $0x68] sm:$0xff] }
 0x1b6   :  { %4877 = vmatprep.subr.bf16.mxu1 %v4876_v61  ;;  %v4254_v61 = vpack.c.bf16 %v918_v54, %v914_v51  ;;  %v4912_v51 = vpack.c.bf16 %v705_v45, %v701_v44  ;;  %v995_v44 = vld [vmem:[#allocation5 + $0x1ac8] sm:$0xff] }
 0x1b7   :  { %4235 = vmatpush1.bf16.msra.mxu0 %v4234_v60  ;;  %v4894_v60 = vpack.c.bf16 %v664_v17, %v660_v52  ;;  %v954_v52 = vld [vmem:[#allocation5 + $0x1980] sm:$0xff]  ;;  %v700_v17 = vld [vmem:[#allocation5 + $0x1190] sm:$0xff]  ;;  %v999_v45 = vld [vmem:[#allocation5 + $0x1ae8] sm:$0xff] }
 0x1b8   :  { %4237 = vmatprep.subr.bf16.mxu0 %v4236_v1  ;;  %v672_v1 = vld [vmem:[#allocation5 + $0x10b0] sm:$0xff] }
 0x1b9   :  { %4879 = vmatpush1.bf16.msra.mxu1 %v4878_v6  ;;  %v935_v6 = vld [vmem:[#allocation5 + $0x18e8] sm:$0xff] }
 0x1ba   :  { %4881 = vmatprep.subr.bf16.mxu1 %v4880_v7  ;;  %v4898_v7 = vpack.c.bf16 %v672_v1, %v668_v0  ;;  %v4260_v13 = vpack.c.bf16 %v935_v6, %v931_v5  ;;  %v712_v0 = vld [vmem:[#allocation5 + $0x11f0] sm:$0xff]  ;;  %v4276_v1 = vpack.c.bf16 %v967_v58, %v963_v57  ;;  %v975_v5 = vld [vmem:[#allocation5 + $0x1a28] sm:$0xff] }
 0x1bb   :  { %4239 = vmatpush1.bf16.msra.mxu0 %v4238_v28  ;;  %v5630_v28 = vld [vmem:[#allocation2 + $0x48] sm:$0xff]  ;;  %v4918_v6 = vpack.c.bf16 %v712_v0, %v708_v63  ;;  %v1006_v0 = vld [vmem:[#allocation5 + $0x1b20] sm:$0xff] }
 0x1bc   :  { %4241 = vmatprep.subr.bf16.mxu0 %v4240_v11  ;;  %v676_v11 = vld [vmem:[#allocation5 + $0x10d0] sm:$0xff] }
 0x1bd   :  { %4883 = vmatpush1.bf16.msra.mxu1 %v4882_v20  ;;  %v939_v20 = vld [vmem:[#allocation5 + $0x1908] sm:$0xff] }
 0x1be   :  { %4885 = vmatprep.subr.bf16.mxu1 %v4884_v22  ;;  %v4902_v22 = vpack.c.bf16 %v680_v12, %v676_v11  ;;  %v4280_v11 = vpack.c.bf16 %v975_v5, %v971_v4  ;;  %v974_v12 = vld [vmem:[#allocation5 + $0x1a20] sm:$0xff] }
 0x1bf   :  { %4243 = vmatpush1.bf16.msra.mxu0 %v4242_v21  ;;  %v943_v21 = vld [vmem:[#allocation5 + $0x1928] sm:$0xff] }
 0x1c0   :  { %4245 = vmatprep.subr.bf16.mxu0 %v4244_v26  ;;  %v684_v26 = vld [vmem:[#allocation5 + $0x1110] sm:$0xff]  ;;  %v4264_v29 = vpack.c.bf16 %v943_v21, %v939_v20 }
 0x1c1   :  { %4887 = vmatpush1.bf16.msra.mxu1 %v4886_v33  ;;  %v947_v33 = vld [vmem:[#allocation5 + $0x1948] sm:$0xff] }
 0x1c2   :  { %4889 = vmatprep.subr.bf16.mxu1 %v4888_v35  ;;  %v4906_v35 = vpack.c.bf16 %v688_v27, %v684_v26  ;;  %v4284_v26 = vpack.c.bf16 %v983_v18, %v979_v15  ;;  %v982_v27 = vld [vmem:[#allocation5 + $0x1a60] sm:$0xff] }
 0x1c3   :  { %4247 = vmatpush1.bf16.msra.mxu0 %v4246_v34  ;;  %v951_v34 = vld [vmem:[#allocation5 + $0x1968] sm:$0xff] }
 0x1c4   :  { %4249 = vmatprep.subr.bf16.mxu0 %v4248_v39  ;;  %2826 = vmatmul.mubr.f32.vlgmr.msra.gmra.mrb[2].mxu1 %v5629_v56  ;;  %v692_v39 = vld [vmem:[#allocation5 + $0x1150] sm:$0xff]  ;;  %v4268_v41 = vpack.c.bf16 %v951_v34, %v947_v33  ;;  %v713_v56 = vld [vmem:[#allocation5 + $0x11f8] sm:$0xff] }
 0x1c5   :  { %4891 = vmatpush1.bf16.msra.mxu1 %v4890_v47  ;;  %2896 = vmatprep.mubr.f32.mxu1 %v5630_v28  ;;  %v959_v47 = vld [vmem:[#allocation5 + $0x19a8] sm:$0xff] }
 0x1c6   :  { %2116 = vmatmul.mubr.f32.vlgmr.msra.gmra.mrb[0].mxu0 %v124_v46  ;;  %4893 = vmatprep.subr.bf16.mxu1 %v4892_v50  ;;  %v955_v46 = vld [vmem:[#allocation5 + $0x1988] sm:$0xff]  ;;  %v4270_v50 = vpack.c.bf16 %v950_v42, %v946_v38  ;;  %v736_v38 = vld [vmem:[#allocation5 + $0x12b0] sm:$0xff]  ;;  %v745_v42 = vld [vmem:[#allocation5 + $0x12f8] sm:$0xff] }
 0x1c7   :  { %4251 = vmatpush1.bf16.msra.mxu0 %v4250_v49  ;;  %2186 = vmatprep.mubr.f32.mxu0 %v127_v59  ;;  %v4910_v49 = vpack.c.bf16 %v696_v40, %v692_v39  ;;  %v4272_v54 = vpack.c.bf16 %v959_v47, %v955_v46  ;;  %v4288_v39 = vpack.c.bf16 %v991_v32, %v987_v31  ;;  %v990_v40 = vld [vmem:[#allocation5 + $0x1aa0] sm:$0xff] }
 0x1c8   :  { %4253 = vmatprep.subr.bf16.mxu0 %v4252_v53  ;;  %v704_v53 = vld [vmem:[#allocation5 + $0x11b0] sm:$0xff] }
 0x1c9   :  { %4895 = vmatpush1.bf16.msra.mxu1 %v4894_v60  ;;  %v4914_v59 = vpack.c.bf16 %v704_v53, %v700_v17  ;;  %v4274_v60 = vpack.c.bf16 %v958_v55, %v954_v52  ;;  %v744_v52 = vld [vmem:[#allocation5 + $0x12f0] sm:$0xff]  ;;  %v4292_v17 = vpack.c.bf16 %v999_v45, %v995_v44  ;;  %v998_v53 = vld [vmem:[#allocation5 + $0x1ae0] sm:$0xff]  ;;  %v753_v55 = vld [vmem:[#allocation5 + $0x1338] sm:$0xff] }
 0x1ca   :  { %4897 = vmatprep.subr.bf16.mxu1 %v4896_v62  ;;  %v962_v62 = vld [vmem:[#allocation5 + $0x19c0] sm:$0xff] }
 0x1cb   :  { %4255 = vmatpush1.bf16.msra.mxu0 %v4254_v61  ;;  %v4916_v61 = vpack.c.bf16 %v713_v56, %v709_v16  ;;  %v1003_v16 = vld [vmem:[#allocation5 + $0x1b08] sm:$0xff] }
 0x1cc   :  { %4257 = vmatprep.subr.bf16.mxu0 %v4256_v19  ;;  %v966_v19 = vld [vmem:[#allocation5 + $0x19e0] sm:$0xff]  ;;  %v1007_v56 = vld [vmem:[#allocation5 + $0x1b28] sm:$0xff] }
 0x1cd   :  { %4899 = vmatpush1.bf16.msra.mxu1 %v4898_v7  ;;  %v4278_v28 = vpack.c.bf16 %v966_v19, %v962_v62  ;;  %v4920_v7 = vpack.c.bf16 %v721_v3, %v717_v2  ;;  %v752_v62 = vld [vmem:[#allocation5 + $0x1330] sm:$0xff]  ;;  %v4296_v63 = vpack.c.bf16 %v1007_v56, %v1003_v16  ;;  %v761_v19 = vld [vmem:[#allocation5 + $0x1378] sm:$0xff]  ;;  %v1011_v2 = vld [vmem:[#allocation5 + $0x1b48] sm:$0xff] }
 0x1ce   :  { %4901 = vmatprep.subr.bf16.mxu1 %v4900_v9  ;;  %v716_v9 = vld [vmem:[#allocation5 + $0x1210] sm:$0xff]  ;;  %v1015_v3 = vld [vmem:[#allocation5 + $0x1b68] sm:$0xff]  ;;  %v126_v16 = vld [vmem:[#allocation2 + $0x60] sm:$0xff] }
 0x1cf   :  { %4259 = vmatpush1.bf16.msra.mxu0 %v4258_v8  ;;  %v970_v8 = vld [vmem:[#allocation5 + $0x1a00] sm:$0xff]  ;;  %v4922_v20 = vpack.c.bf16 %v720_v10, %v716_v9  ;;  %v4300_v9 = vpack.c.bf16 %v1015_v3, %v1011_v2  ;;  %v1051_v2 = vld [vmem:[#allocation5 + $0x1c88] sm:$0xff] }
 0x1d0   :  { %4261 = vmatprep.subr.bf16.mxu0 %v4260_v13  ;;  %v725_v13 = vld [vmem:[#allocation5 + $0x1258] sm:$0xff]  ;;  %v4282_v21 = vpack.c.bf16 %v974_v12, %v970_v8  ;;  %v760_v8 = vld [vmem:[#allocation5 + $0x1370] sm:$0xff]  ;;  %v1014_v10 = vld [vmem:[#allocation5 + $0x1b60] sm:$0xff] }
 0x1d1   :  { %4903 = vmatpush1.bf16.msra.mxu1 %v4902_v22  ;;  %v4924_v22 = vpack.c.bf16 %v729_v14, %v725_v13  ;;  %v769_v12 = vld [vmem:[#allocation5 + $0x13b8] sm:$0xff]  ;;  %v1019_v13 = vld [vmem:[#allocation5 + $0x1b88] sm:$0xff] }
 0x1d2   :  { %4905 = vmatprep.subr.bf16.mxu1 %v4904_v24  ;;  %v724_v24 = vld [vmem:[#allocation5 + $0x1250] sm:$0xff]  ;;  %v1023_v14 = vld [vmem:[#allocation5 + $0x1ba8] sm:$0xff] }
 0x1d3   :  { %4263 = vmatpush1.bf16.msra.mxu0 %v4262_v23  ;;  %v978_v23 = vld [vmem:[#allocation5 + $0x1a40] sm:$0xff]  ;;  %v4926_v33 = vpack.c.bf16 %v728_v25, %v724_v24  ;;  %v4304_v24 = vpack.c.bf16 %v1023_v14, %v1019_v13  ;;  %v1055_v3 = vld [vmem:[#allocation5 + $0x1ca8] sm:$0xff]  ;;  %v809_v13 = vld [vmem:[#allocation5 + $0x14f8] sm:$0xff] }
 0x1d4   :  { %4265 = vmatprep.subr.bf16.mxu0 %v4264_v29  ;;  %v733_v29 = vld [vmem:[#allocation5 + $0x1298] sm:$0xff]  ;;  %v4286_v34 = vpack.c.bf16 %v982_v27, %v978_v23  ;;  %v768_v23 = vld [vmem:[#allocation5 + $0x13b0] sm:$0xff]  ;;  %v1022_v25 = vld [vmem:[#allocation5 + $0x1ba0] sm:$0xff] }
 0x1d5   :  { %4907 = vmatpush1.bf16.msra.mxu1 %v4906_v35  ;;  %v4928_v35 = vpack.c.bf16 %v737_v30, %v733_v29  ;;  %v777_v27 = vld [vmem:[#allocation5 + $0x13f8] sm:$0xff]  ;;  %v1027_v29 = vld [vmem:[#allocation5 + $0x1bc8] sm:$0xff] }
 0x1d6   :  { %4909 = vmatprep.subr.bf16.mxu1 %v4908_v37  ;;  %v732_v37 = vld [vmem:[#allocation5 + $0x1290] sm:$0xff]  ;;  %v1031_v30 = vld [vmem:[#allocation5 + $0x1be8] sm:$0xff] }
 0x1d7   :  { %4267 = vmatpush1.bf16.msra.mxu0 %v4266_v36  ;;  %v986_v36 = vld [vmem:[#allocation5 + $0x1a80] sm:$0xff]  ;;  %v4930_v46 = vpack.c.bf16 %v736_v38, %v732_v37  ;;  %v4308_v37 = vpack.c.bf16 %v1031_v30, %v1027_v29  ;;  %v1059_v14 = vld [vmem:[#allocation5 + $0x1cc8] sm:$0xff]  ;;  %v813_v29 = vld [vmem:[#allocation5 + $0x1518] sm:$0xff] }
 0x1d8   :  { %4269 = vmatprep.subr.bf16.mxu0 %v4268_v41  ;;  %v741_v41 = vld [vmem:[#allocation5 + $0x12d8] sm:$0xff]  ;;  %v4290_v47 = vpack.c.bf16 %v990_v40, %v986_v36  ;;  %v776_v36 = vld [vmem:[#allocation5 + $0x13f0] sm:$0xff]  ;;  %v1030_v38 = vld [vmem:[#allocation5 + $0x1be0] sm:$0xff] }
 0x1d9   :  { %4911 = vmatpush1.bf16.msra.mxu1 %v4910_v49  ;;  %v4932_v49 = vpack.c.bf16 %v745_v42, %v741_v41  ;;  %v785_v40 = vld [vmem:[#allocation5 + $0x1438] sm:$0xff]  ;;  %v1035_v41 = vld [vmem:[#allocation5 + $0x1c08] sm:$0xff] }
 0x1da   :  { %4913 = vmatprep.subr.bf16.mxu1 %v4912_v51  ;;  %v740_v51 = vld [vmem:[#allocation5 + $0x12d0] sm:$0xff]  ;;  %v1039_v42 = vld [vmem:[#allocation5 + $0x1c28] sm:$0xff]  ;;  %v817_v30 = vld [vmem:[#allocation5 + $0x1538] sm:$0xff] }
 0x1db   :  { %4271 = vmatpush1.bf16.msra.mxu0 %v4270_v50  ;;  %v994_v50 = vld [vmem:[#allocation5 + $0x1ac0] sm:$0xff]  ;;  %v4934_v57 = vpack.c.bf16 %v744_v52, %v740_v51  ;;  %v4312_v51 = vpack.c.bf16 %v1039_v42, %v1035_v41  ;;  %v821_v41 = vld [vmem:[#allocation5 + $0x1558] sm:$0xff] }
 0x1dc   :  { %4273 = vmatprep.subr.bf16.mxu0 %v4272_v54  ;;  %v749_v54 = vld [vmem:[#allocation5 + $0x1318] sm:$0xff]  ;;  %v4294_v58 = vpack.c.bf16 %v998_v53, %v994_v50  ;;  %v784_v50 = vld [vmem:[#allocation5 + $0x1430] sm:$0xff]  ;;  %v1038_v52 = vld [vmem:[#allocation5 + $0x1c20] sm:$0xff] }
 0x1dd   :  { %4915 = vmatpush1.bf16.msra.mxu1 %v4914_v59  ;;  %v4936_v59 = vpack.c.bf16 %v753_v55, %v749_v54  ;;  %v793_v53 = vld [vmem:[#allocation5 + $0x1478] sm:$0xff]  ;;  %v1043_v54 = vld [vmem:[#allocation5 + $0x1c48] sm:$0xff] }
 0x1de   :  { %4917 = vmatprep.subr.bf16.mxu1 %v4916_v61  ;;  %v748_v61 = vld [vmem:[#allocation5 + $0x1310] sm:$0xff]  ;;  %v1047_v55 = vld [vmem:[#allocation5 + $0x1c68] sm:$0xff]  ;;  %v825_v42 = vld [vmem:[#allocation5 + $0x1578] sm:$0xff] }
 0x1df   :  { %4275 = vmatpush1.bf16.msra.mxu0 %v4274_v60  ;;  %v1002_v60 = vld [vmem:[#allocation5 + $0x1b00] sm:$0xff]  ;;  %v4938_v4 = vpack.c.bf16 %v752_v62, %v748_v61  ;;  %v792_v61 = vld [vmem:[#allocation5 + $0x1470] sm:$0xff]  ;;  %v4316_v62 = vpack.c.bf16 %v1047_v55, %v1043_v54  ;;  %v829_v54 = vld [vmem:[#allocation5 + $0x1598] sm:$0xff] }
 0x1e0   :  { %4277 = vmatprep.subr.bf16.mxu0 %v4276_v1  ;;  %v757_v1 = vld [vmem:[#allocation5 + $0x1358] sm:$0xff]  ;;  %v4298_v5 = vpack.c.bf16 %v1006_v0, %v1002_v60  ;;  %v788_v60 = vld [vmem:[#allocation5 + $0x1450] sm:$0xff] }
 0x1e1   :  { %4919 = vmatpush1.bf16.msra.mxu1 %v4918_v6  ;;  %v4940_v6 = vpack.c.bf16 %v761_v19, %v757_v1  ;;  %v797_v0 = vld [vmem:[#allocation5 + $0x1498] sm:$0xff]  ;;  %v5631_v19 = vld [vmem:[#allocation2 + $0x40] sm:$0xff] }
 0x1e2   :  { %4921 = vmatprep.subr.bf16.mxu1 %v4920_v7  ;;  %v756_v7 = vld [vmem:[#allocation5 + $0x1350] sm:$0xff]  ;;  %v801_v1 = vld [vmem:[#allocation5 + $0x14b8] sm:$0xff] }
 0x1e3   :  { %4279 = vmatpush1.bf16.msra.mxu0 %v4278_v28  ;;  %v1010_v28 = vld [vmem:[#allocation5 + $0x1b40] sm:$0xff]  ;;  %v4942_v15 = vpack.c.bf16 %v760_v8, %v756_v7  ;;  %v796_v8 = vld [vmem:[#allocation5 + $0x1490] sm:$0xff]  ;;  %v833_v55 = vld [vmem:[#allocation5 + $0x15b8] sm:$0xff] }
 0x1e4   :  { %4281 = vmatprep.subr.bf16.mxu0 %v4280_v11  ;;  %v765_v11 = vld [vmem:[#allocation5 + $0x1398] sm:$0xff]  ;;  %v4302_v18 = vpack.c.bf16 %v1014_v10, %v1010_v28  ;;  %v4960_v28 = vpack.c.bf16 %v801_v1, %v797_v0  ;;  %v1050_v7 = vld [vmem:[#allocation5 + $0x1c80] sm:$0xff]  ;;  %v4320_v10 = vpack.c.bf16 %v1055_v3, %v1051_v2  ;;  %v1091_v2 = vld [vmem:[#allocation5 + $0x1dc8] sm:$0xff] }
 0x1e5   :  { %4923 = vmatpush1.bf16.msra.mxu1 %v4922_v20  ;;  %v4944_v20 = vpack.c.bf16 %v769_v12, %v765_v11  ;;  %v1054_v11 = vld [vmem:[#allocation5 + $0x1ca0] sm:$0xff]  ;;  %v805_v12 = vld [vmem:[#allocation5 + $0x14d8] sm:$0xff]  ;;  %v1095_v3 = vld [vmem:[#allocation5 + $0x1de8] sm:$0xff] }
 0x1e6   :  { %4925 = vmatprep.subr.bf16.mxu1 %v4924_v22  ;;  %v764_v22 = vld [vmem:[#allocation5 + $0x1390] sm:$0xff]  ;;  %v1086_v0 = vld [vmem:[#allocation5 + $0x1da0] sm:$0xff]  ;;  %v837_v1 = vld [vmem:[#allocation5 + $0x15d8] sm:$0xff] }
 0x1e7   :  { %4283 = vmatpush1.bf16.msra.mxu0 %v4282_v21  ;;  %v1018_v21 = vld [vmem:[#allocation5 + $0x1b80] sm:$0xff]  ;;  %v4946_v31 = vpack.c.bf16 %v768_v23, %v764_v22  ;;  %v4964_v22 = vpack.c.bf16 %v809_v13, %v805_v12  ;;  %v849_v12 = vld [vmem:[#allocation5 + $0x1638] sm:$0xff]  ;;  %v1099_v13 = vld [vmem:[#allocation5 + $0x1e08] sm:$0xff] }
 0x1e8   :  { %4285 = vmatprep.subr.bf16.mxu0 %v4284_v26  ;;  %v773_v26 = vld [vmem:[#allocation5 + $0x13d8] sm:$0xff]  ;;  %v4306_v32 = vpack.c.bf16 %v1022_v25, %v1018_v21  ;;  %v4322_v21 = vpack.c.bf16 %v1054_v11, %v1050_v7  ;;  %v1058_v23 = vld [vmem:[#allocation5 + $0x1cc0] sm:$0xff]  ;;  %v808_v25 = vld [vmem:[#allocation5 + $0x14f0] sm:$0xff] }
 0x1e9   :  { %4927 = vmatpush1.bf16.msra.mxu1 %v4926_v33  ;;  %v4948_v33 = vpack.c.bf16 %v777_v27, %v773_v26  ;;  %v1062_v27 = vld [vmem:[#allocation5 + $0x1ce0] sm:$0xff]  ;;  %v836_v7 = vld [vmem:[#allocation5 + $0x15d0] sm:$0xff]  ;;  %v845_v11 = vld [vmem:[#allocation5 + $0x1618] sm:$0xff] }
 0x1ea   :  { %4929 = vmatprep.subr.bf16.mxu1 %v4928_v35  ;;  %v772_v35 = vld [vmem:[#allocation5 + $0x13d0] sm:$0xff] }
 0x1eb   :  { %4287 = vmatpush1.bf16.msra.mxu0 %v4286_v34  ;;  %v1026_v34 = vld [vmem:[#allocation5 + $0x1bc0] sm:$0xff]  ;;  %v4950_v44 = vpack.c.bf16 %v776_v36, %v772_v35  ;;  %v4968_v35 = vpack.c.bf16 %v817_v30, %v813_v29  ;;  %v1107_v29 = vld [vmem:[#allocation5 + $0x1e48] sm:$0xff] }
 0x1ec   :  { %4289 = vmatprep.subr.bf16.mxu0 %v4288_v39  ;;  %v781_v39 = vld [vmem:[#allocation5 + $0x1418] sm:$0xff]  ;;  %v4310_v45 = vpack.c.bf16 %v1030_v38, %v1026_v34  ;;  %v4326_v34 = vpack.c.bf16 %v1062_v27, %v1058_v23  ;;  %v1066_v36 = vld [vmem:[#allocation5 + $0x1d00] sm:$0xff]  ;;  %v816_v38 = vld [vmem:[#allocation5 + $0x1530] sm:$0xff] }
 0x1ed   :  { %4931 = vmatpush1.bf16.msra.mxu1 %v4930_v46  ;;  %v4952_v46 = vpack.c.bf16 %v785_v40, %v781_v39  ;;  %v1070_v40 = vld [vmem:[#allocation5 + $0x1d20] sm:$0xff]  ;;  %v848_v23 = vld [vmem:[#allocation5 + $0x1630] sm:$0xff]  ;;  %v857_v27 = vld [vmem:[#allocation5 + $0x1678] sm:$0xff] }
 0x1ee   :  { %4933 = vmatprep.subr.bf16.mxu1 %v4932_v49  ;;  %v780_v49 = vld [vmem:[#allocation5 + $0x1410] sm:$0xff]  ;;  %v1111_v30 = vld [vmem:[#allocation5 + $0x1e68] sm:$0xff] }
 0x1ef   :  { %4291 = vmatpush1.bf16.msra.mxu0 %v4290_v47  ;;  %v1034_v47 = vld [vmem:[#allocation5 + $0x1c00] sm:$0xff]  ;;  %v4954_v56 = vpack.c.bf16 %v784_v50, %v780_v49  ;;  %v4972_v49 = vpack.c.bf16 %v825_v42, %v821_v41  ;;  %v1115_v41 = vld [vmem:[#allocation5 + $0x1e88] sm:$0xff] }
 0x1f0   :  { %4293 = vmatprep.subr.bf16.mxu0 %v4292_v17  ;;  %v789_v17 = vld [vmem:[#allocation5 + $0x1458] sm:$0xff]  ;;  %v1074_v50 = vld [vmem:[#allocation5 + $0x1d40] sm:$0xff]  ;;  %v1119_v42 = vld [vmem:[#allocation5 + $0x1ea8] sm:$0xff] }
 0x1f1   :  { %4935 = vmatpush1.bf16.msra.mxu1 %v4934_v57  ;;  %v4314_v57 = vpack.c.bf16 %v1038_v52, %v1034_v47  ;;  %v4330_v47 = vpack.c.bf16 %v1070_v40, %v1066_v36  ;;  %v824_v52 = vld [vmem:[#allocation5 + $0x1570] sm:$0xff]  ;;  %v865_v40 = vld [vmem:[#allocation5 + $0x16b8] sm:$0xff] }
 0x1f2   :  { %4937 = vmatprep.subr.bf16.mxu1 %v4936_v59  ;;  %v1042_v59 = vld [vmem:[#allocation5 + $0x1c40] sm:$0xff]  ;;  %v856_v36 = vld [vmem:[#allocation5 + $0x1670] sm:$0xff] }
 0x1f3   :  { %4295 = vmatpush1.bf16.msra.mxu0 %v4294_v58  ;;  %v4956_v58 = vpack.c.bf16 %v793_v53, %v789_v17  ;;  %v1078_v53 = vld [vmem:[#allocation5 + $0x1d60] sm:$0xff] }
 0x1f4   :  { %4297 = vmatprep.subr.bf16.mxu0 %v4296_v63  ;;  %v1046_v63 = vld [vmem:[#allocation5 + $0x1c60] sm:$0xff] }
 0x1f5   :  { %4939 = vmatpush1.bf16.msra.mxu1 %v4938_v4  ;;  %v129_v4 = vld [vmem:[#allocation2 + $0x78] sm:$0xff] }
 0x1f6   :  { %4941 = vmatprep.subr.bf16.mxu1 %v4940_v6  ;;  %v4318_v6 = vpack.c.bf16 %v1046_v63, %v1042_v59  ;;  %v4976_v59 = vpack.c.bf16 %v833_v55, %v829_v54  ;;  %v1123_v54 = vld [vmem:[#allocation5 + $0x1ec8] sm:$0xff] }
 0x1f7   :  { %4299 = vmatpush1.bf16.msra.mxu0 %v4298_v5  ;;  %v4958_v5 = vpack.c.bf16 %v792_v61, %v788_v60  ;;  %v1082_v60 = vld [vmem:[#allocation5 + $0x1d80] sm:$0xff]  ;;  %v828_v61 = vld [vmem:[#allocation5 + $0x1590] sm:$0xff]  ;;  %v1127_v55 = vld [vmem:[#allocation5 + $0x1ee8] sm:$0xff] }
 0x1f8   :  { %4301 = vmatprep.subr.bf16.mxu0 %v4300_v9  ;;  %v800_v9 = vld [vmem:[#allocation5 + $0x14b0] sm:$0xff] }
 0x1f9   :  { %4943 = vmatpush1.bf16.msra.mxu1 %v4942_v15  ;;  %v1063_v15 = vld [vmem:[#allocation5 + $0x1ce8] sm:$0xff] }
 0x1fa   :  { %4945 = vmatprep.subr.bf16.mxu1 %v4944_v20  ;;  %v4962_v20 = vpack.c.bf16 %v800_v9, %v796_v8  ;;  %v4324_v26 = vpack.c.bf16 %v1063_v15, %v1059_v14  ;;  %v840_v8 = vld [vmem:[#allocation5 + $0x15f0] sm:$0xff]  ;;  %v4340_v9 = vpack.c.bf16 %v1095_v3, %v1091_v2  ;;  %v1103_v14 = vld [vmem:[#allocation5 + $0x1e28] sm:$0xff] }
 0x1fb   :  { %4303 = vmatpush1.bf16.msra.mxu0 %v4302_v18  ;;  %v5632_v18 = vld [vmem:[#allocation2 + $0x58] sm:$0xff]  ;;  %v4982_v15 = vpack.c.bf16 %v840_v8, %v836_v7  ;;  %v1134_v8 = vld [vmem:[#allocation5 + $0x1f20] sm:$0xff] }
 0x1fc   :  { %4305 = vmatprep.subr.bf16.mxu0 %v4304_v24  ;;  %v804_v24 = vld [vmem:[#allocation5 + $0x14d0] sm:$0xff] }
 0x1fd   :  { %4947 = vmatpush1.bf16.msra.mxu1 %v4946_v31  ;;  %v1067_v31 = vld [vmem:[#allocation5 + $0x1d08] sm:$0xff] }
 0x1fe   :  { %4949 = vmatprep.subr.bf16.mxu1 %v4948_v33  ;;  %v4966_v33 = vpack.c.bf16 %v808_v25, %v804_v24  ;;  %v4344_v24 = vpack.c.bf16 %v1103_v14, %v1099_v13  ;;  %v1102_v25 = vld [vmem:[#allocation5 + $0x1e20] sm:$0xff] }
 0x1ff   :  { %4307 = vmatpush1.bf16.msra.mxu0 %v4306_v32  ;;  %v1071_v32 = vld [vmem:[#allocation5 + $0x1d28] sm:$0xff] }
 0x200   :  { %4309 = vmatprep.subr.bf16.mxu0 %v4308_v37  ;;  %v812_v37 = vld [vmem:[#allocation5 + $0x1510] sm:$0xff]  ;;  %v4328_v39 = vpack.c.bf16 %v1071_v32, %v1067_v31 }
 0x201   :  { %4951 = vmatpush1.bf16.msra.mxu1 %v4950_v44  ;;  %v1075_v44 = vld [vmem:[#allocation5 + $0x1d48] sm:$0xff] }
 0x202   :  { %4953 = vmatprep.subr.bf16.mxu1 %v4952_v46  ;;  %v4970_v46 = vpack.c.bf16 %v816_v38, %v812_v37  ;;  %v4348_v37 = vpack.c.bf16 %v1111_v30, %v1107_v29  ;;  %v1110_v38 = vld [vmem:[#allocation5 + $0x1e60] sm:$0xff] }
 0x203   :  { %4311 = vmatpush1.bf16.msra.mxu0 %v4310_v45  ;;  %v1079_v45 = vld [vmem:[#allocation5 + $0x1d68] sm:$0xff] }
 0x204   :  { %4313 = vmatprep.subr.bf16.mxu0 %v4312_v51  ;;  %2897 = vmatmul.mubr.f32.vlgmr.msra.gmra.mrb[2].mxu1 %v5631_v19  ;;  %v820_v51 = vld [vmem:[#allocation5 + $0x1550] sm:$0xff]  ;;  %v4332_v17 = vpack.c.bf16 %v1079_v45, %v1075_v44  ;;  %v841_v19 = vld [vmem:[#allocation5 + $0x15f8] sm:$0xff] }
 0x205   :  { %4955 = vmatpush1.bf16.msra.mxu1 %v4954_v56  ;;  %2967 = vmatprep.mubr.f32.mxu1 %v5632_v18  ;;  %v1087_v56 = vld [vmem:[#allocation5 + $0x1da8] sm:$0xff] }
 0x206   :  { %2187 = vmatmul.mubr.f32.vlgmr.msra.gmra.mrb[0].mxu0 %v126_v16  ;;  %4957 = vmatprep.subr.bf16.mxu1 %v4956_v58  ;;  %v1083_v16 = vld [vmem:[#allocation5 + $0x1d88] sm:$0xff]  ;;  %v4334_v58 = vpack.c.bf16 %v1078_v53, %v1074_v50  ;;  %v864_v50 = vld [vmem:[#allocation5 + $0x16b0] sm:$0xff]  ;;  %v873_v53 = vld [vmem:[#allocation5 + $0x16f8] sm:$0xff] }
 0x207   :  { %4315 = vmatpush1.bf16.msra.mxu0 %v4314_v57  ;;  %2257 = vmatprep.mubr.f32.mxu0 %v129_v4  ;;  %v4974_v57 = vpack.c.bf16 %v824_v52, %v820_v51  ;;  %v4336_v63 = vpack.c.bf16 %v1087_v56, %v1083_v16  ;;  %v4352_v51 = vpack.c.bf16 %v1119_v42, %v1115_v41  ;;  %v1118_v52 = vld [vmem:[#allocation5 + $0x1ea0] sm:$0xff] }
 0x208   :  { %4317 = vmatprep.subr.bf16.mxu0 %v4316_v62  ;;  %v832_v62 = vld [vmem:[#allocation5 + $0x15b0] sm:$0xff] }
 0x209   :  { %4959 = vmatpush1.bf16.msra.mxu1 %v4958_v5  ;;  %v4978_v4 = vpack.c.bf16 %v832_v62, %v828_v61  ;;  %v4338_v5 = vpack.c.bf16 %v1086_v0, %v1082_v60  ;;  %v872_v60 = vld [vmem:[#allocation5 + $0x16f0] sm:$0xff]  ;;  %v4356_v61 = vpack.c.bf16 %v1127_v55, %v1123_v54  ;;  %v1126_v62 = vld [vmem:[#allocation5 + $0x1ee0] sm:$0xff]  ;;  %v881_v0 = vld [vmem:[#allocation5 + $0x1738] sm:$0xff] }
 0x20a   :  { %4961 = vmatprep.subr.bf16.mxu1 %v4960_v28  ;;  %v1090_v28 = vld [vmem:[#allocation5 + $0x1dc0] sm:$0xff] }
 0x20b   :  { %4319 = vmatpush1.bf16.msra.mxu0 %v4318_v6  ;;  %v4980_v6 = vpack.c.bf16 %v841_v19, %v837_v1  ;;  %v1131_v1 = vld [vmem:[#allocation5 + $0x1f08] sm:$0xff] }
 0x20c   :  { %4321 = vmatprep.subr.bf16.mxu0 %v4320_v10  ;;  %v1094_v10 = vld [vmem:[#allocation5 + $0x1de0] sm:$0xff]  ;;  %v1135_v19 = vld [vmem:[#allocation5 + $0x1f28] sm:$0xff] }
 0x20d   :  { %4963 = vmatpush1.bf16.msra.mxu1 %v4962_v20  ;;  %v4342_v18 = vpack.c.bf16 %v1094_v10, %v1090_v28  ;;  %v4984_v20 = vpack.c.bf16 %v849_v12, %v845_v11  ;;  %v880_v28 = vld [vmem:[#allocation5 + $0x1730] sm:$0xff]  ;;  %v4360_v7 = vpack.c.bf16 %v1135_v19, %v1131_v1  ;;  %v889_v10 = vld [vmem:[#allocation5 + $0x1778] sm:$0xff]  ;;  %v1139_v11 = vld [vmem:[#allocation5 + $0x1f48] sm:$0xff] }
 0x20e   :  { %4965 = vmatprep.subr.bf16.mxu1 %v4964_v22  ;;  %v844_v22 = vld [vmem:[#allocation5 + $0x1610] sm:$0xff]  ;;  %v1143_v12 = vld [vmem:[#allocation5 + $0x1f68] sm:$0xff] }
 0x20f   :  { %4323 = vmatpush1.bf16.msra.mxu0 %v4322_v21  ;;  %v1098_v21 = vld [vmem:[#allocation5 + $0x1e00] sm:$0xff]  ;;  %v4986_v31 = vpack.c.bf16 %v848_v23, %v844_v22  ;;  %v4364_v22 = vpack.c.bf16 %v1143_v12, %v1139_v11  ;;  %v128_v1 = vld [vmem:[#allocation2 + $0x70] sm:$0xff]  ;;  %v1179_v11 = vld [vmem:[#allocation5 + $0x2088] sm:$0xff] }
 0x210   :  { %4325 = vmatprep.subr.bf16.mxu0 %v4324_v26  ;;  %v853_v26 = vld [vmem:[#allocation5 + $0x1658] sm:$0xff]  ;;  %v4346_v32 = vpack.c.bf16 %v1102_v25, %v1098_v21  ;;  %v888_v21 = vld [vmem:[#allocation5 + $0x1770] sm:$0xff]  ;;  %v1142_v23 = vld [vmem:[#allocation5 + $0x1f60] sm:$0xff] }
 0x211   :  { %4967 = vmatpush1.bf16.msra.mxu1 %v4966_v33  ;;  %v4988_v33 = vpack.c.bf16 %v857_v27, %v853_v26  ;;  %v897_v25 = vld [vmem:[#allocation5 + $0x17b8] sm:$0xff]  ;;  %v1147_v26 = vld [vmem:[#allocation5 + $0x1f88] sm:$0xff] }
 0x212   :  { %4969 = vmatprep.subr.bf16.mxu1 %v4968_v35  ;;  %v852_v35 = vld [vmem:[#allocation5 + $0x1650] sm:$0xff]  ;;  %v1151_v27 = vld [vmem:[#allocation5 + $0x1fa8] sm:$0xff] }
 0x213   :  { %4327 = vmatpush1.bf16.msra.mxu0 %v4326_v34  ;;  %v1106_v34 = vld [vmem:[#allocation5 + $0x1e40] sm:$0xff]  ;;  %v4990_v44 = vpack.c.bf16 %v856_v36, %v852_v35  ;;  %v4368_v35 = vpack.c.bf16 %v1151_v27, %v1147_v26  ;;  %v1183_v12 = vld [vmem:[#allocation5 + $0x20a8] sm:$0xff]  ;;  %v937_v26 = vld [vmem:[#allocation5 + $0x18f8] sm:$0xff] }
 0x214   :  { %4329 = vmatprep.subr.bf16.mxu0 %v4328_v39  ;;  %v861_v39 = vld [vmem:[#allocation5 + $0x1698] sm:$0xff]  ;;  %v4350_v45 = vpack.c.bf16 %v1110_v38, %v1106_v34  ;;  %v896_v34 = vld [vmem:[#allocation5 + $0x17b0] sm:$0xff]  ;;  %v1150_v36 = vld [vmem:[#allocation5 + $0x1fa0] sm:$0xff] }
 0x215   :  { %4971 = vmatpush1.bf16.msra.mxu1 %v4970_v46  ;;  %v4992_v46 = vpack.c.bf16 %v865_v40, %v861_v39  ;;  %v905_v38 = vld [vmem:[#allocation5 + $0x17f8] sm:$0xff]  ;;  %v1155_v39 = vld [vmem:[#allocation5 + $0x1fc8] sm:$0xff] }
 0x216   :  { %4973 = vmatprep.subr.bf16.mxu1 %v4972_v49  ;;  %v860_v49 = vld [vmem:[#allocation5 + $0x1690] sm:$0xff]  ;;  %v1159_v40 = vld [vmem:[#allocation5 + $0x1fe8] sm:$0xff] }
 0x217   :  { %4331 = vmatpush1.bf16.msra.mxu0 %v4330_v47  ;;  %v1114_v47 = vld [vmem:[#allocation5 + $0x1e80] sm:$0xff]  ;;  %v4994_v16 = vpack.c.bf16 %v864_v50, %v860_v49  ;;  %v4372_v49 = vpack.c.bf16 %v1159_v40, %v1155_v39  ;;  %v1187_v27 = vld [vmem:[#allocation5 + $0x20c8] sm:$0xff]  ;;  %v941_v39 = vld [vmem:[#allocation5 + $0x1918] sm:$0xff] }
 0x218   :  { %4333 = vmatprep.subr.bf16.mxu0 %v4332_v17  ;;  %v869_v17 = vld [vmem:[#allocation5 + $0x16d8] sm:$0xff]  ;;  %v4354_v56 = vpack.c.bf16 %v1118_v52, %v1114_v47  ;;  %v904_v47 = vld [vmem:[#allocation5 + $0x17f0] sm:$0xff]  ;;  %v1158_v50 = vld [vmem:[#allocation5 + $0x1fe0] sm:$0xff] }
 0x219   :  { %4975 = vmatpush1.bf16.msra.mxu1 %v4974_v57  ;;  %v4996_v57 = vpack.c.bf16 %v873_v53, %v869_v17  ;;  %v913_v52 = vld [vmem:[#allocation5 + $0x1838] sm:$0xff]  ;;  %v1163_v17 = vld [vmem:[#allocation5 + $0x2008] sm:$0xff] }
 0x21a   :  { %4977 = vmatprep.subr.bf16.mxu1 %v4976_v59  ;;  %v868_v59 = vld [vmem:[#allocation5 + $0x16d0] sm:$0xff]  ;;  %v1167_v53 = vld [vmem:[#allocation5 + $0x2028] sm:$0xff]  ;;  %v945_v40 = vld [vmem:[#allocation5 + $0x1938] sm:$0xff] }
 0x21b   :  { %4335 = vmatpush1.bf16.msra.mxu0 %v4334_v58  ;;  %v1122_v58 = vld [vmem:[#allocation5 + $0x1ec0] sm:$0xff]  ;;  %v4998_v2 = vpack.c.bf16 %v872_v60, %v868_v59  ;;  %v4376_v59 = vpack.c.bf16 %v1167_v53, %v1163_v17  ;;  %v949_v17 = vld [vmem:[#allocation5 + $0x1958] sm:$0xff] }
 0x21c   :  { %4337 = vmatprep.subr.bf16.mxu0 %v4336_v63  ;;  %v877_v63 = vld [vmem:[#allocation5 + $0x1718] sm:$0xff]  ;;  %v4358_v3 = vpack.c.bf16 %v1126_v62, %v1122_v58  ;;  %v912_v58 = vld [vmem:[#allocation5 + $0x1830] sm:$0xff]  ;;  %v1166_v60 = vld [vmem:[#allocation5 + $0x2020] sm:$0xff] }
 0x21d   :  { %4979 = vmatpush1.bf16.msra.mxu1 %v4978_v4  ;;  %v5000_v4 = vpack.c.bf16 %v881_v0, %v877_v63  ;;  %v921_v62 = vld [vmem:[#allocation5 + $0x1878] sm:$0xff]  ;;  %v1171_v63 = vld [vmem:[#allocation5 + $0x2048] sm:$0xff] }
 0x21e   :  { %4981 = vmatprep.subr.bf16.mxu1 %v4980_v6  ;;  %v876_v6 = vld [vmem:[#allocation5 + $0x1710] sm:$0xff]  ;;  %v1175_v0 = vld [vmem:[#allocation5 + $0x2068] sm:$0xff]  ;;  %v953_v53 = vld [vmem:[#allocation5 + $0x1978] sm:$0xff] }
 0x21f   :  { %4339 = vmatpush1.bf16.msra.mxu0 %v4338_v5  ;;  %v1130_v5 = vld [vmem:[#allocation5 + $0x1f00] sm:$0xff]  ;;  %v5002_v13 = vpack.c.bf16 %v880_v28, %v876_v6  ;;  %v920_v6 = vld [vmem:[#allocation5 + $0x1870] sm:$0xff]  ;;  %v4380_v28 = vpack.c.bf16 %v1175_v0, %v1171_v63  ;;  %v957_v63 = vld [vmem:[#allocation5 + $0x1998] sm:$0xff] }
 0x220   :  { %4341 = vmatprep.subr.bf16.mxu0 %v4340_v9  ;;  %v885_v9 = vld [vmem:[#allocation5 + $0x1758] sm:$0xff]  ;;  %v4362_v14 = vpack.c.bf16 %v1134_v8, %v1130_v5  ;;  %v916_v5 = vld [vmem:[#allocation5 + $0x1850] sm:$0xff] }
 0x221   :  { %4983 = vmatpush1.bf16.msra.mxu1 %v4982_v15  ;;  %v5004_v15 = vpack.c.bf16 %v889_v10, %v885_v9  ;;  %v925_v8 = vld [vmem:[#allocation5 + $0x1898] sm:$0xff]  ;;  %v5633_v10 = vld [vmem:[#allocation2 + $0x50] sm:$0xff] }
 0x222   :  { %4985 = vmatprep.subr.bf16.mxu1 %v4984_v20  ;;  %v884_v20 = vld [vmem:[#allocation5 + $0x1750] sm:$0xff]  ;;  %v929_v9 = vld [vmem:[#allocation5 + $0x18b8] sm:$0xff] }
 0x223   :  { %4343 = vmatpush1.bf16.msra.mxu0 %v4342_v18  ;;  %v1138_v18 = vld [vmem:[#allocation5 + $0x1f40] sm:$0xff]  ;;  %v5006_v29 = vpack.c.bf16 %v888_v21, %v884_v20  ;;  %v924_v21 = vld [vmem:[#allocation5 + $0x1890] sm:$0xff]  ;;  %v961_v0 = vld [vmem:[#allocation5 + $0x19b8] sm:$0xff] }
 0x224   :  { %4345 = vmatprep.subr.bf16.mxu0 %v4344_v24  ;;  %v893_v24 = vld [vmem:[#allocation5 + $0x1798] sm:$0xff]  ;;  %v4366_v30 = vpack.c.bf16 %v1142_v23, %v1138_v18  ;;  %v5024_v18 = vpack.c.bf16 %v929_v9, %v925_v8  ;;  %v1178_v20 = vld [vmem:[#allocation5 + $0x2080] sm:$0xff]  ;;  %v4384_v23 = vpack.c.bf16 %v1183_v12, %v1179_v11  ;;  %v1219_v11 = vld [vmem:[#allocation5 + $0x21c8] sm:$0xff] }
 0x225   :  { %4987 = vmatpush1.bf16.msra.mxu1 %v4986_v31  ;;  %v5008_v31 = vpack.c.bf16 %v897_v25, %v893_v24  ;;  %v1182_v24 = vld [vmem:[#allocation5 + $0x20a0] sm:$0xff]  ;;  %v933_v25 = vld [vmem:[#allocation5 + $0x18d8] sm:$0xff]  ;;  %v1223_v12 = vld [vmem:[#allocation5 + $0x21e8] sm:$0xff] }
 0x226   :  { %4989 = vmatprep.subr.bf16.mxu1 %v4988_v33  ;;  %v892_v33 = vld [vmem:[#allocation5 + $0x1790] sm:$0xff]  ;;  %v1214_v8 = vld [vmem:[#allocation5 + $0x21a0] sm:$0xff]  ;;  %v965_v9 = vld [vmem:[#allocation5 + $0x19d8] sm:$0xff] }
 0x227   :  { %4347 = vmatpush1.bf16.msra.mxu0 %v4346_v32  ;;  %v1146_v32 = vld [vmem:[#allocation5 + $0x1f80] sm:$0xff]  ;;  %v5010_v41 = vpack.c.bf16 %v896_v34, %v892_v33  ;;  %v5028_v33 = vpack.c.bf16 %v937_v26, %v933_v25  ;;  %v977_v25 = vld [vmem:[#allocation5 + $0x1a38] sm:$0xff]  ;;  %v1227_v26 = vld [vmem:[#allocation5 + $0x2208] sm:$0xff] }
 0x228   :  { %4349 = vmatprep.subr.bf16.mxu0 %v4348_v37  ;;  %v901_v37 = vld [vmem:[#allocation5 + $0x17d8] sm:$0xff]  ;;  %v4370_v42 = vpack.c.bf16 %v1150_v36, %v1146_v32  ;;  %v4386_v32 = vpack.c.bf16 %v1182_v24, %v1178_v20  ;;  %v1186_v34 = vld [vmem:[#allocation5 + $0x20c0] sm:$0xff]  ;;  %v936_v36 = vld [vmem:[#allocation5 + $0x18f0] sm:$0xff] }
 0x229   :  { %4991 = vmatpush1.bf16.msra.mxu1 %v4990_v44  ;;  %v5012_v44 = vpack.c.bf16 %v905_v38, %v901_v37  ;;  %v1190_v38 = vld [vmem:[#allocation5 + $0x20e0] sm:$0xff]  ;;  %v964_v20 = vld [vmem:[#allocation5 + $0x19d0] sm:$0xff]  ;;  %v973_v24 = vld [vmem:[#allocation5 + $0x1a18] sm:$0xff] }
 0x22a   :  { %4993 = vmatprep.subr.bf16.mxu1 %v4992_v46  ;;  %v900_v46 = vld [vmem:[#allocation5 + $0x17d0] sm:$0xff] }
 0x22b   :  { %4351 = vmatpush1.bf16.msra.mxu0 %v4350_v45  ;;  %v1154_v45 = vld [vmem:[#allocation5 + $0x1fc0] sm:$0xff]  ;;  %v5014_v54 = vpack.c.bf16 %v904_v47, %v900_v46  ;;  %v5032_v46 = vpack.c.bf16 %v945_v40, %v941_v39  ;;  %v1235_v39 = vld [vmem:[#allocation5 + $0x2248] sm:$0xff] }
 0x22c   :  { %4353 = vmatprep.subr.bf16.mxu0 %v4352_v51  ;;  %v909_v51 = vld [vmem:[#allocation5 + $0x1818] sm:$0xff]  ;;  %v4374_v55 = vpack.c.bf16 %v1158_v50, %v1154_v45  ;;  %v4390_v45 = vpack.c.bf16 %v1190_v38, %v1186_v34  ;;  %v1194_v47 = vld [vmem:[#allocation5 + $0x2100] sm:$0xff]  ;;  %v944_v50 = vld [vmem:[#allocation5 + $0x1930] sm:$0xff] }
 0x22d   :  { %4995 = vmatpush1.bf16.msra.mxu1 %v4994_v16  ;;  %v5016_v16 = vpack.c.bf16 %v913_v52, %v909_v51  ;;  %v1198_v52 = vld [vmem:[#allocation5 + $0x2120] sm:$0xff]  ;;  %v976_v34 = vld [vmem:[#allocation5 + $0x1a30] sm:$0xff]  ;;  %v985_v38 = vld [vmem:[#allocation5 + $0x1a78] sm:$0xff] }
 0x22e   :  { %4997 = vmatprep.subr.bf16.mxu1 %v4996_v57  ;;  %v908_v57 = vld [vmem:[#allocation5 + $0x1810] sm:$0xff]  ;;  %v1239_v40 = vld [vmem:[#allocation5 + $0x2268] sm:$0xff] }
 0x22f   :  { %4355 = vmatpush1.bf16.msra.mxu0 %v4354_v56  ;;  %v1162_v56 = vld [vmem:[#allocation5 + $0x2000] sm:$0xff]  ;;  %v5018_v19 = vpack.c.bf16 %v912_v58, %v908_v57  ;;  %v5036_v57 = vpack.c.bf16 %v953_v53, %v949_v17  ;;  %v1243_v17 = vld [vmem:[#allocation5 + $0x2288] sm:$0xff] }
 0x230   :  { %4357 = vmatprep.subr.bf16.mxu0 %v4356_v61  ;;  %v917_v61 = vld [vmem:[#allocation5 + $0x1858] sm:$0xff]  ;;  %v1202_v58 = vld [vmem:[#allocation5 + $0x2140] sm:$0xff]  ;;  %v1247_v53 = vld [vmem:[#allocation5 + $0x22a8] sm:$0xff] }
 0x231   :  { %4999 = vmatpush1.bf16.msra.mxu1 %v4998_v2  ;;  %v4378_v2 = vpack.c.bf16 %v1166_v60, %v1162_v56  ;;  %v4394_v56 = vpack.c.bf16 %v1198_v52, %v1194_v47  ;;  %v952_v60 = vld [vmem:[#allocation5 + $0x1970] sm:$0xff]  ;;  %v993_v52 = vld [vmem:[#allocation5 + $0x1ab8] sm:$0xff] }
 0x232   :  { %5001 = vmatprep.subr.bf16.mxu1 %v5000_v4  ;;  %v1170_v4 = vld [vmem:[#allocation5 + $0x2040] sm:$0xff]  ;;  %v984_v47 = vld [vmem:[#allocation5 + $0x1a70] sm:$0xff] }
 0x233   :  { %4359 = vmatpush1.bf16.msra.mxu0 %v4358_v3  ;;  %v5020_v3 = vpack.c.bf16 %v921_v62, %v917_v61  ;;  %v1206_v62 = vld [vmem:[#allocation5 + $0x2160] sm:$0xff] }
 0x234   :  { %4361 = vmatprep.subr.bf16.mxu0 %v4360_v7  ;;  %v1174_v7 = vld [vmem:[#allocation5 + $0x2060] sm:$0xff] }
 0x235   :  { %5003 = vmatpush1.bf16.msra.mxu1 %v5002_v13  ;;  %v131_v13 = vld [vmem:[#allocation2 + $0x88] sm:$0xff] }
 0x236   :  { %5005 = vmatprep.subr.bf16.mxu1 %v5004_v15  ;;  %v4382_v15 = vpack.c.bf16 %v1174_v7, %v1170_v4  ;;  %v5040_v4 = vpack.c.bf16 %v961_v0, %v957_v63  ;;  %v1251_v63 = vld [vmem:[#allocation5 + $0x22c8] sm:$0xff] }
 0x237   :  { %4363 = vmatpush1.bf16.msra.mxu0 %v4362_v14  ;;  %v5022_v14 = vpack.c.bf16 %v920_v6, %v916_v5  ;;  %v1210_v5 = vld [vmem:[#allocation5 + $0x2180] sm:$0xff]  ;;  %v956_v6 = vld [vmem:[#allocation5 + $0x1990] sm:$0xff]  ;;  %v1255_v0 = vld [vmem:[#allocation5 + $0x22e8] sm:$0xff] }
 0x238   :  { %4365 = vmatprep.subr.bf16.mxu0 %v4364_v22  ;;  %v928_v22 = vld [vmem:[#allocation5 + $0x18b0] sm:$0xff] }
 0x239   :  { %5007 = vmatpush1.bf16.msra.mxu1 %v5006_v29  ;;  %v1191_v29 = vld [vmem:[#allocation5 + $0x20e8] sm:$0xff] }
 0x23a   :  { %5009 = vmatprep.subr.bf16.mxu1 %v5008_v31  ;;  %v5026_v31 = vpack.c.bf16 %v928_v22, %v924_v21  ;;  %v4388_v37 = vpack.c.bf16 %v1191_v29, %v1187_v27  ;;  %v968_v21 = vld [vmem:[#allocation5 + $0x19f0] sm:$0xff]  ;;  %v4404_v22 = vpack.c.bf16 %v1223_v12, %v1219_v11  ;;  %v1231_v27 = vld [vmem:[#allocation5 + $0x2228] sm:$0xff] }
 0x23b   :  { %4367 = vmatpush1.bf16.msra.mxu0 %v4366_v30  ;;  %v5634_v30 = vld [vmem:[#allocation2 + $0x68] sm:$0xff]  ;;  %v5046_v29 = vpack.c.bf16 %v968_v21, %v964_v20  ;;  %v1262_v21 = vld [vmem:[#allocation5 + $0x2320] sm:$0xff] }
 0x23c   :  { %4369 = vmatprep.subr.bf16.mxu0 %v4368_v35  ;;  %v932_v35 = vld [vmem:[#allocation5 + $0x18d0] sm:$0xff] }
 0x23d   :  { %5011 = vmatpush1.bf16.msra.mxu1 %v5010_v41  ;;  %v1195_v41 = vld [vmem:[#allocation5 + $0x2108] sm:$0xff] }
 0x23e   :  { %5013 = vmatprep.subr.bf16.mxu1 %v5012_v44  ;;  %v5030_v44 = vpack.c.bf16 %v936_v36, %v932_v35  ;;  %v4408_v35 = vpack.c.bf16 %v1231_v27, %v1227_v26  ;;  %v1230_v36 = vld [vmem:[#allocation5 + $0x2220] sm:$0xff] }
 0x23f   :  { %4371 = vmatpush1.bf16.msra.mxu0 %v4370_v42  ;;  %v1199_v42 = vld [vmem:[#allocation5 + $0x2128] sm:$0xff] }
 0x240   :  { %4373 = vmatprep.subr.bf16.mxu0 %v4372_v49  ;;  %v940_v49 = vld [vmem:[#allocation5 + $0x1910] sm:$0xff]  ;;  %v4392_v51 = vpack.c.bf16 %v1199_v42, %v1195_v41 }
 0x241   :  { %5015 = vmatpush1.bf16.msra.mxu1 %v5014_v54  ;;  %v1203_v54 = vld [vmem:[#allocation5 + $0x2148] sm:$0xff] }
 0x242   :  { %5017 = vmatprep.subr.bf16.mxu1 %v5016_v16  ;;  %v5034_v16 = vpack.c.bf16 %v944_v50, %v940_v49  ;;  %v4412_v49 = vpack.c.bf16 %v1239_v40, %v1235_v39  ;;  %v1238_v50 = vld [vmem:[#allocation5 + $0x2260] sm:$0xff] }
 0x243   :  { %4375 = vmatpush1.bf16.msra.mxu0 %v4374_v55  ;;  %v1207_v55 = vld [vmem:[#allocation5 + $0x2168] sm:$0xff] }
 0x244   :  { %4377 = vmatprep.subr.bf16.mxu0 %v4376_v59  ;;  %2968 = vmatmul.mubr.f32.vlgmr.msra.gmra.mrb[2].mxu1 %v5633_v10  ;;  %v948_v59 = vld [vmem:[#allocation5 + $0x1950] sm:$0xff]  ;;  %v4396_v61 = vpack.c.bf16 %v1207_v55, %v1203_v54  ;;  %v969_v10 = vld [vmem:[#allocation5 + $0x19f8] sm:$0xff] }
 0x245   :  { %5019 = vmatpush1.bf16.msra.mxu1 %v5018_v19  ;;  %3038 = vmatprep.mubr.f32.mxu1 %v5634_v30  ;;  %v1215_v19 = vld [vmem:[#allocation5 + $0x21a8] sm:$0xff] }
 0x246   :  { %2258 = vmatmul.mubr.f32.vlgmr.msra.gmra.mrb[0].mxu0 %v128_v1  ;;  %5021 = vmatprep.subr.bf16.mxu1 %v5020_v3  ;;  %v1211_v1 = vld [vmem:[#allocation5 + $0x2188] sm:$0xff]  ;;  %v4398_v3 = vpack.c.bf16 %v1206_v62, %v1202_v58  ;;  %v992_v58 = vld [vmem:[#allocation5 + $0x1ab0] sm:$0xff]  ;;  %v1001_v62 = vld [vmem:[#allocation5 + $0x1af8] sm:$0xff] }
 0x247   :  { %4379 = vmatpush1.bf16.msra.mxu0 %v4378_v2  ;;  %2328 = vmatprep.mubr.f32.mxu0 %v131_v13  ;;  %v5038_v2 = vpack.c.bf16 %v952_v60, %v948_v59  ;;  %v4400_v7 = vpack.c.bf16 %v1215_v19, %v1211_v1  ;;  %v4416_v59 = vpack.c.bf16 %v1247_v53, %v1243_v17  ;;  %v1246_v60 = vld [vmem:[#allocation5 + $0x22a0] sm:$0xff] }
 0x248   :  { %4381 = vmatprep.subr.bf16.mxu0 %v4380_v28  ;;  %v960_v28 = vld [vmem:[#allocation5 + $0x19b0] sm:$0xff] }
 0x249   :  { %5023 = vmatpush1.bf16.msra.mxu1 %v5022_v14  ;;  %v5042_v13 = vpack.c.bf16 %v960_v28, %v956_v6  ;;  %v4402_v14 = vpack.c.bf16 %v1214_v8, %v1210_v5  ;;  %v1000_v5 = vld [vmem:[#allocation5 + $0x1af0] sm:$0xff]  ;;  %v4420_v6 = vpack.c.bf16 %v1255_v0, %v1251_v63  ;;  %v1254_v28 = vld [vmem:[#allocation5 + $0x22e0] sm:$0xff]  ;;  %v1009_v8 = vld [vmem:[#allocation5 + $0x1b38] sm:$0xff] }
 0x24a   :  { %5025 = vmatprep.subr.bf16.mxu1 %v5024_v18  ;;  %v1218_v18 = vld [vmem:[#allocation5 + $0x21c0] sm:$0xff] }
 0x24b   :  { %4383 = vmatpush1.bf16.msra.mxu0 %v4382_v15  ;;  %v5044_v15 = vpack.c.bf16 %v969_v10, %v965_v9  ;;  %v1259_v9 = vld [vmem:[#allocation5 + $0x2308] sm:$0xff] }
 0x24c   :  { %4385 = vmatprep.subr.bf16.mxu0 %v4384_v23  ;;  %v1222_v23 = vld [vmem:[#allocation5 + $0x21e0] sm:$0xff]  ;;  %v1263_v10 = vld [vmem:[#allocation5 + $0x2328] sm:$0xff] }
 0x24d   :  { %5027 = vmatpush1.bf16.msra.mxu1 %v5026_v31  ;;  %v4406_v30 = vpack.c.bf16 %v1222_v23, %v1218_v18  ;;  %v5048_v31 = vpack.c.bf16 %v977_v25, %v973_v24  ;;  %v1008_v18 = vld [vmem:[#allocation5 + $0x1b30] sm:$0xff]  ;;  %v4424_v20 = vpack.c.bf16 %v1263_v10, %v1259_v9  ;;  %v1017_v23 = vld [vmem:[#allocation5 + $0x1b78] sm:$0xff]  ;;  %v1267_v24 = vld [vmem:[#allocation5 + $0x2348] sm:$0xff] }
 0x24e   :  { %5029 = vmatprep.subr.bf16.mxu1 %v5028_v33  ;;  %v972_v33 = vld [vmem:[#allocation5 + $0x1a10] sm:$0xff]  ;;  %v1271_v25 = vld [vmem:[#allocation5 + $0x2368] sm:$0xff]  ;;  %v130_v9 = vld [vmem:[#allocation2 + $0x80] sm:$0xff] }
 0x24f   :  { %4387 = vmatpush1.bf16.msra.mxu0 %v4386_v32  ;;  %v1226_v32 = vld [vmem:[#allocation5 + $0x2200] sm:$0xff]  ;;  %v5050_v41 = vpack.c.bf16 %v976_v34, %v972_v33  ;;  %v4428_v33 = vpack.c.bf16 %v1271_v25, %v1267_v24  ;;  %v1307_v24 = vld [vmem:[#allocation5 + $0x2488] sm:$0xff] }
 0x250   :  { %4389 = vmatprep.subr.bf16.mxu0 %v4388_v37  ;;  %v981_v37 = vld [vmem:[#allocation5 + $0x1a58] sm:$0xff]  ;;  %v4410_v42 = vpack.c.bf16 %v1230_v36, %v1226_v32  ;;  %v1016_v32 = vld [vmem:[#allocation5 + $0x1b70] sm:$0xff]  ;;  %v1270_v34 = vld [vmem:[#allocation5 + $0x2360] sm:$0xff] }
 0x251   :  { %5031 = vmatpush1.bf16.msra.mxu1 %v5030_v44  ;;  %v5052_v44 = vpack.c.bf16 %v985_v38, %v981_v37  ;;  %v1025_v36 = vld [vmem:[#allocation5 + $0x1bb8] sm:$0xff]  ;;  %v1275_v37 = vld [vmem:[#allocation5 + $0x2388] sm:$0xff] }
 0x252   :  { %5033 = vmatprep.subr.bf16.mxu1 %v5032_v46  ;;  %v980_v46 = vld [vmem:[#allocation5 + $0x1a50] sm:$0xff]  ;;  %v1279_v38 = vld [vmem:[#allocation5 + $0x23a8] sm:$0xff] }
 0x253   :  { %4391 = vmatpush1.bf16.msra.mxu0 %v4390_v45  ;;  %v1234_v45 = vld [vmem:[#allocation5 + $0x2240] sm:$0xff]  ;;  %v5054_v54 = vpack.c.bf16 %v984_v47, %v980_v46  ;;  %v4432_v46 = vpack.c.bf16 %v1279_v38, %v1275_v37  ;;  %v1311_v25 = vld [vmem:[#allocation5 + $0x24a8] sm:$0xff]  ;;  %v1065_v37 = vld [vmem:[#allocation5 + $0x1cf8] sm:$0xff] }
 0x254   :  { %4393 = vmatprep.subr.bf16.mxu0 %v4392_v51  ;;  %v989_v51 = vld [vmem:[#allocation5 + $0x1a98] sm:$0xff]  ;;  %v4414_v55 = vpack.c.bf16 %v1238_v50, %v1234_v45  ;;  %v1024_v45 = vld [vmem:[#allocation5 + $0x1bb0] sm:$0xff]  ;;  %v1278_v47 = vld [vmem:[#allocation5 + $0x23a0] sm:$0xff] }
 0x255   :  { %5035 = vmatpush1.bf16.msra.mxu1 %v5034_v16  ;;  %v5056_v16 = vpack.c.bf16 %v993_v52, %v989_v51  ;;  %v1033_v50 = vld [vmem:[#allocation5 + $0x1bf8] sm:$0xff]  ;;  %v1283_v51 = vld [vmem:[#allocation5 + $0x23c8] sm:$0xff] }
 0x256   :  { %5037 = vmatprep.subr.bf16.mxu1 %v5036_v57  ;;  %v988_v57 = vld [vmem:[#allocation5 + $0x1a90] sm:$0xff]  ;;  %v1287_v52 = vld [vmem:[#allocation5 + $0x23e8] sm:$0xff] }
 0x257   :  { %4395 = vmatpush1.bf16.msra.mxu0 %v4394_v56  ;;  %v1242_v56 = vld [vmem:[#allocation5 + $0x2280] sm:$0xff]  ;;  %v5058_v1 = vpack.c.bf16 %v992_v58, %v988_v57  ;;  %v4436_v57 = vpack.c.bf16 %v1287_v52, %v1283_v51  ;;  %v1315_v38 = vld [vmem:[#allocation5 + $0x24c8] sm:$0xff]  ;;  %v1069_v51 = vld [vmem:[#allocation5 + $0x1d18] sm:$0xff] }
 0x258   :  { %4397 = vmatprep.subr.bf16.mxu0 %v4396_v61  ;;  %v997_v61 = vld [vmem:[#allocation5 + $0x1ad8] sm:$0xff]  ;;  %v4418_v19 = vpack.c.bf16 %v1246_v60, %v1242_v56  ;;  %v1032_v56 = vld [vmem:[#allocation5 + $0x1bf0] sm:$0xff]  ;;  %v1286_v58 = vld [vmem:[#allocation5 + $0x23e0] sm:$0xff] }
 0x259   :  { %5039 = vmatpush1.bf16.msra.mxu1 %v5038_v2  ;;  %v5060_v2 = vpack.c.bf16 %v1001_v62, %v997_v61  ;;  %v1041_v60 = vld [vmem:[#allocation5 + $0x1c38] sm:$0xff]  ;;  %v1291_v61 = vld [vmem:[#allocation5 + $0x2408] sm:$0xff] }
 0x25a   :  { %5041 = vmatprep.subr.bf16.mxu1 %v5040_v4  ;;  %v996_v4 = vld [vmem:[#allocation5 + $0x1ad0] sm:$0xff]  ;;  %v1295_v62 = vld [vmem:[#allocation5 + $0x2428] sm:$0xff]  ;;  %v1073_v52 = vld [vmem:[#allocation5 + $0x1d38] sm:$0xff] }
 0x25b   :  { %4399 = vmatpush1.bf16.msra.mxu0 %v4398_v3  ;;  %v1250_v3 = vld [vmem:[#allocation5 + $0x22c0] sm:$0xff]  ;;  %v5062_v11 = vpack.c.bf16 %v1000_v5, %v996_v4  ;;  %v4440_v4 = vpack.c.bf16 %v1295_v62, %v1291_v61  ;;  %v1077_v61 = vld [vmem:[#allocation5 + $0x1d58] sm:$0xff] }
 0x25c   :  { %4401 = vmatprep.subr.bf16.mxu0 %v4400_v7  ;;  %v1005_v7 = vld [vmem:[#allocation5 + $0x1b18] sm:$0xff]  ;;  %v4422_v12 = vpack.c.bf16 %v1254_v28, %v1250_v3  ;;  %v1040_v3 = vld [vmem:[#allocation5 + $0x1c30] sm:$0xff]  ;;  %v1294_v5 = vld [vmem:[#allocation5 + $0x2420] sm:$0xff] }
 0x25d   :  { %5043 = vmatpush1.bf16.msra.mxu1 %v5042_v13  ;;  %v5064_v13 = vpack.c.bf16 %v1009_v8, %v1005_v7  ;;  %v1049_v28 = vld [vmem:[#allocation5 + $0x1c78] sm:$0xff]  ;;  %v1299_v7 = vld [vmem:[#allocation5 + $0x2448] sm:$0xff] }
 0x25e   :  { %5045 = vmatprep.subr.bf16.mxu1 %v5044_v15  ;;  %v1004_v15 = vld [vmem:[#allocation5 + $0x1b10] sm:$0xff]  ;;  %v1303_v8 = vld [vmem:[#allocation5 + $0x2468] sm:$0xff]  ;;  %v1081_v62 = vld [vmem:[#allocation5 + $0x1d78] sm:$0xff] }
 0x25f   :  { %4403 = vmatpush1.bf16.msra.mxu0 %v4402_v14  ;;  %v1258_v14 = vld [vmem:[#allocation5 + $0x2300] sm:$0xff]  ;;  %v5066_v26 = vpack.c.bf16 %v1008_v18, %v1004_v15  ;;  %v1048_v15 = vld [vmem:[#allocation5 + $0x1c70] sm:$0xff]  ;;  %v4444_v18 = vpack.c.bf16 %v1303_v8, %v1299_v7  ;;  %v1085_v7 = vld [vmem:[#allocation5 + $0x1d98] sm:$0xff] }
 0x260   :  { %4405 = vmatprep.subr.bf16.mxu0 %v4404_v22  ;;  %v1013_v22 = vld [vmem:[#allocation5 + $0x1b58] sm:$0xff]  ;;  %v4426_v27 = vpack.c.bf16 %v1262_v21, %v1258_v14  ;;  %v1044_v14 = vld [vmem:[#allocation5 + $0x1c50] sm:$0xff] }
 0x261   :  { %5047 = vmatpush1.bf16.msra.mxu1 %v5046_v29  ;;  %v5068_v29 = vpack.c.bf16 %v1017_v23, %v1013_v22  ;;  %v1053_v21 = vld [vmem:[#allocation5 + $0x1c98] sm:$0xff]  ;;  %v5635_v23 = vld [vmem:[#allocation2 + $0x60] sm:$0xff] }
 0x262   :  { %5049 = vmatprep.subr.bf16.mxu1 %v5048_v31  ;;  %v1012_v31 = vld [vmem:[#allocation5 + $0x1b50] sm:$0xff]  ;;  %v1057_v22 = vld [vmem:[#allocation5 + $0x1cb8] sm:$0xff] }
 0x263   :  { %4407 = vmatpush1.bf16.msra.mxu0 %v4406_v30  ;;  %v1266_v30 = vld [vmem:[#allocation5 + $0x2340] sm:$0xff]  ;;  %v5070_v39 = vpack.c.bf16 %v1016_v32, %v1012_v31  ;;  %v1052_v32 = vld [vmem:[#allocation5 + $0x1c90] sm:$0xff]  ;;  %v1089_v8 = vld [vmem:[#allocation5 + $0x1db8] sm:$0xff] }
 0x264   :  { %4409 = vmatprep.subr.bf16.mxu0 %v4408_v35  ;;  %v1021_v35 = vld [vmem:[#allocation5 + $0x1b98] sm:$0xff]  ;;  %v4430_v40 = vpack.c.bf16 %v1270_v34, %v1266_v30  ;;  %v5088_v30 = vpack.c.bf16 %v1057_v22, %v1053_v21  ;;  %v1306_v31 = vld [vmem:[#allocation5 + $0x2480] sm:$0xff]  ;;  %v4448_v34 = vpack.c.bf16 %v1311_v25, %v1307_v24  ;;  %v1347_v24 = vld [vmem:[#allocation5 + $0x25c8] sm:$0xff] }
 0x265   :  { %5051 = vmatpush1.bf16.msra.mxu1 %v5050_v41  ;;  %v5072_v41 = vpack.c.bf16 %v1025_v36, %v1021_v35  ;;  %v1310_v35 = vld [vmem:[#allocation5 + $0x24a0] sm:$0xff]  ;;  %v1061_v36 = vld [vmem:[#allocation5 + $0x1cd8] sm:$0xff]  ;;  %v1351_v25 = vld [vmem:[#allocation5 + $0x25e8] sm:$0xff] }
 0x266   :  { %5053 = vmatprep.subr.bf16.mxu1 %v5052_v44  ;;  %v1020_v44 = vld [vmem:[#allocation5 + $0x1b90] sm:$0xff]  ;;  %v1342_v21 = vld [vmem:[#allocation5 + $0x25a0] sm:$0xff]  ;;  %v1093_v22 = vld [vmem:[#allocation5 + $0x1dd8] sm:$0xff] }
 0x267   :  { %4411 = vmatpush1.bf16.msra.mxu0 %v4410_v42  ;;  %v1274_v42 = vld [vmem:[#allocation5 + $0x2380] sm:$0xff]  ;;  %v5074_v17 = vpack.c.bf16 %v1024_v45, %v1020_v44  ;;  %v5092_v44 = vpack.c.bf16 %v1065_v37, %v1061_v36  ;;  %v1105_v36 = vld [vmem:[#allocation5 + $0x1e38] sm:$0xff]  ;;  %v1355_v37 = vld [vmem:[#allocation5 + $0x2608] sm:$0xff] }
 0x268   :  { %4413 = vmatprep.subr.bf16.mxu0 %v4412_v49  ;;  %v1029_v49 = vld [vmem:[#allocation5 + $0x1bd8] sm:$0xff]  ;;  %v4434_v53 = vpack.c.bf16 %v1278_v47, %v1274_v42  ;;  %v4450_v42 = vpack.c.bf16 %v1310_v35, %v1306_v31  ;;  %v1314_v45 = vld [vmem:[#allocation5 + $0x24c0] sm:$0xff]  ;;  %v1064_v47 = vld [vmem:[#allocation5 + $0x1cf0] sm:$0xff] }
 0x269   :  { %5055 = vmatpush1.bf16.msra.mxu1 %v5054_v54  ;;  %v5076_v54 = vpack.c.bf16 %v1033_v50, %v1029_v49  ;;  %v1318_v50 = vld [vmem:[#allocation5 + $0x24e0] sm:$0xff]  ;;  %v1092_v31 = vld [vmem:[#allocation5 + $0x1dd0] sm:$0xff]  ;;  %v1101_v35 = vld [vmem:[#allocation5 + $0x1e18] sm:$0xff] }
 0x26a   :  { %5057 = vmatprep.subr.bf16.mxu1 %v5056_v16  ;;  %v1028_v16 = vld [vmem:[#allocation5 + $0x1bd0] sm:$0xff] }
 0x26b   :  { %4415 = vmatpush1.bf16.msra.mxu0 %v4414_v55  ;;  %v1282_v55 = vld [vmem:[#allocation5 + $0x23c0] sm:$0xff]  ;;  %v5078_v63 = vpack.c.bf16 %v1032_v56, %v1028_v16  ;;  %v5096_v16 = vpack.c.bf16 %v1073_v52, %v1069_v51  ;;  %v1363_v51 = vld [vmem:[#allocation5 + $0x2648] sm:$0xff] }
 0x26c   :  { %4417 = vmatprep.subr.bf16.mxu0 %v4416_v59  ;;  %v1037_v59 = vld [vmem:[#allocation5 + $0x1c18] sm:$0xff]  ;;  %v4438_v0 = vpack.c.bf16 %v1286_v58, %v1282_v55  ;;  %v4454_v55 = vpack.c.bf16 %v1318_v50, %v1314_v45  ;;  %v1322_v56 = vld [vmem:[#allocation5 + $0x2500] sm:$0xff]  ;;  %v1072_v58 = vld [vmem:[#allocation5 + $0x1d30] sm:$0xff] }
 0x26d   :  { %5059 = vmatpush1.bf16.msra.mxu1 %v5058_v1  ;;  %v5080_v1 = vpack.c.bf16 %v1041_v60, %v1037_v59  ;;  %v1326_v60 = vld [vmem:[#allocation5 + $0x2520] sm:$0xff]  ;;  %v1104_v45 = vld [vmem:[#allocation5 + $0x1e30] sm:$0xff]  ;;  %v1113_v50 = vld [vmem:[#allocation5 + $0x1e78] sm:$0xff] }
 0x26e   :  { %5061 = vmatprep.subr.bf16.mxu1 %v5060_v2  ;;  %v1036_v2 = vld [vmem:[#allocation5 + $0x1c10] sm:$0xff]  ;;  %v1367_v52 = vld [vmem:[#allocation5 + $0x2668] sm:$0xff] }
 0x26f   :  { %4419 = vmatpush1.bf16.msra.mxu0 %v4418_v19  ;;  %v1290_v19 = vld [vmem:[#allocation5 + $0x2400] sm:$0xff]  ;;  %v5082_v10 = vpack.c.bf16 %v1040_v3, %v1036_v2  ;;  %v5100_v2 = vpack.c.bf16 %v1081_v62, %v1077_v61  ;;  %v1371_v61 = vld [vmem:[#allocation5 + $0x2688] sm:$0xff] }
 0x270   :  { %4421 = vmatprep.subr.bf16.mxu0 %v4420_v6  ;;  %v1045_v6 = vld [vmem:[#allocation5 + $0x1c58] sm:$0xff]  ;;  %v1330_v3 = vld [vmem:[#allocation5 + $0x2540] sm:$0xff]  ;;  %v1375_v62 = vld [vmem:[#allocation5 + $0x26a8] sm:$0xff] }
 0x271   :  { %5063 = vmatpush1.bf16.msra.mxu1 %v5062_v11  ;;  %v4442_v11 = vpack.c.bf16 %v1294_v5, %v1290_v19  ;;  %v4458_v19 = vpack.c.bf16 %v1326_v60, %v1322_v56  ;;  %v1080_v5 = vld [vmem:[#allocation5 + $0x1d70] sm:$0xff]  ;;  %v1121_v60 = vld [vmem:[#allocation5 + $0x1eb8] sm:$0xff] }
 0x272   :  { %5065 = vmatprep.subr.bf16.mxu1 %v5064_v13  ;;  %v1298_v13 = vld [vmem:[#allocation5 + $0x2440] sm:$0xff]  ;;  %v1112_v56 = vld [vmem:[#allocation5 + $0x1e70] sm:$0xff] }
 0x273   :  { %4423 = vmatpush1.bf16.msra.mxu0 %v4422_v12  ;;  %v5084_v12 = vpack.c.bf16 %v1049_v28, %v1045_v6  ;;  %v1334_v28 = vld [vmem:[#allocation5 + $0x2560] sm:$0xff] }
 0x274   :  { %4425 = vmatprep.subr.bf16.mxu0 %v4424_v20  ;;  %v1302_v20 = vld [vmem:[#allocation5 + $0x2460] sm:$0xff] }
 0x275   :  { %5067 = vmatpush1.bf16.msra.mxu1 %v5066_v26  ;;  %v133_v26 = vld [vmem:[#allocation2 + $0x98] sm:$0xff] }
 0x276   :  { %5069 = vmatprep.subr.bf16.mxu1 %v5068_v29  ;;  %v4446_v29 = vpack.c.bf16 %v1302_v20, %v1298_v13  ;;  %v5104_v13 = vpack.c.bf16 %v1089_v8, %v1085_v7  ;;  %v1379_v7 = vld [vmem:[#allocation5 + $0x26c8] sm:$0xff] }
 0x277   :  { %4427 = vmatpush1.bf16.msra.mxu0 %v4426_v27  ;;  %v5086_v27 = vpack.c.bf16 %v1048_v15, %v1044_v14  ;;  %v1338_v14 = vld [vmem:[#allocation5 + $0x2580] sm:$0xff]  ;;  %v1084_v15 = vld [vmem:[#allocation5 + $0x1d90] sm:$0xff]  ;;  %v1383_v8 = vld [vmem:[#allocation5 + $0x26e8] sm:$0xff] }
 0x278   :  { %4429 = vmatprep.subr.bf16.mxu0 %v4428_v33  ;;  %v1056_v33 = vld [vmem:[#allocation5 + $0x1cb0] sm:$0xff] }
 0x279   :  { %5071 = vmatpush1.bf16.msra.mxu1 %v5070_v39  ;;  %v1319_v39 = vld [vmem:[#allocation5 + $0x24e8] sm:$0xff] }
 0x27a   :  { %5073 = vmatprep.subr.bf16.mxu1 %v5072_v41  ;;  %v5090_v41 = vpack.c.bf16 %v1056_v33, %v1052_v32  ;;  %v4452_v49 = vpack.c.bf16 %v1319_v39, %v1315_v38  ;;  %v1096_v32 = vld [vmem:[#allocation5 + $0x1df0] sm:$0xff]  ;;  %v4468_v33 = vpack.c.bf16 %v1351_v25, %v1347_v24  ;;  %v1359_v38 = vld [vmem:[#allocation5 + $0x2628] sm:$0xff] }
 0x27b   :  { %4431 = vmatpush1.bf16.msra.mxu0 %v4430_v40  ;;  %v5636_v40 = vld [vmem:[#allocation2 + $0x78] sm:$0xff]  ;;  %v5110_v39 = vpack.c.bf16 %v1096_v32, %v1092_v31  ;;  %v1390_v32 = vld [vmem:[#allocation5 + $0x2720] sm:$0xff] }
 0x27c   :  { %4433 = vmatprep.subr.bf16.mxu0 %v4432_v46  ;;  %v1060_v46 = vld [vmem:[#allocation5 + $0x1cd0] sm:$0xff] }
 0x27d   :  { %5075 = vmatpush1.bf16.msra.mxu1 %v5074_v17  ;;  %v1323_v17 = vld [vmem:[#allocation5 + $0x2508] sm:$0xff] }
 0x27e   :  { %5077 = vmatprep.subr.bf16.mxu1 %v5076_v54  ;;  %v5094_v54 = vpack.c.bf16 %v1064_v47, %v1060_v46  ;;  %v4472_v46 = vpack.c.bf16 %v1359_v38, %v1355_v37  ;;  %v1358_v47 = vld [vmem:[#allocation5 + $0x2620] sm:$0xff] }
 0x27f   :  { %4435 = vmatpush1.bf16.msra.mxu0 %v4434_v53  ;;  %v1327_v53 = vld [vmem:[#allocation5 + $0x2528] sm:$0xff] }
 0x280   :  { %4437 = vmatprep.subr.bf16.mxu0 %v4436_v57  ;;  %v1068_v57 = vld [vmem:[#allocation5 + $0x1d10] sm:$0xff]  ;;  %v4456_v59 = vpack.c.bf16 %v1327_v53, %v1323_v17 }
 0x281   :  { %5079 = vmatpush1.bf16.msra.mxu1 %v5078_v63  ;;  %v1331_v63 = vld [vmem:[#allocation5 + $0x2548] sm:$0xff] }
 0x282   :  { %5081 = vmatprep.subr.bf16.mxu1 %v5080_v1  ;;  %v5098_v1 = vpack.c.bf16 %v1072_v58, %v1068_v57  ;;  %v4476_v57 = vpack.c.bf16 %v1367_v52, %v1363_v51  ;;  %v1366_v58 = vld [vmem:[#allocation5 + $0x2660] sm:$0xff] }
 0x283   :  { %4439 = vmatpush1.bf16.msra.mxu0 %v4438_v0  ;;  %v1335_v0 = vld [vmem:[#allocation5 + $0x2568] sm:$0xff] }
 0x284   :  { %4441 = vmatprep.subr.bf16.mxu0 %v4440_v4  ;;  %3039 = vmatmul.mubr.f32.vlgmr.msra.gmra.mrb[2].mxu1 %v5635_v23  ;;  %v1076_v4 = vld [vmem:[#allocation5 + $0x1d50] sm:$0xff]  ;;  %v4460_v6 = vpack.c.bf16 %v1335_v0, %v1331_v63  ;;  %v1097_v23 = vld [vmem:[#allocation5 + $0x1df8] sm:$0xff] }
 0x285   :  { %5083 = vmatpush1.bf16.msra.mxu1 %v5082_v10  ;;  %3109 = vmatprep.mubr.f32.mxu1 %v5636_v40  ;;  %v1343_v10 = vld [vmem:[#allocation5 + $0x25a8] sm:$0xff] }
 0x286   :  { %2329 = vmatmul.mubr.f32.vlgmr.msra.gmra.mrb[0].mxu0 %v130_v9  ;;  %5085 = vmatprep.subr.bf16.mxu1 %v5084_v12  ;;  %v1339_v9 = vld [vmem:[#allocation5 + $0x2588] sm:$0xff]  ;;  %v4462_v12 = vpack.c.bf16 %v1334_v28, %v1330_v3  ;;  %v1120_v3 = vld [vmem:[#allocation5 + $0x1eb0] sm:$0xff]  ;;  %v1129_v28 = vld [vmem:[#allocation5 + $0x1ef8] sm:$0xff] }
 0x287   :  { %4443 = vmatpush1.bf16.msra.mxu0 %v4442_v11  ;;  %2399 = vmatprep.mubr.f32.mxu0 %v133_v26  ;;  %v5102_v11 = vpack.c.bf16 %v1080_v5, %v1076_v4  ;;  %v4464_v20 = vpack.c.bf16 %v1343_v10, %v1339_v9  ;;  %v4480_v4 = vpack.c.bf16 %v1375_v62, %v1371_v61  ;;  %v1374_v5 = vld [vmem:[#allocation5 + $0x26a0] sm:$0xff] }
 0x288   :  { %4445 = vmatprep.subr.bf16.mxu0 %v4444_v18  ;;  %v1088_v18 = vld [vmem:[#allocation5 + $0x1db0] sm:$0xff] }
 0x289   :  { %5087 = vmatpush1.bf16.msra.mxu1 %v5086_v27  ;;  %v5106_v26 = vpack.c.bf16 %v1088_v18, %v1084_v15  ;;  %v4466_v27 = vpack.c.bf16 %v1342_v21, %v1338_v14  ;;  %v1128_v14 = vld [vmem:[#allocation5 + $0x1ef0] sm:$0xff]  ;;  %v4484_v15 = vpack.c.bf16 %v1383_v8, %v1379_v7  ;;  %v1382_v18 = vld [vmem:[#allocation5 + $0x26e0] sm:$0xff]  ;;  %v1137_v21 = vld [vmem:[#allocation5 + $0x1f38] sm:$0xff] }
 0x28a   :  { %5089 = vmatprep.subr.bf16.mxu1 %v5088_v30  ;;  %v1346_v30 = vld [vmem:[#allocation5 + $0x25c0] sm:$0xff] }
 0x28b   :  { %4447 = vmatpush1.bf16.msra.mxu0 %v4446_v29  ;;  %v5108_v29 = vpack.c.bf16 %v1097_v23, %v1093_v22  ;;  %v1387_v22 = vld [vmem:[#allocation5 + $0x2708] sm:$0xff] }
 0x28c   :  { %4449 = vmatprep.subr.bf16.mxu0 %v4448_v34  ;;  %v1350_v34 = vld [vmem:[#allocation5 + $0x25e0] sm:$0xff]  ;;  %v1391_v23 = vld [vmem:[#allocation5 + $0x2728] sm:$0xff] }
 0x28d   :  { %5091 = vmatpush1.bf16.msra.mxu1 %v5090_v41  ;;  %v4470_v40 = vpack.c.bf16 %v1350_v34, %v1346_v30  ;;  %v5112_v41 = vpack.c.bf16 %v1105_v36, %v1101_v35  ;;  %v1136_v30 = vld [vmem:[#allocation5 + $0x1f30] sm:$0xff]  ;;  %v4488_v31 = vpack.c.bf16 %v1391_v23, %v1387_v22  ;;  %v1145_v34 = vld [vmem:[#allocation5 + $0x1f78] sm:$0xff]  ;;  %v1395_v35 = vld [vmem:[#allocation5 + $0x2748] sm:$0xff] }
 0x28e   :  { %5093 = vmatprep.subr.bf16.mxu1 %v5092_v44  ;;  %v1100_v44 = vld [vmem:[#allocation5 + $0x1e10] sm:$0xff]  ;;  %v1399_v36 = vld [vmem:[#allocation5 + $0x2768] sm:$0xff] }
 0x28f   :  { %4451 = vmatpush1.bf16.msra.mxu0 %v4450_v42  ;;  %v1354_v42 = vld [vmem:[#allocation5 + $0x2600] sm:$0xff]  ;;  %v5114_v17 = vpack.c.bf16 %v1104_v45, %v1100_v44  ;;  %v4492_v44 = vpack.c.bf16 %v1399_v36, %v1395_v35  ;;  %v132_v22 = vld [vmem:[#allocation2 + $0x90] sm:$0xff]  ;;  %v1435_v35 = vld [vmem:[#allocation5 + $0x2888] sm:$0xff] }
 0x290   :  { %4453 = vmatprep.subr.bf16.mxu0 %v4452_v49  ;;  %v1109_v49 = vld [vmem:[#allocation5 + $0x1e58] sm:$0xff]  ;;  %v4474_v53 = vpack.c.bf16 %v1358_v47, %v1354_v42  ;;  %v1144_v42 = vld [vmem:[#allocation5 + $0x1f70] sm:$0xff]  ;;  %v1398_v45 = vld [vmem:[#allocation5 + $0x2760] sm:$0xff] }
 0x291   :  { %5095 = vmatpush1.bf16.msra.mxu1 %v5094_v54  ;;  %v5116_v54 = vpack.c.bf16 %v1113_v50, %v1109_v49  ;;  %v1153_v47 = vld [vmem:[#allocation5 + $0x1fb8] sm:$0xff]  ;;  %v1403_v49 = vld [vmem:[#allocation5 + $0x2788] sm:$0xff] }
 0x292   :  { %5097 = vmatprep.subr.bf16.mxu1 %v5096_v16  ;;  %v1108_v16 = vld [vmem:[#allocation5 + $0x1e50] sm:$0xff]  ;;  %v1407_v50 = vld [vmem:[#allocation5 + $0x27a8] sm:$0xff] }
 0x293   :  { %4455 = vmatpush1.bf16.msra.mxu0 %v4454_v55  ;;  %v1362_v55 = vld [vmem:[#allocation5 + $0x2640] sm:$0xff]  ;;  %v5118_v63 = vpack.c.bf16 %v1112_v56, %v1108_v16  ;;  %v4496_v16 = vpack.c.bf16 %v1407_v50, %v1403_v49  ;;  %v1439_v36 = vld [vmem:[#allocation5 + $0x28a8] sm:$0xff]  ;;  %v1193_v49 = vld [vmem:[#allocation5 + $0x20f8] sm:$0xff] }
 0x294   :  { %4457 = vmatprep.subr.bf16.mxu0 %v4456_v59  ;;  %v1117_v59 = vld [vmem:[#allocation5 + $0x1e98] sm:$0xff]  ;;  %v4478_v0 = vpack.c.bf16 %v1366_v58, %v1362_v55  ;;  %v1152_v55 = vld [vmem:[#allocation5 + $0x1fb0] sm:$0xff]  ;;  %v1406_v56 = vld [vmem:[#allocation5 + $0x27a0] sm:$0xff] }
 0x295   :  { %5099 = vmatpush1.bf16.msra.mxu1 %v5098_v1  ;;  %v5120_v1 = vpack.c.bf16 %v1121_v60, %v1117_v59  ;;  %v1161_v58 = vld [vmem:[#allocation5 + $0x1ff8] sm:$0xff]  ;;  %v1411_v59 = vld [vmem:[#allocation5 + $0x27c8] sm:$0xff] }
 0x296   :  { %5101 = vmatprep.subr.bf16.mxu1 %v5100_v2  ;;  %v1116_v2 = vld [vmem:[#allocation5 + $0x1e90] sm:$0xff]  ;;  %v1415_v60 = vld [vmem:[#allocation5 + $0x27e8] sm:$0xff] }
 0x297   :  { %4459 = vmatpush1.bf16.msra.mxu0 %v4458_v19  ;;  %v1370_v19 = vld [vmem:[#allocation5 + $0x2680] sm:$0xff]  ;;  %v5122_v9 = vpack.c.bf16 %v1120_v3, %v1116_v2  ;;  %v4500_v2 = vpack.c.bf16 %v1415_v60, %v1411_v59  ;;  %v1443_v50 = vld [vmem:[#allocation5 + $0x28c8] sm:$0xff]  ;;  %v1197_v59 = vld [vmem:[#allocation5 + $0x2118] sm:$0xff] }
 0x298   :  { %4461 = vmatprep.subr.bf16.mxu0 %v4460_v6  ;;  %v1125_v6 = vld [vmem:[#allocation5 + $0x1ed8] sm:$0xff]  ;;  %v4482_v10 = vpack.c.bf16 %v1374_v5, %v1370_v19  ;;  %v1160_v19 = vld [vmem:[#allocation5 + $0x1ff0] sm:$0xff]  ;;  %v1414_v3 = vld [vmem:[#allocation5 + $0x27e0] sm:$0xff] }
 0x299   :  { %5103 = vmatpush1.bf16.msra.mxu1 %v5102_v11  ;;  %v5124_v11 = vpack.c.bf16 %v1129_v28, %v1125_v6  ;;  %v1169_v5 = vld [vmem:[#allocation5 + $0x2038] sm:$0xff]  ;;  %v1419_v6 = vld [vmem:[#allocation5 + $0x2808] sm:$0xff] }
 0x29a   :  { %5105 = vmatprep.subr.bf16.mxu1 %v5104_v13  ;;  %v1124_v13 = vld [vmem:[#allocation5 + $0x1ed0] sm:$0xff]  ;;  %v1423_v28 = vld [vmem:[#allocation5 + $0x2828] sm:$0xff]  ;;  %v1201_v60 = vld [vmem:[#allocation5 + $0x2138] sm:$0xff] }
 0x29b   :  { %4463 = vmatpush1.bf16.msra.mxu0 %v4462_v12  ;;  %v1378_v12 = vld [vmem:[#allocation5 + $0x26c0] sm:$0xff]  ;;  %v5126_v24 = vpack.c.bf16 %v1128_v14, %v1124_v13  ;;  %v4504_v13 = vpack.c.bf16 %v1423_v28, %v1419_v6  ;;  %v1205_v6 = vld [vmem:[#allocation5 + $0x2158] sm:$0xff] }
 0x29c   :  { %4465 = vmatprep.subr.bf16.mxu0 %v4464_v20  ;;  %v1133_v20 = vld [vmem:[#allocation5 + $0x1f18] sm:$0xff]  ;;  %v4486_v25 = vpack.c.bf16 %v1382_v18, %v1378_v12  ;;  %v1168_v12 = vld [vmem:[#allocation5 + $0x2030] sm:$0xff]  ;;  %v1422_v14 = vld [vmem:[#allocation5 + $0x2820] sm:$0xff] }
 0x29d   :  { %5107 = vmatpush1.bf16.msra.mxu1 %v5106_v26  ;;  %v5128_v26 = vpack.c.bf16 %v1137_v21, %v1133_v20  ;;  %v1177_v18 = vld [vmem:[#allocation5 + $0x2078] sm:$0xff]  ;;  %v1427_v20 = vld [vmem:[#allocation5 + $0x2848] sm:$0xff] }
 0x29e   :  { %5109 = vmatprep.subr.bf16.mxu1 %v5108_v29  ;;  %v1132_v29 = vld [vmem:[#allocation5 + $0x1f10] sm:$0xff]  ;;  %v1431_v21 = vld [vmem:[#allocation5 + $0x2868] sm:$0xff]  ;;  %v1209_v28 = vld [vmem:[#allocation5 + $0x2178] sm:$0xff] }
 0x29f   :  { %4467 = vmatpush1.bf16.msra.mxu0 %v4466_v27  ;;  %v1386_v27 = vld [vmem:[#allocation5 + $0x2700] sm:$0xff]  ;;  %v5130_v37 = vpack.c.bf16 %v1136_v30, %v1132_v29  ;;  %v1176_v29 = vld [vmem:[#allocation5 + $0x2070] sm:$0xff]  ;;  %v4508_v30 = vpack.c.bf16 %v1431_v21, %v1427_v20  ;;  %v1213_v20 = vld [vmem:[#allocation5 + $0x2198] sm:$0xff] }
 0x2a0   :  { %4469 = vmatprep.subr.bf16.mxu0 %v4468_v33  ;;  %v1141_v33 = vld [vmem:[#allocation5 + $0x1f58] sm:$0xff]  ;;  %v4490_v38 = vpack.c.bf16 %v1390_v32, %v1386_v27  ;;  %v1172_v27 = vld [vmem:[#allocation5 + $0x2050] sm:$0xff] }
 0x2a1   :  { %5111 = vmatpush1.bf16.msra.mxu1 %v5110_v39  ;;  %v5132_v39 = vpack.c.bf16 %v1145_v34, %v1141_v33  ;;  %v1181_v32 = vld [vmem:[#allocation5 + $0x2098] sm:$0xff]  ;;  %v5637_v34 = vld [vmem:[#allocation2 + $0x70] sm:$0xff] }
 0x2a2   :  { %5113 = vmatprep.subr.bf16.mxu1 %v5112_v41  ;;  %v1140_v41 = vld [vmem:[#allocation5 + $0x1f50] sm:$0xff]  ;;  %v1185_v33 = vld [vmem:[#allocation5 + $0x20b8] sm:$0xff] }
 0x2a3   :  { %4471 = vmatpush1.bf16.msra.mxu0 %v4470_v40  ;;  %v1394_v40 = vld [vmem:[#allocation5 + $0x2740] sm:$0xff]  ;;  %v5134_v51 = vpack.c.bf16 %v1144_v42, %v1140_v41  ;;  %v1180_v42 = vld [vmem:[#allocation5 + $0x2090] sm:$0xff]  ;;  %v1217_v21 = vld [vmem:[#allocation5 + $0x21b8] sm:$0xff] }
 0x2a4   :  { %4473 = vmatprep.subr.bf16.mxu0 %v4472_v46  ;;  %v1149_v46 = vld [vmem:[#allocation5 + $0x1f98] sm:$0xff]  ;;  %v4494_v52 = vpack.c.bf16 %v1398_v45, %v1394_v40  ;;  %v5152_v40 = vpack.c.bf16 %v1185_v33, %v1181_v32  ;;  %v1434_v41 = vld [vmem:[#allocation5 + $0x2880] sm:$0xff]  ;;  %v4512_v45 = vpack.c.bf16 %v1439_v36, %v1435_v35  ;;  %v1475_v35 = vld [vmem:[#allocation5 + $0x29c8] sm:$0xff] }
 0x2a5   :  { %5115 = vmatpush1.bf16.msra.mxu1 %v5114_v17  ;;  %v5136_v17 = vpack.c.bf16 %v1153_v47, %v1149_v46  ;;  %v1438_v46 = vld [vmem:[#allocation5 + $0x28a0] sm:$0xff]  ;;  %v1189_v47 = vld [vmem:[#allocation5 + $0x20d8] sm:$0xff]  ;;  %v1479_v36 = vld [vmem:[#allocation5 + $0x29e8] sm:$0xff] }
 0x2a6   :  { %5117 = vmatprep.subr.bf16.mxu1 %v5116_v54  ;;  %v1148_v54 = vld [vmem:[#allocation5 + $0x1f90] sm:$0xff]  ;;  %v1470_v32 = vld [vmem:[#allocation5 + $0x29a0] sm:$0xff]  ;;  %v1221_v33 = vld [vmem:[#allocation5 + $0x21d8] sm:$0xff] }
 0x2a7   :  { %4475 = vmatpush1.bf16.msra.mxu0 %v4474_v53  ;;  %v1402_v53 = vld [vmem:[#allocation5 + $0x2780] sm:$0xff]  ;;  %v5138_v61 = vpack.c.bf16 %v1152_v55, %v1148_v54  ;;  %v5156_v54 = vpack.c.bf16 %v1193_v49, %v1189_v47  ;;  %v1233_v47 = vld [vmem:[#allocation5 + $0x2238] sm:$0xff]  ;;  %v1483_v49 = vld [vmem:[#allocation5 + $0x2a08] sm:$0xff] }
 0x2a8   :  { %4477 = vmatprep.subr.bf16.mxu0 %v4476_v57  ;;  %v1157_v57 = vld [vmem:[#allocation5 + $0x1fd8] sm:$0xff]  ;;  %v4498_v62 = vpack.c.bf16 %v1406_v56, %v1402_v53  ;;  %v4514_v53 = vpack.c.bf16 %v1438_v46, %v1434_v41  ;;  %v1442_v55 = vld [vmem:[#allocation5 + $0x28c0] sm:$0xff]  ;;  %v1192_v56 = vld [vmem:[#allocation5 + $0x20f0] sm:$0xff] }
 0x2a9   :  { %5119 = vmatpush1.bf16.msra.mxu1 %v5118_v63  ;;  %v5140_v63 = vpack.c.bf16 %v1161_v58, %v1157_v57  ;;  %v1446_v58 = vld [vmem:[#allocation5 + $0x28e0] sm:$0xff]  ;;  %v1220_v41 = vld [vmem:[#allocation5 + $0x21d0] sm:$0xff]  ;;  %v1229_v46 = vld [vmem:[#allocation5 + $0x2218] sm:$0xff] }
 0x2aa   :  { %5121 = vmatprep.subr.bf16.mxu1 %v5120_v1  ;;  %v1156_v1 = vld [vmem:[#allocation5 + $0x1fd0] sm:$0xff] }
 0x2ab   :  { %4479 = vmatpush1.bf16.msra.mxu0 %v4478_v0  ;;  %v1410_v0 = vld [vmem:[#allocation5 + $0x27c0] sm:$0xff]  ;;  %v5142_v7 = vpack.c.bf16 %v1160_v19, %v1156_v1  ;;  %v5160_v1 = vpack.c.bf16 %v1201_v60, %v1197_v59  ;;  %v1491_v59 = vld [vmem:[#allocation5 + $0x2a48] sm:$0xff] }
 0x2ac   :  { %4481 = vmatprep.subr.bf16.mxu0 %v4480_v4  ;;  %v1165_v4 = vld [vmem:[#allocation5 + $0x2018] sm:$0xff]  ;;  %v4502_v8 = vpack.c.bf16 %v1414_v3, %v1410_v0  ;;  %v4518_v0 = vpack.c.bf16 %v1446_v58, %v1442_v55  ;;  %v1450_v19 = vld [vmem:[#allocation5 + $0x2900] sm:$0xff]  ;;  %v1200_v3 = vld [vmem:[#allocation5 + $0x2130] sm:$0xff] }
 0x2ad   :  { %5123 = vmatpush1.bf16.msra.mxu1 %v5122_v9  ;;  %v5144_v9 = vpack.c.bf16 %v1169_v5, %v1165_v4  ;;  %v1454_v5 = vld [vmem:[#allocation5 + $0x2920] sm:$0xff]  ;;  %v1232_v55 = vld [vmem:[#allocation5 + $0x2230] sm:$0xff]  ;;  %v1241_v58 = vld [vmem:[#allocation5 + $0x2278] sm:$0xff] }
 0x2ae   :  { %5125 = vmatprep.subr.bf16.mxu1 %v5124_v11  ;;  %v1164_v11 = vld [vmem:[#allocation5 + $0x2010] sm:$0xff]  ;;  %v1495_v60 = vld [vmem:[#allocation5 + $0x2a68] sm:$0xff] }
 0x2af   :  { %4483 = vmatpush1.bf16.msra.mxu0 %v4482_v10  ;;  %v1418_v10 = vld [vmem:[#allocation5 + $0x2800] sm:$0xff]  ;;  %v5146_v23 = vpack.c.bf16 %v1168_v12, %v1164_v11  ;;  %v5164_v11 = vpack.c.bf16 %v1209_v28, %v1205_v6  ;;  %v1499_v6 = vld [vmem:[#allocation5 + $0x2a88] sm:$0xff] }
 0x2b0   :  { %4485 = vmatprep.subr.bf16.mxu0 %v4484_v15  ;;  %v1173_v15 = vld [vmem:[#allocation5 + $0x2058] sm:$0xff]  ;;  %v1458_v12 = vld [vmem:[#allocation5 + $0x2940] sm:$0xff]  ;;  %v1503_v28 = vld [vmem:[#allocation5 + $0x2aa8] sm:$0xff] }
 0x2b1   :  { %5127 = vmatpush1.bf16.msra.mxu1 %v5126_v24  ;;  %v4506_v24 = vpack.c.bf16 %v1422_v14, %v1418_v10  ;;  %v4522_v10 = vpack.c.bf16 %v1454_v5, %v1450_v19  ;;  %v1208_v14 = vld [vmem:[#allocation5 + $0x2170] sm:$0xff]  ;;  %v1249_v5 = vld [vmem:[#allocation5 + $0x22b8] sm:$0xff] }
 0x2b2   :  { %5129 = vmatprep.subr.bf16.mxu1 %v5128_v26  ;;  %v1426_v26 = vld [vmem:[#allocation5 + $0x2840] sm:$0xff]  ;;  %v1240_v19 = vld [vmem:[#allocation5 + $0x2270] sm:$0xff] }
 0x2b3   :  { %4487 = vmatpush1.bf16.msra.mxu0 %v4486_v25  ;;  %v5148_v25 = vpack.c.bf16 %v1177_v18, %v1173_v15  ;;  %v1462_v18 = vld [vmem:[#allocation5 + $0x2960] sm:$0xff] }
 0x2b4   :  { %4489 = vmatprep.subr.bf16.mxu0 %v4488_v31  ;;  %v1430_v31 = vld [vmem:[#allocation5 + $0x2860] sm:$0xff] }
 0x2b5   :  { %5131 = vmatpush1.bf16.msra.mxu1 %v5130_v37  ;;  %v135_v37 = vld [vmem:[#allocation2 + $0xa8] sm:$0xff] }
 0x2b6   :  { %5133 = vmatprep.subr.bf16.mxu1 %v5132_v39  ;;  %v4510_v39 = vpack.c.bf16 %v1430_v31, %v1426_v26  ;;  %v5168_v26 = vpack.c.bf16 %v1217_v21, %v1213_v20  ;;  %v1507_v20 = vld [vmem:[#allocation5 + $0x2ac8] sm:$0xff] }
 0x2b7   :  { %4491 = vmatpush1.bf16.msra.mxu0 %v4490_v38  ;;  %v5150_v38 = vpack.c.bf16 %v1176_v29, %v1172_v27  ;;  %v1466_v27 = vld [vmem:[#allocation5 + $0x2980] sm:$0xff]  ;;  %v1212_v29 = vld [vmem:[#allocation5 + $0x2190] sm:$0xff]  ;;  %v1511_v21 = vld [vmem:[#allocation5 + $0x2ae8] sm:$0xff] }
 0x2b8   :  { %4493 = vmatprep.subr.bf16.mxu0 %v4492_v44  ;;  %v1184_v44 = vld [vmem:[#allocation5 + $0x20b0] sm:$0xff] }
 0x2b9   :  { %5135 = vmatpush1.bf16.msra.mxu1 %v5134_v51  ;;  %v1447_v51 = vld [vmem:[#allocation5 + $0x28e8] sm:$0xff] }
 0x2ba   :  { %5137 = vmatprep.subr.bf16.mxu1 %v5136_v17  ;;  %v5154_v17 = vpack.c.bf16 %v1184_v44, %v1180_v42  ;;  %v4516_v57 = vpack.c.bf16 %v1447_v51, %v1443_v50  ;;  %v1224_v42 = vld [vmem:[#allocation5 + $0x21f0] sm:$0xff]  ;;  %v4532_v44 = vpack.c.bf16 %v1479_v36, %v1475_v35  ;;  %v1487_v50 = vld [vmem:[#allocation5 + $0x2a28] sm:$0xff] }
 0x2bb   :  { %4495 = vmatpush1.bf16.msra.mxu0 %v4494_v52  ;;  %v5638_v52 = vld [vmem:[#allocation2 + $0x88] sm:$0xff]  ;;  %v5174_v51 = vpack.c.bf16 %v1224_v42, %v1220_v41  ;;  %v1518_v42 = vld [vmem:[#allocation5 + $0x2b20] sm:$0xff] }
 0x2bc   :  { %4497 = vmatprep.subr.bf16.mxu0 %v4496_v16  ;;  %v1188_v16 = vld [vmem:[#allocation5 + $0x20d0] sm:$0xff] }
 0x2bd   :  { %5139 = vmatpush1.bf16.msra.mxu1 %v5138_v61  ;;  %v1451_v61 = vld [vmem:[#allocation5 + $0x2908] sm:$0xff] }
 0x2be   :  { %5141 = vmatprep.subr.bf16.mxu1 %v5140_v63  ;;  %v5158_v63 = vpack.c.bf16 %v1192_v56, %v1188_v16  ;;  %v4536_v16 = vpack.c.bf16 %v1487_v50, %v1483_v49  ;;  %v1486_v56 = vld [vmem:[#allocation5 + $0x2a20] sm:$0xff] }
 0x2bf   :  { %4499 = vmatpush1.bf16.msra.mxu0 %v4498_v62  ;;  %v1455_v62 = vld [vmem:[#allocation5 + $0x2928] sm:$0xff] }
 0x2c0   :  { %4501 = vmatprep.subr.bf16.mxu0 %v4500_v2  ;;  %v1196_v2 = vld [vmem:[#allocation5 + $0x2110] sm:$0xff]  ;;  %v4520_v4 = vpack.c.bf16 %v1455_v62, %v1451_v61 }
 0x2c1   :  { %5143 = vmatpush1.bf16.msra.mxu1 %v5142_v7  ;;  %v1459_v7 = vld [vmem:[#allocation5 + $0x2948] sm:$0xff] }
 0x2c2   :  { %5145 = vmatprep.subr.bf16.mxu1 %v5144_v9  ;;  %v5162_v9 = vpack.c.bf16 %v1200_v3, %v1196_v2  ;;  %v4540_v2 = vpack.c.bf16 %v1495_v60, %v1491_v59  ;;  %v1494_v3 = vld [vmem:[#allocation5 + $0x2a60] sm:$0xff] }
 0x2c3   :  { %4503 = vmatpush1.bf16.msra.mxu0 %v4502_v8  ;;  %v1463_v8 = vld [vmem:[#allocation5 + $0x2968] sm:$0xff] }
 0x2c4   :  { %4505 = vmatprep.subr.bf16.mxu0 %v4504_v13  ;;  %3110 = vmatmul.mubr.f32.vlgmr.msra.gmra.mrb[2].mxu1 %v5637_v34  ;;  %v1204_v13 = vld [vmem:[#allocation5 + $0x2150] sm:$0xff]  ;;  %v4524_v15 = vpack.c.bf16 %v1463_v8, %v1459_v7  ;;  %v1225_v34 = vld [vmem:[#allocation5 + $0x21f8] sm:$0xff] }
 0x2c5   :  { %5147 = vmatpush1.bf16.msra.mxu1 %v5146_v23  ;;  %3180 = vmatprep.mubr.f32.mxu1 %v5638_v52  ;;  %v1471_v23 = vld [vmem:[#allocation5 + $0x29a8] sm:$0xff] }
 0x2c6   :  { %2400 = vmatmul.mubr.f32.vlgmr.msra.gmra.mrb[0].mxu0 %v132_v22  ;;  %5149 = vmatprep.subr.bf16.mxu1 %v5148_v25  ;;  %v1467_v22 = vld [vmem:[#allocation5 + $0x2988] sm:$0xff]  ;;  %v4526_v25 = vpack.c.bf16 %v1462_v18, %v1458_v12  ;;  %v1248_v12 = vld [vmem:[#allocation5 + $0x22b0] sm:$0xff]  ;;  %v1257_v18 = vld [vmem:[#allocation5 + $0x22f8] sm:$0xff] }
 0x2c7   :  { %4507 = vmatpush1.bf16.msra.mxu0 %v4506_v24  ;;  %2470 = vmatprep.mubr.f32.mxu0 %v135_v37  ;;  %v5166_v24 = vpack.c.bf16 %v1208_v14, %v1204_v13  ;;  %v4528_v31 = vpack.c.bf16 %v1471_v23, %v1467_v22  ;;  %v4544_v13 = vpack.c.bf16 %v1503_v28, %v1499_v6  ;;  %v1502_v14 = vld [vmem:[#allocation5 + $0x2aa0] sm:$0xff] }
 0x2c8   :  { %4509 = vmatprep.subr.bf16.mxu0 %v4508_v30  ;;  %v1216_v30 = vld [vmem:[#allocation5 + $0x21b0] sm:$0xff] }
 0x2c9   :  { %5151 = vmatpush1.bf16.msra.mxu1 %v5150_v38  ;;  %v5170_v37 = vpack.c.bf16 %v1216_v30, %v1212_v29  ;;  %v4530_v38 = vpack.c.bf16 %v1470_v32, %v1466_v27  ;;  %v1256_v27 = vld [vmem:[#allocation5 + $0x22f0] sm:$0xff]  ;;  %v4548_v29 = vpack.c.bf16 %v1511_v21, %v1507_v20  ;;  %v1510_v30 = vld [vmem:[#allocation5 + $0x2ae0] sm:$0xff]  ;;  %v1265_v32 = vld [vmem:[#allocation5 + $0x2338] sm:$0xff] }
 0x2ca   :  { %5153 = vmatprep.subr.bf16.mxu1 %v5152_v40  ;;  %v1474_v40 = vld [vmem:[#allocation5 + $0x29c0] sm:$0xff] }
 0x2cb   :  { %4511 = vmatpush1.bf16.msra.mxu0 %v4510_v39  ;;  %v5172_v39 = vpack.c.bf16 %v1225_v34, %v1221_v33  ;;  %v1515_v33 = vld [vmem:[#allocation5 + $0x2b08] sm:$0xff] }
 0x2cc   :  { %4513 = vmatprep.subr.bf16.mxu0 %v4512_v45  ;;  %v1478_v45 = vld [vmem:[#allocation5 + $0x29e0] sm:$0xff]  ;;  %v1519_v34 = vld [vmem:[#allocation5 + $0x2b28] sm:$0xff] }
 0x2cd   :  { %5155 = vmatpush1.bf16.msra.mxu1 %v5154_v17  ;;  %v4534_v52 = vpack.c.bf16 %v1478_v45, %v1474_v40  ;;  %v5176_v17 = vpack.c.bf16 %v1233_v47, %v1229_v46  ;;  %v1264_v40 = vld [vmem:[#allocation5 + $0x2330] sm:$0xff]  ;;  %v4552_v41 = vpack.c.bf16 %v1519_v34, %v1515_v33  ;;  %v1273_v45 = vld [vmem:[#allocation5 + $0x2378] sm:$0xff]  ;;  %v1523_v46 = vld [vmem:[#allocation5 + $0x2b48] sm:$0xff] }
 0x2ce   :  { %5157 = vmatprep.subr.bf16.mxu1 %v5156_v54  ;;  %v1228_v54 = vld [vmem:[#allocation5 + $0x2210] sm:$0xff]  ;;  %v1527_v47 = vld [vmem:[#allocation5 + $0x2b68] sm:$0xff]  ;;  %v5987_v33 = vld [vmem:[#allocation2 + $0xa0] sm:$0xff] }
 0x2cf   :  { %4515 = vmatpush1.bf16.msra.mxu0 %v4514_v53  ;;  %v1482_v53 = vld [vmem:[#allocation5 + $0x2a00] sm:$0xff]  ;;  %v5178_v61 = vpack.c.bf16 %v1232_v55, %v1228_v54  ;;  %v4556_v54 = vpack.c.bf16 %v1527_v47, %v1523_v46  ;;  %v1563_v46 = vld [vmem:[#allocation5 + $0x2c88] sm:$0xff] }
 0x2d0   :  { %4517 = vmatprep.subr.bf16.mxu0 %v4516_v57  ;;  %v1237_v57 = vld [vmem:[#allocation5 + $0x2258] sm:$0xff]  ;;  %v4538_v62 = vpack.c.bf16 %v1486_v56, %v1482_v53  ;;  %v1272_v53 = vld [vmem:[#allocation5 + $0x2370] sm:$0xff]  ;;  %v1526_v55 = vld [vmem:[#allocation5 + $0x2b60] sm:$0xff] }
 0x2d1   :  { %5159 = vmatpush1.bf16.msra.mxu1 %v5158_v63  ;;  %v5180_v63 = vpack.c.bf16 %v1241_v58, %v1237_v57  ;;  %v1281_v56 = vld [vmem:[#allocation5 + $0x23b8] sm:$0xff]  ;;  %v1531_v57 = vld [vmem:[#allocation5 + $0x2b88] sm:$0xff] }
 0x2d2   :  { %5161 = vmatprep.subr.bf16.mxu1 %v5160_v1  ;;  %v1236_v1 = vld [vmem:[#allocation5 + $0x2250] sm:$0xff]  ;;  %v1535_v58 = vld [vmem:[#allocation5 + $0x2ba8] sm:$0xff] }
 0x2d3   :  { %4519 = vmatpush1.bf16.msra.mxu0 %v4518_v0  ;;  %v1490_v0 = vld [vmem:[#allocation5 + $0x2a40] sm:$0xff]  ;;  %v5182_v7 = vpack.c.bf16 %v1240_v19, %v1236_v1  ;;  %v4560_v1 = vpack.c.bf16 %v1535_v58, %v1531_v57  ;;  %v1567_v47 = vld [vmem:[#allocation5 + $0x2ca8] sm:$0xff]  ;;  %v1321_v57 = vld [vmem:[#allocation5 + $0x24f8] sm:$0xff] }
 0x2d4   :  { %4521 = vmatprep.subr.bf16.mxu0 %v4520_v4  ;;  %v1245_v4 = vld [vmem:[#allocation5 + $0x2298] sm:$0xff]  ;;  %v4542_v8 = vpack.c.bf16 %v1494_v3, %v1490_v0  ;;  %v1280_v0 = vld [vmem:[#allocation5 + $0x23b0] sm:$0xff]  ;;  %v1534_v19 = vld [vmem:[#allocation5 + $0x2ba0] sm:$0xff] }
 0x2d5   :  { %5163 = vmatpush1.bf16.msra.mxu1 %v5162_v9  ;;  %v5184_v9 = vpack.c.bf16 %v1249_v5, %v1245_v4  ;;  %v1289_v3 = vld [vmem:[#allocation5 + $0x23f8] sm:$0xff]  ;;  %v1539_v4 = vld [vmem:[#allocation5 + $0x2bc8] sm:$0xff] }
 0x2d6   :  { %5165 = vmatprep.subr.bf16.mxu1 %v5164_v11  ;;  %v1244_v11 = vld [vmem:[#allocation5 + $0x2290] sm:$0xff]  ;;  %v1543_v5 = vld [vmem:[#allocation5 + $0x2be8] sm:$0xff] }
 0x2d7   :  { %4523 = vmatpush1.bf16.msra.mxu0 %v4522_v10  ;;  %v1498_v10 = vld [vmem:[#allocation5 + $0x2a80] sm:$0xff]  ;;  %v5186_v22 = vpack.c.bf16 %v1248_v12, %v1244_v11  ;;  %v4564_v11 = vpack.c.bf16 %v1543_v5, %v1539_v4  ;;  %v1571_v58 = vld [vmem:[#allocation5 + $0x2cc8] sm:$0xff]  ;;  %v1325_v4 = vld [vmem:[#allocation5 + $0x2518] sm:$0xff] }
 0x2d8   :  { %4525 = vmatprep.subr.bf16.mxu0 %v4524_v15  ;;  %v1253_v15 = vld [vmem:[#allocation5 + $0x22d8] sm:$0xff]  ;;  %v4546_v23 = vpack.c.bf16 %v1502_v14, %v1498_v10  ;;  %v1288_v10 = vld [vmem:[#allocation5 + $0x23f0] sm:$0xff]  ;;  %v1542_v12 = vld [vmem:[#allocation5 + $0x2be0] sm:$0xff] }
 0x2d9   :  { %5167 = vmatpush1.bf16.msra.mxu1 %v5166_v24  ;;  %v5188_v24 = vpack.c.bf16 %v1257_v18, %v1253_v15  ;;  %v1297_v14 = vld [vmem:[#allocation5 + $0x2438] sm:$0xff]  ;;  %v1547_v15 = vld [vmem:[#allocation5 + $0x2c08] sm:$0xff] }
 0x2da   :  { %5169 = vmatprep.subr.bf16.mxu1 %v5168_v26  ;;  %v1252_v26 = vld [vmem:[#allocation5 + $0x22d0] sm:$0xff]  ;;  %v1551_v18 = vld [vmem:[#allocation5 + $0x2c28] sm:$0xff]  ;;  %v1329_v5 = vld [vmem:[#allocation5 + $0x2538] sm:$0xff] }
 0x2db   :  { %4527 = vmatpush1.bf16.msra.mxu0 %v4526_v25  ;;  %v1506_v25 = vld [vmem:[#allocation5 + $0x2ac0] sm:$0xff]  ;;  %v5190_v35 = vpack.c.bf16 %v1256_v27, %v1252_v26  ;;  %v4568_v26 = vpack.c.bf16 %v1551_v18, %v1547_v15  ;;  %v1333_v15 = vld [vmem:[#allocation5 + $0x2558] sm:$0xff] }
 0x2dc   :  { %4529 = vmatprep.subr.bf16.mxu0 %v4528_v31  ;;  %v1261_v31 = vld [vmem:[#allocation5 + $0x2318] sm:$0xff]  ;;  %v4550_v36 = vpack.c.bf16 %v1510_v30, %v1506_v25  ;;  %v1296_v25 = vld [vmem:[#allocation5 + $0x2430] sm:$0xff]  ;;  %v1550_v27 = vld [vmem:[#allocation5 + $0x2c20] sm:$0xff] }
 0x2dd   :  { %5171 = vmatpush1.bf16.msra.mxu1 %v5170_v37  ;;  %v5192_v37 = vpack.c.bf16 %v1265_v32, %v1261_v31  ;;  %v1305_v30 = vld [vmem:[#allocation5 + $0x2478] sm:$0xff]  ;;  %v1555_v31 = vld [vmem:[#allocation5 + $0x2c48] sm:$0xff] }
 0x2de   :  { %5173 = vmatprep.subr.bf16.mxu1 %v5172_v39  ;;  %v1260_v39 = vld [vmem:[#allocation5 + $0x2310] sm:$0xff]  ;;  %v1559_v32 = vld [vmem:[#allocation5 + $0x2c68] sm:$0xff]  ;;  %v1337_v18 = vld [vmem:[#allocation5 + $0x2578] sm:$0xff] }
 0x2df   :  { %4531 = vmatpush1.bf16.msra.mxu0 %v4530_v38  ;;  %v1514_v38 = vld [vmem:[#allocation5 + $0x2b00] sm:$0xff]  ;;  %v5194_v49 = vpack.c.bf16 %v1264_v40, %v1260_v39  ;;  %v1304_v39 = vld [vmem:[#allocation5 + $0x2470] sm:$0xff]  ;;  %v4572_v40 = vpack.c.bf16 %v1559_v32, %v1555_v31  ;;  %v1341_v31 = vld [vmem:[#allocation5 + $0x2598] sm:$0xff] }
 0x2e0   :  { %4533 = vmatprep.subr.bf16.mxu0 %v4532_v44  ;;  %v1269_v44 = vld [vmem:[#allocation5 + $0x2358] sm:$0xff]  ;;  %v4554_v50 = vpack.c.bf16 %v1518_v42, %v1514_v38  ;;  %v1300_v38 = vld [vmem:[#allocation5 + $0x2450] sm:$0xff] }
 0x2e1   :  { %5175 = vmatpush1.bf16.msra.mxu1 %v5174_v51  ;;  %v5196_v51 = vpack.c.bf16 %v1273_v45, %v1269_v44  ;;  %v1309_v42 = vld [vmem:[#allocation5 + $0x2498] sm:$0xff]  ;;  %v5639_v45 = vld [vmem:[#allocation2 + $0x80] sm:$0xff] }
 0x2e2   :  { %5177 = vmatprep.subr.bf16.mxu1 %v5176_v17  ;;  %v1268_v17 = vld [vmem:[#allocation5 + $0x2350] sm:$0xff]  ;;  %v1313_v44 = vld [vmem:[#allocation5 + $0x24b8] sm:$0xff] }
 0x2e3   :  { %4535 = vmatpush1.bf16.msra.mxu0 %v4534_v52  ;;  %v1522_v52 = vld [vmem:[#allocation5 + $0x2b40] sm:$0xff]  ;;  %v5198_v59 = vpack.c.bf16 %v1272_v53, %v1268_v17  ;;  %v1308_v53 = vld [vmem:[#allocation5 + $0x2490] sm:$0xff]  ;;  %v1345_v32 = vld [vmem:[#allocation5 + $0x25b8] sm:$0xff] }
 0x2e4   :  { %4537 = vmatprep.subr.bf16.mxu0 %v4536_v16  ;;  %v1277_v16 = vld [vmem:[#allocation5 + $0x2398] sm:$0xff]  ;;  %v4558_v60 = vpack.c.bf16 %v1526_v55, %v1522_v52  ;;  %v5216_v52 = vpack.c.bf16 %v1313_v44, %v1309_v42  ;;  %v1562_v17 = vld [vmem:[#allocation5 + $0x2c80] sm:$0xff]  ;;  %v4576_v55 = vpack.c.bf16 %v1567_v47, %v1563_v46  ;;  %v1603_v47 = vld [vmem:[#allocation5 + $0x2dc8] sm:$0xff] }
 0x2e5   :  { %5179 = vmatpush1.bf16.msra.mxu1 %v5178_v61  ;;  %v5200_v61 = vpack.c.bf16 %v1281_v56, %v1277_v16  ;;  %v1566_v16 = vld [vmem:[#allocation5 + $0x2ca0] sm:$0xff]  ;;  %v1317_v56 = vld [vmem:[#allocation5 + $0x24d8] sm:$0xff] }
 0x2e6   :  { %5181 = vmatprep.subr.bf16.mxu1 %v5180_v63  ;;  %v1276_v63 = vld [vmem:[#allocation5 + $0x2390] sm:$0xff]  ;;  %v1598_v44 = vld [vmem:[#allocation5 + $0x2da0] sm:$0xff]  ;;  %v1353_v46 = vld [vmem:[#allocation5 + $0x25f8] sm:$0xff] }
 0x2e7   :  { %4539 = vmatpush1.bf16.msra.mxu0 %v4538_v62  ;;  %v1530_v62 = vld [vmem:[#allocation5 + $0x2b80] sm:$0xff]  ;;  %v5202_v6 = vpack.c.bf16 %v1280_v0, %v1276_v63  ;;  %v5220_v63 = vpack.c.bf16 %v1321_v57, %v1317_v56  ;;  %v1357_v57 = vld [vmem:[#allocation5 + $0x2618] sm:$0xff] }
 0x2e8   :  { %4541 = vmatprep.subr.bf16.mxu0 %v4540_v2  ;;  %v1285_v2 = vld [vmem:[#allocation5 + $0x23d8] sm:$0xff]  ;;  %v4562_v28 = vpack.c.bf16 %v1534_v19, %v1530_v62  ;;  %v4578_v62 = vpack.c.bf16 %v1566_v16, %v1562_v17  ;;  %v1570_v0 = vld [vmem:[#allocation5 + $0x2cc0] sm:$0xff]  ;;  %v1320_v19 = vld [vmem:[#allocation5 + $0x24f0] sm:$0xff] }
 0x2e9   :  { %5183 = vmatpush1.bf16.msra.mxu1 %v5182_v7  ;;  %v5204_v7 = vpack.c.bf16 %v1289_v3, %v1285_v2  ;;  %v1574_v3 = vld [vmem:[#allocation5 + $0x2ce0] sm:$0xff] }
 0x2ea   :  { %5185 = vmatprep.subr.bf16.mxu1 %v5184_v9  ;;  %v1284_v9 = vld [vmem:[#allocation5 + $0x23d0] sm:$0xff]  ;;  %v1606_v56 = vld [vmem:[#allocation5 + $0x2de0] sm:$0xff] }
 0x2eb   :  { %4543 = vmatpush1.bf16.msra.mxu0 %v4542_v8  ;;  %v1538_v8 = vld [vmem:[#allocation5 + $0x2bc0] sm:$0xff]  ;;  %v5206_v20 = vpack.c.bf16 %v1288_v10, %v1284_v9  ;;  %v5224_v9 = vpack.c.bf16 %v1329_v5, %v1325_v4  ;;  %v1365_v4 = vld [vmem:[#allocation5 + $0x2658] sm:$0xff] }
 0x2ec   :  { %4545 = vmatprep.subr.bf16.mxu0 %v4544_v13  ;;  %v1293_v13 = vld [vmem:[#allocation5 + $0x2418] sm:$0xff]  ;;  %v4566_v21 = vpack.c.bf16 %v1542_v12, %v1538_v8  ;;  %v4582_v8 = vpack.c.bf16 %v1574_v3, %v1570_v0  ;;  %v1578_v10 = vld [vmem:[#allocation5 + $0x2d00] sm:$0xff]  ;;  %v1328_v12 = vld [vmem:[#allocation5 + $0x2530] sm:$0xff] }
 0x2ed   :  { %5187 = vmatpush1.bf16.msra.mxu1 %v5186_v22  ;;  %v5208_v22 = vpack.c.bf16 %v1297_v14, %v1293_v13  ;;  %v1582_v14 = vld [vmem:[#allocation5 + $0x2d20] sm:$0xff]  ;;  %v1369_v5 = vld [vmem:[#allocation5 + $0x2678] sm:$0xff] }
 0x2ee   :  { %5189 = vmatprep.subr.bf16.mxu1 %v5188_v24  ;;  %v1292_v24 = vld [vmem:[#allocation5 + $0x2410] sm:$0xff]  ;;  %v1610_v0 = vld [vmem:[#allocation5 + $0x2e00] sm:$0xff] }
 0x2ef   :  { %4547 = vmatpush1.bf16.msra.mxu0 %v4546_v23  ;;  %v1546_v23 = vld [vmem:[#allocation5 + $0x2c00] sm:$0xff]  ;;  %v5210_v34 = vpack.c.bf16 %v1296_v25, %v1292_v24  ;;  %v5228_v24 = vpack.c.bf16 %v1337_v18, %v1333_v15  ;;  %v1373_v15 = vld [vmem:[#allocation5 + $0x2698] sm:$0xff] }
 0x2f0   :  { %4549 = vmatprep.subr.bf16.mxu0 %v4548_v29  ;;  %v1301_v29 = vld [vmem:[#allocation5 + $0x2458] sm:$0xff]  ;;  %v1586_v25 = vld [vmem:[#allocation5 + $0x2d40] sm:$0xff] }
 0x2f1   :  { %5191 = vmatpush1.bf16.msra.mxu1 %v5190_v35  ;;  %v4570_v35 = vpack.c.bf16 %v1550_v27, %v1546_v23  ;;  %v4586_v23 = vpack.c.bf16 %v1582_v14, %v1578_v10  ;;  %v1336_v27 = vld [vmem:[#allocation5 + $0x2570] sm:$0xff]  ;;  %v1614_v3 = vld [vmem:[#allocation5 + $0x2e20] sm:$0xff]  ;;  %v1377_v18 = vld [vmem:[#allocation5 + $0x26b8] sm:$0xff] }
 0x2f2   :  { %5193 = vmatprep.subr.bf16.mxu1 %v5192_v37  ;;  %v1554_v37 = vld [vmem:[#allocation5 + $0x2c40] sm:$0xff] }
 0x2f3   :  { %4551 = vmatpush1.bf16.msra.mxu0 %v4550_v36  ;;  %v5212_v36 = vpack.c.bf16 %v1305_v30, %v1301_v29  ;;  %v1590_v30 = vld [vmem:[#allocation5 + $0x2d60] sm:$0xff] }
 0x2f4   :  { %4553 = vmatprep.subr.bf16.mxu0 %v4552_v41  ;;  %v1558_v41 = vld [vmem:[#allocation5 + $0x2c60] sm:$0xff] }
 0x2f5   :  { %5195 = vmatpush1.bf16.msra.mxu1 %v5194_v49  ;;  %v5989_v49 = vld [vmem:[#allocation2 + $0xb8] sm:$0xff]  ;;  %v1618_v10 = vld [vmem:[#allocation5 + $0x2e40] sm:$0xff] }
 0x2f6   :  { %5197 = vmatprep.subr.bf16.mxu1 %v5196_v51  ;;  %v4574_v51 = vpack.c.bf16 %v1558_v41, %v1554_v37  ;;  %v4590_v37 = vpack.c.bf16 %v1590_v30, %v1586_v25  ;;  %v1344_v41 = vld [vmem:[#allocation5 + $0x25b0] sm:$0xff]  ;;  %v1622_v14 = vld [vmem:[#allocation5 + $0x2e60] sm:$0xff] }
 0x2f7   :  { %4555 = vmatpush1.bf16.msra.mxu0 %v4554_v50  ;;  %v5214_v50 = vpack.c.bf16 %v1304_v39, %v1300_v38  ;;  %v5232_v38 = vpack.c.bf16 %v1345_v32, %v1341_v31  ;;  %v1594_v39 = vld [vmem:[#allocation5 + $0x2d80] sm:$0xff]  ;;  %v1381_v31 = vld [vmem:[#allocation5 + $0x26d8] sm:$0xff] }
 0x2f8   :  { %4557 = vmatprep.subr.bf16.mxu0 %v4556_v54  ;;  %v1312_v54 = vld [vmem:[#allocation5 + $0x24b0] sm:$0xff]  ;;  %v1626_v25 = vld [vmem:[#allocation5 + $0x2e80] sm:$0xff]  ;;  %v1385_v32 = vld [vmem:[#allocation5 + $0x26f8] sm:$0xff] }
 0x2f9   :  { %5199 = vmatpush1.bf16.msra.mxu1 %v5198_v59  ;;  %v1575_v59 = vld [vmem:[#allocation5 + $0x2ce8] sm:$0xff]  ;;  %v1630_v30 = vld [vmem:[#allocation5 + $0x2ea0] sm:$0xff] }
 0x2fa   :  { %5201 = vmatprep.subr.bf16.mxu1 %v5200_v61  ;;  %v5218_v61 = vpack.c.bf16 %v1312_v54, %v1308_v53  ;;  %v4580_v2 = vpack.c.bf16 %v1575_v59, %v1571_v58  ;;  %v1602_v53 = vld [vmem:[#allocation5 + $0x2dc0] sm:$0xff]  ;;  %v1348_v54 = vld [vmem:[#allocation5 + $0x25d0] sm:$0xff]  ;;  %v1361_v58 = vld [vmem:[#allocation5 + $0x2638] sm:$0xff] }
 0x2fb   :  { %4559 = vmatpush1.bf16.msra.mxu0 %v4558_v60  ;;  %v5640_v60 = vld [vmem:[#allocation2 + $0x98] sm:$0xff]  ;;  %v1611_v59 = vld [vmem:[#allocation5 + $0x2e08] sm:$0xff] }
 0x2fc   :  { %4561 = vmatprep.subr.bf16.mxu0 %v4560_v1  ;;  %v1316_v1 = vld [vmem:[#allocation5 + $0x24d0] sm:$0xff] }
 0x2fd   :  { %5203 = vmatpush1.bf16.msra.mxu1 %v5202_v6  ;;  %v1579_v6 = vld [vmem:[#allocation5 + $0x2d08] sm:$0xff] }
 0x2fe   :  { %5205 = vmatprep.subr.bf16.mxu1 %v5204_v7  ;;  %v5222_v7 = vpack.c.bf16 %v1320_v19, %v1316_v1  ;;  %v1356_v1 = vld [vmem:[#allocation5 + $0x2610] sm:$0xff] }
 0x2ff   :  { %4563 = vmatpush1.bf16.msra.mxu0 %v4562_v28  ;;  %v1583_v28 = vld [vmem:[#allocation5 + $0x2d28] sm:$0xff]  ;;  %v1360_v19 = vld [vmem:[#allocation5 + $0x2630] sm:$0xff] }
 0x300   :  { %4565 = vmatprep.subr.bf16.mxu0 %v4564_v11  ;;  %v1324_v11 = vld [vmem:[#allocation5 + $0x2510] sm:$0xff]  ;;  %v4584_v13 = vpack.c.bf16 %v1583_v28, %v1579_v6  ;;  %v1619_v6 = vld [vmem:[#allocation5 + $0x2e48] sm:$0xff] }
 0x301   :  { %5207 = vmatpush1.bf16.msra.mxu1 %v5206_v20  ;;  %v1587_v20 = vld [vmem:[#allocation5 + $0x2d48] sm:$0xff] }
 0x302   :  { %5209 = vmatprep.subr.bf16.mxu1 %v5208_v22  ;;  %v5226_v22 = vpack.c.bf16 %v1328_v12, %v1324_v11  ;;  %v1623_v28 = vld [vmem:[#allocation5 + $0x2e68] sm:$0xff]  ;;  %v1364_v11 = vld [vmem:[#allocation5 + $0x2650] sm:$0xff] }
 0x303   :  { %4567 = vmatpush1.bf16.msra.mxu0 %v4566_v21  ;;  %v1591_v21 = vld [vmem:[#allocation5 + $0x2d68] sm:$0xff]  ;;  %v1368_v12 = vld [vmem:[#allocation5 + $0x2670] sm:$0xff] }
 0x304   :  { %4569 = vmatprep.subr.bf16.mxu0 %v4568_v26  ;;  %3181 = vmatmul.mubr.f32.vlgmr.msra.gmra.mrb[2].mxu1 %v5639_v45  ;;  %v1332_v26 = vld [vmem:[#allocation5 + $0x2550] sm:$0xff]  ;;  %v4588_v29 = vpack.c.bf16 %v1591_v21, %v1587_v20  ;;  %v1349_v45 = vld [vmem:[#allocation5 + $0x25d8] sm:$0xff]  ;;  %v1627_v20 = vld [vmem:[#allocation5 + $0x2e88] sm:$0xff] }
 0x305   :  { %5211 = vmatpush1.bf16.msra.mxu1 %v5210_v34  ;;  %3251 = vmatprep.mubr.f32.mxu1 %v5640_v60  ;;  %v1595_v34 = vld [vmem:[#allocation5 + $0x2d88] sm:$0xff]  ;;  %v5236_v17 = vpack.c.bf16 %v1353_v46, %v1349_v45  ;;  %v1389_v45 = vld [vmem:[#allocation5 + $0x2718] sm:$0xff] }
 0x306   :  { %2471 = vmatmul.mubr.f32.vlgmr.msra.gmra.mrb[0].mxu0 %v5987_v33  ;;  %5213 = vmatprep.subr.bf16.mxu1 %v5212_v36  ;;  %v5230_v36 = vpack.c.bf16 %v1336_v27, %v1332_v26  ;;  %v1615_v60 = vld [vmem:[#allocation5 + $0x2e28] sm:$0xff]  ;;  %v1372_v26 = vld [vmem:[#allocation5 + $0x2690] sm:$0xff]  ;;  %v1393_v46 = vld [vmem:[#allocation5 + $0x2738] sm:$0xff] }
 0x307   :  { %4571 = vmatpush1.bf16.msra.mxu0 %v4570_v35  ;;  %2541 = vmatprep.mubr.f32.mxu0 %v5989_v49  ;;  %v1599_v35 = vld [vmem:[#allocation5 + $0x2da8] sm:$0xff]  ;;  %v1376_v27 = vld [vmem:[#allocation5 + $0x26b0] sm:$0xff] }
 0x308   :  { %4573 = vmatprep.subr.bf16.mxu0 %v4572_v40  ;;  %v1340_v40 = vld [vmem:[#allocation5 + $0x2590] sm:$0xff]  ;;  %v4592_v42 = vpack.c.bf16 %v1599_v35, %v1595_v34  ;;  %v1631_v21 = vld [vmem:[#allocation5 + $0x2ea8] sm:$0xff] }
 0x309   :  { %5215 = vmatpush1.bf16.msra.mxu1 %v5214_v50  ;;  %v1607_v50 = vld [vmem:[#allocation5 + $0x2de8] sm:$0xff] }
 0x30a   :  { %5217 = vmatprep.subr.bf16.mxu1 %v5216_v52  ;;  %v4594_v52 = vpack.c.bf16 %v1598_v44, %v1594_v39  ;;  %v4596_v16 = vpack.c.bf16 %v1607_v50, %v1603_v47  ;;  %v1635_v34 = vld [vmem:[#allocation5 + $0x2ec8] sm:$0xff]  ;;  %v1634_v39 = vld [vmem:[#allocation5 + $0x2ec0] sm:$0xff] }
 0x30b   :  { %4575 = vmatpush1.bf16.msra.mxu0 %v4574_v51  ;;  %v5234_v51 = vpack.c.bf16 %v1344_v41, %v1340_v40  ;;  %v1639_v35 = vld [vmem:[#allocation5 + $0x2ee8] sm:$0xff]  ;;  %v1380_v40 = vld [vmem:[#allocation5 + $0x26d0] sm:$0xff]  ;;  %v1638_v44 = vld [vmem:[#allocation5 + $0x2ee0] sm:$0xff] }
 0x30c   :  { %4577 = vmatprep.subr.bf16.mxu0 %v4576_v55  ;;  %v1352_v55 = vld [vmem:[#allocation5 + $0x25f0] sm:$0xff]  ;;  %v1643_v47 = vld [vmem:[#allocation5 + $0x2f08] sm:$0xff] }
 0x30d   :  { %5219 = vmatpush1.bf16.msra.mxu1 %v5218_v61  ;;  %v5238_v61 = vpack.c.bf16 %v1352_v55, %v1348_v54  ;;  %v1384_v41 = vld [vmem:[#allocation5 + $0x26f0] sm:$0xff]  ;;  %v1647_v50 = vld [vmem:[#allocation5 + $0x2f28] sm:$0xff] }
 0x30e   :  { %5221 = vmatprep.subr.bf16.mxu1 %v5220_v63  ;;  %v5240_v63 = vpack.c.bf16 %v1361_v58, %v1357_v57  ;;  %v1388_v54 = vld [vmem:[#allocation5 + $0x2710] sm:$0xff]  ;;  %v1397_v57 = vld [vmem:[#allocation5 + $0x2758] sm:$0xff] }
 0x30f   :  { %4579 = vmatpush1.bf16.msra.mxu0 %v4578_v62  ;;  %v4598_v62 = vpack.c.bf16 %v1606_v56, %v1602_v53  ;;  %v1642_v53 = vld [vmem:[#allocation5 + $0x2f00] sm:$0xff]  ;;  %v1392_v55 = vld [vmem:[#allocation5 + $0x2730] sm:$0xff]  ;;  %v1401_v58 = vld [vmem:[#allocation5 + $0x2778] sm:$0xff] }
 0x310   :  { %4581 = vmatprep.subr.bf16.mxu0 %v4580_v2  ;;  %v4600_v2 = vpack.c.bf16 %v1615_v60, %v1611_v59  ;;  %v1646_v56 = vld [vmem:[#allocation5 + $0x2f20] sm:$0xff]  ;;  %v1651_v59 = vld [vmem:[#allocation5 + $0x2f48] sm:$0xff] }
 0x311   :  { %5223 = vmatpush1.bf16.msra.mxu1 %v5222_v7  ;;  %v5242_v7 = vpack.c.bf16 %v1360_v19, %v1356_v1  ;;  %v1655_v60 = vld [vmem:[#allocation5 + $0x2f68] sm:$0xff]  ;;  %v1396_v1 = vld [vmem:[#allocation5 + $0x2750] sm:$0xff] }
 0x312   :  { %5225 = vmatprep.subr.bf16.mxu1 %v5224_v9  ;;  %v5244_v9 = vpack.c.bf16 %v1369_v5, %v1365_v4  ;;  %v1400_v19 = vld [vmem:[#allocation5 + $0x2770] sm:$0xff]  ;;  %v1405_v4 = vld [vmem:[#allocation5 + $0x2798] sm:$0xff] }
 0x313   :  { %4583 = vmatpush1.bf16.msra.mxu0 %v4582_v8  ;;  %v4602_v8 = vpack.c.bf16 %v1614_v3, %v1610_v0  ;;  %v1650_v0 = vld [vmem:[#allocation5 + $0x2f40] sm:$0xff]  ;;  %v1409_v5 = vld [vmem:[#allocation5 + $0x27b8] sm:$0xff] }
 0x314   :  { %4585 = vmatprep.subr.bf16.mxu0 %v4584_v13  ;;  %v4604_v13 = vpack.c.bf16 %v1623_v28, %v1619_v6  ;;  %v1654_v3 = vld [vmem:[#allocation5 + $0x2f60] sm:$0xff]  ;;  %v1659_v6 = vld [vmem:[#allocation5 + $0x2f88] sm:$0xff] }
 0x315   :  { %5227 = vmatpush1.bf16.msra.mxu1 %v5226_v22  ;;  %v5246_v22 = vpack.c.bf16 %v1368_v12, %v1364_v11  ;;  %v1663_v28 = vld [vmem:[#allocation5 + $0x2fa8] sm:$0xff]  ;;  %v1404_v11 = vld [vmem:[#allocation5 + $0x2790] sm:$0xff] }
 0x316   :  { %5229 = vmatprep.subr.bf16.mxu1 %v5228_v24  ;;  %v5248_v24 = vpack.c.bf16 %v1377_v18, %v1373_v15  ;;  %v1408_v12 = vld [vmem:[#allocation5 + $0x27b0] sm:$0xff]  ;;  %v1413_v15 = vld [vmem:[#allocation5 + $0x27d8] sm:$0xff] }
 0x317   :  { %4587 = vmatpush1.bf16.msra.mxu0 %v4586_v23  ;;  %v4606_v23 = vpack.c.bf16 %v1622_v14, %v1618_v10  ;;  %v1658_v10 = vld [vmem:[#allocation5 + $0x2f80] sm:$0xff]  ;;  %v1417_v18 = vld [vmem:[#allocation5 + $0x27f8] sm:$0xff] }
 0x318   :  { %4589 = vmatprep.subr.bf16.mxu0 %v4588_v29  ;;  %v4608_v29 = vpack.c.bf16 %v1631_v21, %v1627_v20  ;;  %v1662_v14 = vld [vmem:[#allocation5 + $0x2fa0] sm:$0xff]  ;;  %v1667_v20 = vld [vmem:[#allocation5 + $0x2fc8] sm:$0xff] }
 0x319   :  { %5231 = vmatpush1.bf16.msra.mxu1 %v5230_v36  ;;  %v5250_v36 = vpack.c.bf16 %v1376_v27, %v1372_v26  ;;  %v1671_v21 = vld [vmem:[#allocation5 + $0x2fe8] sm:$0xff]  ;;  %v1412_v26 = vld [vmem:[#allocation5 + $0x27d0] sm:$0xff] }
 0x31a   :  { %5233 = vmatprep.subr.bf16.mxu1 %v5232_v38  ;;  %v5252_v38 = vpack.c.bf16 %v1385_v32, %v1381_v31  ;;  %v1416_v27 = vld [vmem:[#allocation5 + $0x27f0] sm:$0xff]  ;;  %v1421_v31 = vld [vmem:[#allocation5 + $0x2818] sm:$0xff] }
 0x31b   :  { %4591 = vmatpush1.bf16.msra.mxu0 %v4590_v37  ;;  %v4610_v37 = vpack.c.bf16 %v1630_v30, %v1626_v25  ;;  %v1666_v25 = vld [vmem:[#allocation5 + $0x2fc0] sm:$0xff]  ;;  %v1425_v32 = vld [vmem:[#allocation5 + $0x2838] sm:$0xff] }
 0x31c   :  { %4593 = vmatprep.subr.bf16.mxu0 %v4592_v42  ;;  %v4612_v42 = vpack.c.bf16 %v1639_v35, %v1635_v34  ;;  %v1670_v30 = vld [vmem:[#allocation5 + $0x2fe0] sm:$0xff]  ;;  %v5270_v34 = vpack.c.bf16 %v1416_v27, %v1412_v26  ;;  %v1456_v26 = vld [vmem:[#allocation5 + $0x2930] sm:$0xff] }
 0x31d   :  { %5235 = vmatpush1.bf16.msra.mxu1 %v5234_v51  ;;  %v5254_v51 = vpack.c.bf16 %v1384_v41, %v1380_v40  ;;  %v4630_v35 = vpack.c.bf16 %v1670_v30, %v1666_v25  ;;  %v1433_v40 = vld [vmem:[#allocation5 + $0x2878] sm:$0xff]  ;;  %v3429_v27 = vld [vmem:[#allocation8 + $0x88] sm:$0xff] }
 0x31e   :  { %5237 = vmatprep.subr.bf16.mxu1 %v5236_v17  ;;  %v5256_v17 = vpack.c.bf16 %v1393_v46, %v1389_v45  ;;  %v1428_v45 = vld [vmem:[#allocation5 + $0x2850] sm:$0xff]  ;;  %v1461_v30 = vld [vmem:[#allocation5 + $0x2958] sm:$0xff] }
 0x31f   :  { %4595 = vmatpush1.bf16.msra.mxu0 %v4594_v52  ;;  %v4614_v52 = vpack.c.bf16 %v1638_v44, %v1634_v39  ;;  %v1429_v39 = vld [vmem:[#allocation5 + $0x2858] sm:$0xff]  ;;  %v1432_v46 = vld [vmem:[#allocation5 + $0x2870] sm:$0xff] }
 0x320   :  { %4597 = vmatprep.subr.bf16.mxu0 %v4596_v16  ;;  %v4616_v16 = vpack.c.bf16 %v1647_v50, %v1643_v47  ;;  %v5276_v44 = vpack.c.bf16 %v1433_v40, %v1429_v39  ;;  %v1437_v47 = vld [vmem:[#allocation5 + $0x2898] sm:$0xff]  ;;  %v1464_v40 = vld [vmem:[#allocation5 + $0x2970] sm:$0xff] }
 0x321   :  { %5239 = vmatpush1.bf16.msra.mxu1 %v5238_v61  ;;  %v5258_v61 = vpack.c.bf16 %v1392_v55, %v1388_v54  ;;  %v1441_v50 = vld [vmem:[#allocation5 + $0x28b8] sm:$0xff]  ;;  %v3412_v55 = vld [vmem:[#allocation8] sm:$0xff] }
 0x322   :  { %5241 = vmatprep.subr.bf16.mxu1 %v5240_v63  ;;  %v5260_v63 = vpack.c.bf16 %v1401_v58, %v1397_v57  ;;  %v3415_v54 = vld [vmem:[#allocation8 + $0x18] sm:$0xff]  ;;  %v3414_v57 = vld [vmem:[#allocation8 + $0x10] sm:$0xff]  ;;  %v3417_v58 = vld [vmem:[#allocation8 + $0x28] sm:$0xff] }
 0x323   :  { %4599 = vmatpush1.bf16.msra.mxu0 %v4598_v62  ;;  %v4618_v62 = vpack.c.bf16 %v1646_v56, %v1642_v53  ;;  %v3413_v53 = vld [vmem:[#allocation8 + $0x8] sm:$0xff] }
 0x324   :  { %4601 = vmatprep.subr.bf16.mxu0 %v4600_v2  ;;  %v4620_v2 = vpack.c.bf16 %v1655_v60, %v1651_v59  ;;  %v5400_v56 = vpack.c.bf16 %v3415_v54, %v3413_v53  ;;  %v3419_v59 = vld [vmem:[#allocation8 + $0x38] sm:$0xff]  ;;  %v5280_v60 = vpack.c.bf16 %v1441_v50, %v1437_v47  ;;  %v3434_v53 = vld [vmem:[#allocation8 + $0xb0] sm:$0xff] }
 0x325   :  { %5243 = vmatpush1.bf16.msra.mxu1 %v5242_v7  ;;  %v5262_v7 = vpack.c.bf16 %v1400_v19, %v1396_v1  ;;  %v3418_v1 = vld [vmem:[#allocation8 + $0x30] sm:$0xff]  ;;  %v3421_v19 = vld [vmem:[#allocation8 + $0x48] sm:$0xff] }
 0x326   :  { %5245 = vmatprep.subr.bf16.mxu1 %v5244_v9  ;;  %v5264_v9 = vpack.c.bf16 %v1409_v5, %v1405_v4  ;;  %v3423_v4 = vld [vmem:[#allocation8 + $0x58] sm:$0xff] }
 0x327   :  { %4603 = vmatpush1.bf16.msra.mxu0 %v4602_v8  ;;  %v4622_v8 = vpack.c.bf16 %v1654_v3, %v1650_v0  ;;  %v3416_v0 = vld [vmem:[#allocation8 + $0x20] sm:$0xff]  ;;  %v1449_v3 = vld [vmem:[#allocation5 + $0x28f8] sm:$0xff] }
 0x328   :  { %4605 = vmatprep.subr.bf16.mxu0 %v4604_v13  ;;  %v4624_v13 = vpack.c.bf16 %v1663_v28, %v1659_v6  ;;  %v5406_v5 = vpack.c.bf16 %v3418_v1, %v3416_v0  ;;  %v1444_v28 = vld [vmem:[#allocation5 + $0x28d0] sm:$0xff] }
 0x329   :  { %5247 = vmatpush1.bf16.msra.mxu1 %v5246_v22  ;;  %v5266_v22 = vpack.c.bf16 %v1408_v12, %v1404_v11  ;;  %v1448_v11 = vld [vmem:[#allocation5 + $0x28f0] sm:$0xff] }
 0x32a   :  { %5249 = vmatprep.subr.bf16.mxu1 %v5248_v24  ;;  %v5268_v24 = vpack.c.bf16 %v1417_v18, %v1413_v15  ;;  %v3425_v12 = vld [vmem:[#allocation8 + $0x68] sm:$0xff]  ;;  %v1457_v15 = vld [vmem:[#allocation5 + $0x2938] sm:$0xff] }
 0x32b   :  { %4607 = vmatpush1.bf16.msra.mxu0 %v4606_v23  ;;  %v4626_v23 = vpack.c.bf16 %v1662_v14, %v1658_v10  ;;  %v1453_v14 = vld [vmem:[#allocation5 + $0x2918] sm:$0xff] }
 0x32c   :  { %4609 = vmatprep.subr.bf16.mxu0 %v4608_v29  ;;  %v4628_v29 = vpack.c.bf16 %v1671_v21, %v1667_v20  ;;  %v5286_v20 = vpack.c.bf16 %v1448_v11, %v1444_v28  ;;  %v1452_v21 = vld [vmem:[#allocation5 + $0x2910] sm:$0xff]  ;;  %v5288_v25 = vpack.c.bf16 %v1457_v15, %v1453_v14  ;;  %v3447_v14 = vld [vmem:[#allocation8 + $0x118] sm:$0xff] }
 0x32d   :  { %5251 = vmatpush1.bf16.msra.mxu1 %v5250_v36  ;;  %v5272_v36 = vpack.c.bf16 %v1425_v32, %v1421_v31  ;;  %v1465_v31 = vld [vmem:[#allocation5 + $0x2978] sm:$0xff] }
 0x32e   :  { %5253 = vmatprep.subr.bf16.mxu1 %v5252_v38  ;;  %v1424_v38 = vld [vmem:[#allocation5 + $0x2830] sm:$0xff]  ;;  %v5292_v39 = vpack.c.bf16 %v1465_v31, %v1461_v30  ;;  %v1493_v15 = vld [vmem:[#allocation5 + $0x2a58] sm:$0xff] }
 0x32f   :  { %4611 = vmatpush1.bf16.msra.mxu0 %v4610_v37  ;;  %v1420_v37 = vld [vmem:[#allocation5 + $0x2810] sm:$0xff]  ;;  %v3451_v30 = vld [vmem:[#allocation8 + $0x138] sm:$0xff] }
 0x330   :  { %4613 = vmatprep.subr.bf16.mxu0 %v4612_v42  ;;  %v5274_v41 = vpack.c.bf16 %v1424_v38, %v1420_v37  ;;  %v5993_v42 = vld [vmem:[#allocation2 + $0xb0] sm:$0xff]  ;;  %v3428_v37 = vld [vmem:[#allocation8 + $0x80] sm:$0xff]  ;;  %v1501_v31 = vld [vmem:[#allocation5 + $0x2a98] sm:$0xff] }
 0x331   :  { %5255 = vmatpush1.bf16.msra.mxu1 %v5254_v51  ;;  %v5641_v51 = vld [vmem:[#allocation2 + $0x90] sm:$0xff] }
 0x332   :  { %5257 = vmatprep.subr.bf16.mxu1 %v5256_v17  ;;  %v1440_v17 = vld [vmem:[#allocation5 + $0x28b0] sm:$0xff] }
 0x333   :  { %4615 = vmatpush1.bf16.msra.mxu0 %v4614_v52  ;;  %v1436_v52 = vld [vmem:[#allocation5 + $0x2890] sm:$0xff] }
 0x334   :  { %4617 = vmatprep.subr.bf16.mxu0 %v4616_v16  ;;  %v5278_v16 = vpack.c.bf16 %v1432_v46, %v1428_v45  ;;  %v5282_v6 = vpack.c.bf16 %v1440_v17, %v1436_v52  ;;  %v3430_v38 = vld [vmem:[#allocation8 + $0x90] sm:$0xff]  ;;  %v3432_v17 = vld [vmem:[#allocation8 + $0xa0] sm:$0xff] }
 0x335   :  { %5259 = vmatpush1.bf16.msra.mxu1 %v5258_v61  ;;  %v5642_v61 = vld [vmem:[#allocation2 + $0xa8] sm:$0xff]  ;;  %v1469_v45 = vld [vmem:[#allocation5 + $0x2998] sm:$0xff]  ;;  %v5418_v47 = vpack.c.bf16 %v3430_v38, %v3428_v37 }
 0x336   :  { %5261 = vmatprep.subr.bf16.mxu1 %v5260_v63  ;;  %v5404_v63 = vpack.c.bf16 %v3419_v59, %v3417_v58  ;;  %v1473_v46 = vld [vmem:[#allocation5 + $0x29b8] sm:$0xff]  ;;  %v5422_v59 = vpack.c.bf16 %v3434_v53, %v3432_v17  ;;  %v3448_v38 = vld [vmem:[#allocation8 + $0x120] sm:$0xff] }
 0x337   :  { %4619 = vmatpush1.bf16.msra.mxu0 %v4618_v62  ;;  %v5402_v62 = vpack.c.bf16 %v3414_v57, %v3412_v55  ;;  %v5296_v54 = vpack.c.bf16 %v1473_v46, %v1469_v45  ;;  %v1472_v55 = vld [vmem:[#allocation5 + $0x29b0] sm:$0xff]  ;;  %v1477_v57 = vld [vmem:[#allocation5 + $0x29d8] sm:$0xff]  ;;  %v3452_v53 = vld [vmem:[#allocation8 + $0x140] sm:$0xff] }
 0x338   :  { %4621 = vmatprep.subr.bf16.mxu0 %v4620_v2  ;;  %v1445_v2 = vld [vmem:[#allocation5 + $0x28d8] sm:$0xff] }
 0x339   :  { %5263 = vmatpush1.bf16.msra.mxu1 %v5262_v7  ;;  %v5408_v7 = vpack.c.bf16 %v3423_v4, %v3421_v19  ;;  %v5284_v10 = vpack.c.bf16 %v1449_v3, %v1445_v2  ;;  %v1481_v58 = vld [vmem:[#allocation5 + $0x29f8] sm:$0xff]  ;;  %v1480_v19 = vld [vmem:[#allocation5 + $0x29f0] sm:$0xff] }
 0x33a   :  { %5265 = vmatprep.subr.bf16.mxu1 %v5264_v9  ;;  %v3422_v9 = vld [vmem:[#allocation8 + $0x50] sm:$0xff]  ;;  %v5300_v1 = vpack.c.bf16 %v1481_v58, %v1477_v57  ;;  %v3441_v2 = vld [vmem:[#allocation8 + $0xe8] sm:$0xff]  ;;  %v3443_v3 = vld [vmem:[#allocation8 + $0xf8] sm:$0xff] }
 0x33b   :  { %4623 = vmatpush1.bf16.msra.mxu0 %v4622_v8  ;;  %v3420_v8 = vld [vmem:[#allocation8 + $0x40] sm:$0xff]  ;;  %v3438_v0 = vld [vmem:[#allocation8 + $0xd0] sm:$0xff]  ;;  %v3455_v45 = vld [vmem:[#allocation8 + $0x158] sm:$0xff] }
 0x33c   :  { %4625 = vmatprep.subr.bf16.mxu0 %v4624_v13  ;;  %v3427_v13 = vld [vmem:[#allocation8 + $0x78] sm:$0xff]  ;;  %v5410_v18 = vpack.c.bf16 %v3422_v9, %v3420_v8  ;;  %v5428_v8 = vpack.c.bf16 %v3443_v3, %v3441_v2  ;;  %v3440_v9 = vld [vmem:[#allocation8 + $0xe0] sm:$0xff]  ;;  %v1520_v2 = vld [vmem:[#allocation5 + $0x2b30] sm:$0xff] }
 0x33d   :  { %5267 = vmatpush1.bf16.msra.mxu1 %v5266_v22  ;;  %v5412_v22 = vpack.c.bf16 %v3427_v13, %v3425_v12  ;;  %v1485_v4 = vld [vmem:[#allocation5 + $0x2a18] sm:$0xff]  ;;  %v1488_v12 = vld [vmem:[#allocation5 + $0x2a30] sm:$0xff] }
 0x33e   :  { %5269 = vmatprep.subr.bf16.mxu1 %v5268_v24  ;;  %v3426_v24 = vld [vmem:[#allocation8 + $0x70] sm:$0xff]  ;;  %v3445_v13 = vld [vmem:[#allocation8 + $0x108] sm:$0xff]  ;;  %v3459_v57 = vld [vmem:[#allocation8 + $0x178] sm:$0xff] }
 0x33f   :  { %4627 = vmatpush1.bf16.msra.mxu0 %v4626_v23  ;;  %v3424_v23 = vld [vmem:[#allocation8 + $0x60] sm:$0xff]  ;;  %v1509_v46 = vld [vmem:[#allocation5 + $0x2ad8] sm:$0xff]  ;;  %v3461_v3 = vld [vmem:[#allocation8 + $0x188] sm:$0xff] }
 0x340   :  { %4629 = vmatprep.subr.bf16.mxu0 %v4628_v29  ;;  %v3431_v29 = vld [vmem:[#allocation8 + $0x98] sm:$0xff]  ;;  %v5414_v32 = vpack.c.bf16 %v3426_v24, %v3424_v23  ;;  %v5432_v23 = vpack.c.bf16 %v3447_v14, %v3445_v13  ;;  %v3444_v24 = vld [vmem:[#allocation8 + $0x100] sm:$0xff]  ;;  %v1528_v13 = vld [vmem:[#allocation5 + $0x2b70] sm:$0xff] }
 0x341   :  { %5271 = vmatpush1.bf16.msra.mxu1 %v5270_v34  ;;  %v5290_v34 = vpack.c.bf16 %v1456_v26, %v1452_v21  ;;  %v1517_v58 = vld [vmem:[#allocation5 + $0x2b18] sm:$0xff]  ;;  %v3465_v14 = vld [vmem:[#allocation8 + $0x1a8] sm:$0xff] }
 0x342   :  { %5273 = vmatprep.subr.bf16.mxu1 %v5272_v36  ;;  %v5416_v36 = vpack.c.bf16 %v3431_v29, %v3429_v27  ;;  %v1496_v27 = vld [vmem:[#allocation5 + $0x2a70] sm:$0xff] }
 0x343   :  { %4631 = vmatpush1.bf16.msra.mxu0 %v4630_v35  ;;  %v1460_v35 = vld [vmem:[#allocation5 + $0x2950] sm:$0xff] }
 0x344   :  { %3252 = vmatmul.mubr.f32.vlgmr.msra.gmra.mrb[2].mxu1 %v5641_v51  ;;  %5401 = vmatprep.subr.bf16.mxu0 %v5400_v56  ;;  %v5294_v50 = vpack.c.bf16 %v1464_v40, %v1460_v35  ;;  %v1468_v51 = vld [vmem:[#allocation5 + $0x2990] sm:$0xff]  ;;  %v3439_v56 = vld [vmem:[#allocation8 + $0xd8] sm:$0xff] }
 0x345   :  { %5275 = vmatpush1.bf16.msra.mxu1 %v5274_v41  ;;  %3322 = vmatprep.mubr.f32.mxu1 %v5642_v61  ;;  %v3433_v41 = vld [vmem:[#allocation8 + $0xa8] sm:$0xff] }
 0x346   :  { %2542 = vmatmul.mubr.f32.vlgmr.msra.gmra.mrb[0].mxu0 %v5993_v42  ;;  %5277 = vmatprep.subr.bf16.mxu1 %v5276_v44  ;;  %v3435_v44 = vld [vmem:[#allocation8 + $0xb8] sm:$0xff]  ;;  %v1476_v61 = vld [vmem:[#allocation5 + $0x29d0] sm:$0xff] }
 0x347   :  { %5403 = vmatpush1.bf16.msra.mxu0 %v5402_v62  ;;  %v5420_v52 = vpack.c.bf16 %v3435_v44, %v3433_v41  ;;  %v5302_v28 = vpack.c.bf16 %v1480_v19, %v1476_v61  ;;  %v3449_v29 = vld [vmem:[#allocation8 + $0x128] sm:$0xff] }
 0x348   :  { %5405 = vmatprep.subr.bf16.mxu0 %v5404_v63  ;;  %v3436_v63 = vld [vmem:[#allocation8 + $0xc0] sm:$0xff]  ;;  %v5436_v37 = vpack.c.bf16 %v3451_v30, %v3449_v29  ;;  %v1504_v41 = vld [vmem:[#allocation5 + $0x2ab0] sm:$0xff]  ;;  %v1541_v30 = vld [vmem:[#allocation5 + $0x2bd8] sm:$0xff] }
 0x349   :  { %5279 = vmatpush1.bf16.msra.mxu1 %v5278_v16  ;;  %v3437_v16 = vld [vmem:[#allocation8 + $0xc8] sm:$0xff] }
 0x34a   :  { %5281 = vmatprep.subr.bf16.mxu1 %v5280_v60  ;;  %v5298_v60 = vpack.c.bf16 %v1472_v55, %v1468_v51  ;;  %v5424_v62 = vpack.c.bf16 %v3439_v56, %v3437_v16  ;;  %v3453_v44 = vld [vmem:[#allocation8 + $0x148] sm:$0xff] }
 0x34b   :  { %5407 = vmatpush1.bf16.msra.mxu0 %v5406_v5  ;;  %v1489_v5 = vld [vmem:[#allocation5 + $0x2a38] sm:$0xff]  ;;  %v5440_v17 = vpack.c.bf16 %v3455_v45, %v3453_v44  ;;  %v1512_v16 = vld [vmem:[#allocation5 + $0x2af0] sm:$0xff] }
 0x34c   :  { %5409 = vmatprep.subr.bf16.mxu0 %v5408_v7  ;;  %v1484_v7 = vld [vmem:[#allocation5 + $0x2a10] sm:$0xff]  ;;  %v5304_v11 = vpack.c.bf16 %v1489_v5, %v1485_v4  ;;  %v3463_v4 = vld [vmem:[#allocation8 + $0x198] sm:$0xff] }
 0x34d   :  { %5283 = vmatpush1.bf16.msra.mxu1 %v5282_v6  ;;  %v5426_v6 = vpack.c.bf16 %v3438_v0, %v3436_v63  ;;  %v5306_v21 = vpack.c.bf16 %v1488_v12, %v1484_v7  ;;  %v3457_v56 = vld [vmem:[#allocation8 + $0x168] sm:$0xff]  ;;  %v3456_v0 = vld [vmem:[#allocation8 + $0x160] sm:$0xff]  ;;  %v1525_v5 = vld [vmem:[#allocation5 + $0x2b58] sm:$0xff] }
 0x34e   :  { %5285 = vmatprep.subr.bf16.mxu1 %v5284_v10  ;;  %v3442_v10 = vld [vmem:[#allocation8 + $0xf0] sm:$0xff]  ;;  %v5444_v63 = vpack.c.bf16 %v3459_v57, %v3457_v56 }
 0x34f   :  { %5411 = vmatpush1.bf16.msra.mxu0 %v5410_v18  ;;  %v1497_v18 = vld [vmem:[#allocation5 + $0x2a78] sm:$0xff]  ;;  %v1536_v29 = vld [vmem:[#allocation5 + $0x2bb0] sm:$0xff] }
 0x350   :  { %5413 = vmatprep.subr.bf16.mxu0 %v5412_v22  ;;  %v1492_v22 = vld [vmem:[#allocation5 + $0x2a50] sm:$0xff]  ;;  %v5308_v26 = vpack.c.bf16 %v1497_v18, %v1493_v15  ;;  %v3467_v15 = vld [vmem:[#allocation8 + $0x1b8] sm:$0xff] }
 0x351   :  { %5287 = vmatpush1.bf16.msra.mxu1 %v5286_v20  ;;  %v5430_v20 = vpack.c.bf16 %v3442_v10, %v3440_v9  ;;  %v5310_v35 = vpack.c.bf16 %v1496_v27, %v1492_v22  ;;  %v5448_v9 = vpack.c.bf16 %v3463_v4, %v3461_v3  ;;  %v3460_v10 = vld [vmem:[#allocation8 + $0x180] sm:$0xff]  ;;  %v1533_v18 = vld [vmem:[#allocation5 + $0x2b98] sm:$0xff]  ;;  %v1532_v27 = vld [vmem:[#allocation5 + $0x2b90] sm:$0xff] }
 0x352   :  { %5289 = vmatprep.subr.bf16.mxu1 %v5288_v25  ;;  %v3446_v25 = vld [vmem:[#allocation8 + $0x110] sm:$0xff] }
 0x353   :  { %5415 = vmatpush1.bf16.msra.mxu0 %v5414_v32  ;;  %v1505_v32 = vld [vmem:[#allocation5 + $0x2ab8] sm:$0xff]  ;;  %v1548_v44 = vld [vmem:[#allocation5 + $0x2c10] sm:$0xff] }
 0x354   :  { %5417 = vmatprep.subr.bf16.mxu0 %v5416_v36  ;;  %v1500_v36 = vld [vmem:[#allocation5 + $0x2a90] sm:$0xff]  ;;  %v5312_v40 = vpack.c.bf16 %v1505_v32, %v1501_v31  ;;  %v1545_v31 = vld [vmem:[#allocation5 + $0x2bf8] sm:$0xff] }
 0x355   :  { %5291 = vmatpush1.bf16.msra.mxu1 %v5290_v34  ;;  %v5434_v34 = vpack.c.bf16 %v3446_v25, %v3444_v24  ;;  %v5314_v51 = vpack.c.bf16 %v1504_v41, %v1500_v36  ;;  %v3464_v24 = vld [vmem:[#allocation8 + $0x1a0] sm:$0xff]  ;;  %v3466_v25 = vld [vmem:[#allocation8 + $0x1b0] sm:$0xff] }
 0x356   :  { %5293 = vmatprep.subr.bf16.mxu1 %v5292_v39  ;;  %v3450_v39 = vld [vmem:[#allocation8 + $0x130] sm:$0xff]  ;;  %v5454_v32 = vpack.c.bf16 %v3466_v25, %v3464_v24 }
 0x357   :  { %5419 = vmatpush1.bf16.msra.mxu0 %v5418_v47  ;;  %v1513_v47 = vld [vmem:[#allocation5 + $0x2af8] sm:$0xff]  ;;  %v1540_v36 = vld [vmem:[#allocation5 + $0x2bd0] sm:$0xff] }
 0x358   :  { %5421 = vmatprep.subr.bf16.mxu0 %v5420_v52  ;;  %v1508_v52 = vld [vmem:[#allocation5 + $0x2ad0] sm:$0xff]  ;;  %v5316_v55 = vpack.c.bf16 %v1513_v47, %v1509_v46  ;;  %v1557_v46 = vld [vmem:[#allocation5 + $0x2c58] sm:$0xff] }
 0x359   :  { %5295 = vmatpush1.bf16.msra.mxu1 %v5294_v50  ;;  %v5438_v50 = vpack.c.bf16 %v3450_v39, %v3448_v38  ;;  %v5318_v61 = vpack.c.bf16 %v1512_v16, %v1508_v52  ;;  %v1549_v38 = vld [vmem:[#allocation5 + $0x2c18] sm:$0xff]  ;;  %v1552_v45 = vld [vmem:[#allocation5 + $0x2c30] sm:$0xff] }
 0x35a   :  { %5297 = vmatprep.subr.bf16.mxu1 %v5296_v54  ;;  %v3454_v54 = vld [vmem:[#allocation8 + $0x150] sm:$0xff] }
 0x35b   :  { %5423 = vmatpush1.bf16.msra.mxu0 %v5422_v59  ;;  %v1521_v59 = vld [vmem:[#allocation5 + $0x2b38] sm:$0xff]  ;;  %v1556_v52 = vld [vmem:[#allocation5 + $0x2c50] sm:$0xff] }
 0x35c   :  { %5425 = vmatprep.subr.bf16.mxu0 %v5424_v62  ;;  %v1516_v62 = vld [vmem:[#allocation5 + $0x2b10] sm:$0xff]  ;;  %v5320_v19 = vpack.c.bf16 %v1521_v59, %v1517_v58  ;;  %v1553_v39 = vld [vmem:[#allocation5 + $0x2c38] sm:$0xff] }
 0x35d   :  { %5299 = vmatpush1.bf16.msra.mxu1 %v5298_v60  ;;  %v5442_v60 = vpack.c.bf16 %v3454_v54, %v3452_v53  ;;  %v5322_v7 = vpack.c.bf16 %v1520_v2, %v1516_v62  ;;  %v5336_v41 = vpack.c.bf16 %v1553_v39, %v1549_v38  ;;  %v1561_v47 = vld [vmem:[#allocation5 + $0x2c78] sm:$0xff]  ;;  %v1564_v56 = vld [vmem:[#allocation5 + $0x2c90] sm:$0xff] }
 0x35e   :  { %5301 = vmatprep.subr.bf16.mxu1 %v5300_v1  ;;  %v3458_v1 = vld [vmem:[#allocation8 + $0x170] sm:$0xff] }
 0x35f   :  { %5427 = vmatpush1.bf16.msra.mxu0 %v5426_v6  ;;  %v1529_v6 = vld [vmem:[#allocation5 + $0x2b78] sm:$0xff]  ;;  %v1568_v57 = vld [vmem:[#allocation5 + $0x2cb0] sm:$0xff] }
 0x360   :  { %5429 = vmatprep.subr.bf16.mxu0 %v5428_v8  ;;  %v1524_v8 = vld [vmem:[#allocation5 + $0x2b50] sm:$0xff]  ;;  %v5324_v12 = vpack.c.bf16 %v1529_v6, %v1525_v5  ;;  %v1565_v53 = vld [vmem:[#allocation5 + $0x2c98] sm:$0xff] }
 0x361   :  { %5303 = vmatpush1.bf16.msra.mxu1 %v5302_v28  ;;  %v5446_v28 = vpack.c.bf16 %v3458_v1, %v3456_v0  ;;  %v5326_v22 = vpack.c.bf16 %v1528_v13, %v1524_v8  ;;  %v1569_v54 = vld [vmem:[#allocation5 + $0x2cb8] sm:$0xff]  ;;  %v1572_v62 = vld [vmem:[#allocation5 + $0x2cd0] sm:$0xff] }
 0x362   :  { %5305 = vmatprep.subr.bf16.mxu1 %v5304_v11  ;;  %v3462_v11 = vld [vmem:[#allocation8 + $0x190] sm:$0xff]  ;;  %v5344_v16 = vpack.c.bf16 %v1569_v54, %v1565_v53  ;;  %v3471_v13 = vld [vmem:[#allocation8 + $0x1d8] sm:$0xff] }
 0x363   :  { %5431 = vmatpush1.bf16.msra.mxu0 %v5430_v20  ;;  %v1537_v20 = vld [vmem:[#allocation5 + $0x2bb8] sm:$0xff]  ;;  %v1580_v2 = vld [vmem:[#allocation5 + $0x2d10] sm:$0xff] }
 0x364   :  { %5433 = vmatprep.subr.bf16.mxu0 %v5432_v23  ;;  %v5452_v23 = vpack.c.bf16 %v3467_v15, %v3465_v14  ;;  %v1573_v58 = vld [vmem:[#allocation5 + $0x2cd8] sm:$0xff]  ;;  %v1600_v15 = vld [vmem:[#allocation5 + $0x2db0] sm:$0xff] }
 0x365   :  { %5307 = vmatpush1.bf16.msra.mxu1 %v5306_v21  ;;  %v5450_v21 = vpack.c.bf16 %v3462_v11, %v3460_v10  ;;  %v1577_v59 = vld [vmem:[#allocation5 + $0x2cf8] sm:$0xff]  ;;  %v1596_v11 = vld [vmem:[#allocation5 + $0x2d90] sm:$0xff] }
 0x366   :  { %5309 = vmatprep.subr.bf16.mxu1 %v5308_v26  ;;  %v5328_v26 = vpack.c.bf16 %v1537_v20, %v1533_v18  ;;  %v1581_v0 = vld [vmem:[#allocation5 + $0x2d18] sm:$0xff]  ;;  %v3468_v20 = vld [vmem:[#allocation8 + $0x1c0] sm:$0xff]  ;;  %v5362_v25 = vpack.c.bf16 %v1600_v15, %v1596_v11  ;;  %v1620_v53 = vld [vmem:[#allocation5 + $0x2e50] sm:$0xff] }
 0x367   :  { %5435 = vmatpush1.bf16.msra.mxu0 %v5434_v34  ;;  %v5330_v34 = vpack.c.bf16 %v1536_v29, %v1532_v27  ;;  %v1585_v1 = vld [vmem:[#allocation5 + $0x2d38] sm:$0xff]  ;;  %v3473_v27 = vld [vmem:[#allocation8 + $0x1e8] sm:$0xff] }
 0x368   :  { %5437 = vmatprep.subr.bf16.mxu0 %v5436_v37  ;;  %v1544_v37 = vld [vmem:[#allocation5 + $0x2bf0] sm:$0xff]  ;;  %v1589_v3 = vld [vmem:[#allocation5 + $0x2d58] sm:$0xff] }
 0x369   :  { %5311 = vmatpush1.bf16.msra.mxu1 %v5310_v35  ;;  %v5332_v35 = vpack.c.bf16 %v1545_v31, %v1541_v30  ;;  %v1593_v4 = vld [vmem:[#allocation5 + $0x2d78] sm:$0xff]  ;;  %v1608_v31 = vld [vmem:[#allocation5 + $0x2df0] sm:$0xff] }
 0x36a   :  { %5313 = vmatprep.subr.bf16.mxu1 %v5312_v40  ;;  %v5334_v40 = vpack.c.bf16 %v1544_v37, %v1540_v36  ;;  %v5356_v6 = vpack.c.bf16 %v1593_v4, %v1589_v3  ;;  %v1597_v8 = vld [vmem:[#allocation5 + $0x2d98] sm:$0xff]  ;;  %v1624_v54 = vld [vmem:[#allocation5 + $0x2e70] sm:$0xff] }
 0x36b   :  { %5439 = vmatpush1.bf16.msra.mxu0 %v5438_v50  ;;  %v5338_v50 = vpack.c.bf16 %v1552_v45, %v1548_v44  ;;  %v3475_v29 = vld [vmem:[#allocation8 + $0x1f8] sm:$0xff]  ;;  %v1616_v44 = vld [vmem:[#allocation5 + $0x2e30] sm:$0xff] }
 0x36c   :  { %5441 = vmatprep.subr.bf16.mxu0 %v5440_v17  ;;  %v1560_v17 = vld [vmem:[#allocation5 + $0x2c70] sm:$0xff]  ;;  %v1613_v36 = vld [vmem:[#allocation5 + $0x2e18] sm:$0xff] }
 0x36d   :  { %5315 = vmatpush1.bf16.msra.mxu1 %v5314_v51  ;;  %v5340_v51 = vpack.c.bf16 %v1561_v47, %v1557_v46  ;;  %v1617_v37 = vld [vmem:[#allocation5 + $0x2e38] sm:$0xff]  ;;  %v3477_v47 = vld [vmem:[#allocation8 + $0x208] sm:$0xff] }
 0x36e   :  { %5317 = vmatprep.subr.bf16.mxu1 %v5316_v55  ;;  %v5342_v55 = vpack.c.bf16 %v1560_v17, %v1556_v52  ;;  %v1621_v45 = vld [vmem:[#allocation5 + $0x2e58] sm:$0xff]  ;;  %v1644_v3 = vld [vmem:[#allocation5 + $0x2f10] sm:$0xff] }
 0x36f   :  { %5443 = vmatpush1.bf16.msra.mxu0 %v5442_v60  ;;  %v5346_v60 = vpack.c.bf16 %v1568_v57, %v1564_v56  ;;  %v1625_v46 = vld [vmem:[#allocation5 + $0x2e78] sm:$0xff]  ;;  %v5374_v56 = vpack.c.bf16 %v1624_v54, %v1620_v53  ;;  %v1648_v4 = vld [vmem:[#allocation5 + $0x2f30] sm:$0xff] }
 0x370   :  { %5445 = vmatprep.subr.bf16.mxu0 %v5444_v63  ;;  %v1576_v63 = vld [vmem:[#allocation5 + $0x2cf0] sm:$0xff]  ;;  %v5372_v17 = vpack.c.bf16 %v1625_v46, %v1621_v45  ;;  %v1665_v11 = vld [vmem:[#allocation5 + $0x2fb8] sm:$0xff] }
 0x371   :  { %5319 = vmatpush1.bf16.msra.mxu1 %v5318_v61  ;;  %v5348_v61 = vpack.c.bf16 %v1577_v59, %v1573_v58  ;;  %v1628_v58 = vld [vmem:[#allocation5 + $0x2e90] sm:$0xff]  ;;  %v3483_v46 = vld [vmem:[#allocation8 + $0x238] sm:$0xff] }
 0x372   :  { %5321 = vmatprep.subr.bf16.mxu1 %v5320_v19  ;;  %v5352_v19 = vpack.c.bf16 %v1585_v1, %v1581_v0  ;;  %v1632_v59 = vld [vmem:[#allocation5 + $0x2eb0] sm:$0xff]  ;;  %v3487_v54 = vld [vmem:[#allocation8 + $0x258] sm:$0xff] }
 0x373   :  { %5447 = vmatpush1.bf16.msra.mxu0 %v5446_v28  ;;  %v1588_v28 = vld [vmem:[#allocation5 + $0x2d50] sm:$0xff] }
 0x374   :  { %5449 = vmatprep.subr.bf16.mxu0 %v5448_v9  ;;  %v1601_v9 = vld [vmem:[#allocation5 + $0x2db8] sm:$0xff]  ;;  %v1636_v0 = vld [vmem:[#allocation5 + $0x2ed0] sm:$0xff] }
 0x375   :  { %5323 = vmatpush1.bf16.msra.mxu1 %v5322_v7  ;;  %v1592_v7 = vld [vmem:[#allocation5 + $0x2d70] sm:$0xff]  ;;  %v5360_v14 = vpack.c.bf16 %v1601_v9, %v1597_v8 }
 0x376   :  { %5325 = vmatprep.subr.bf16.mxu1 %v5324_v12  ;;  %v5358_v10 = vpack.c.bf16 %v1592_v7, %v1588_v28  ;;  %v3469_v12 = vld [vmem:[#allocation8 + $0x1c8] sm:$0xff]  ;;  %v5386_v28 = vpack.c.bf16 %v1648_v4, %v1644_v3  ;;  %v3482_v53 = vld [vmem:[#allocation8 + $0x230] sm:$0xff] }
 0x377   :  { %5451 = vmatpush1.bf16.msra.mxu0 %v5450_v21  ;;  %v5456_v18 = vpack.c.bf16 %v3471_v13, %v3469_v12  ;;  %v3470_v21 = vld [vmem:[#allocation8 + $0x1d0] sm:$0xff]  ;;  %v3481_v45 = vld [vmem:[#allocation8 + $0x228] sm:$0xff] }
 0x378   :  { %5453 = vmatprep.subr.bf16.mxu0 %v5452_v23  ;;  %v1609_v23 = vld [vmem:[#allocation5 + $0x2df8] sm:$0xff]  ;;  %v5458_v24 = vpack.c.bf16 %v3470_v21, %v3468_v20  ;;  %v1640_v1 = vld [vmem:[#allocation5 + $0x2ef0] sm:$0xff] }
 0x379   :  { %5327 = vmatpush1.bf16.msra.mxu1 %v5326_v22  ;;  %v1605_v22 = vld [vmem:[#allocation5 + $0x2dd8] sm:$0xff]  ;;  %v1652_v8 = vld [vmem:[#allocation5 + $0x2f50] sm:$0xff] }
 0x37a   :  { %5329 = vmatprep.subr.bf16.mxu1 %v5328_v26  ;;  %v1604_v26 = vld [vmem:[#allocation5 + $0x2dd0] sm:$0xff]  ;;  %v5364_v30 = vpack.c.bf16 %v1609_v23, %v1605_v22  ;;  %v1673_v20 = vld [vmem:[#allocation5 + $0x2ff8] sm:$0xff] }
 0x37b   :  { %5455 = vmatpush1.bf16.msra.mxu0 %v5454_v32  ;;  %v5460_v32 = vpack.c.bf16 %v3475_v29, %v3473_v27  ;;  %v5366_v39 = vpack.c.bf16 %v1608_v31, %v1604_v26  ;;  %v1656_v9 = vld [vmem:[#allocation5 + $0x2f70] sm:$0xff]  ;;  %v1676_v26 = vlaneseq }
 0x37c   :  { %5457 = vmatprep.subr.bf16.mxu0 %v5456_v18  ;;  %v5390_v12 = vpack.c.bf16 %v1656_v9, %v1652_v8  ;;  %v1664_v15 = vld [vmem:[#allocation5 + $0x2fb0] sm:$0xff]  ;;  %v1669_v18 = vld [vmem:[#allocation5 + $0x2fd8] sm:$0xff] }
 0x37d   :  { %5331 = vmatpush1.bf16.msra.mxu1 %v5330_v34  ;;  %v3472_v34 = vld [vmem:[#allocation8 + $0x1e0] sm:$0xff]  ;;  %v5396_v22 = vpack.c.bf16 %v1673_v20, %v1669_v18  ;;  %v1668_v23 = vld [vmem:[#allocation5 + $0x2fd0] sm:$0xff]  ;;  %v5999_v27 = vshrl.u32 %v1676_v26, 7  ;;  %v3495_v18 = vld [vmem:[#allocation8 + $0x298] sm:$0xff] }
 0x37e   :  { %5333 = vmatprep.subr.bf16.mxu1 %v5332_v35  ;;  %v3474_v35 = vld [vmem:[#allocation8 + $0x1f0] sm:$0xff]  ;;  %v3489_v4 = vld [vmem:[#allocation8 + $0x268] sm:$0xff] }
 0x37f   :  { %5459 = vmatpush1.bf16.msra.mxu0 %v5458_v24  ;;  %v5462_v38 = vpack.c.bf16 %v3474_v35, %v3472_v34  ;;  %v1672_v24 = vld [vmem:[#allocation5 + $0x2ff0] sm:$0xff]  ;;  %v1678_v29 = vsub.s32 0, %v5999_v27  ;;  %v1682_v31 = vsub.s32 1, %v5999_v27 }
 0x380   :  { %5461 = vmatprep.subr.bf16.mxu0 %v5460_v32  ;;  %v3721_v3 = vld [vmem:[#allocation11 + $0xa8] sm:$0xff] }
 0x381   :  { %5335 = vmatpush1.bf16.msra.mxu1 %v5334_v40  ;;  %v5368_v40 = vpack.c.bf16 %v1617_v37, %v1613_v36  ;;  %v3705_v8 = vld [vmem:[#allocation11 + $0x28] sm:$0xff] }
 0x382   :  { %5337 = vmatprep.subr.bf16.mxu1 %v5336_v41  ;;  %v1612_v41 = vld [vmem:[#allocation5 + $0x2e10] sm:$0xff] }
 0x383   :  { %5463 = vmatpush1.bf16.msra.mxu0 %v5462_v38  ;;  %v3725_v26 = vld [vmem:[#allocation11 + $0xc8] sm:$0xff] }
 0x384   :  { %3323 = vmatmul.mubr.f32.vlgmr.msra.gmra.mrb[2].mxu1 %v5987_v33  ;;  %v5350_v33 = vpack.c.bf16 %v1576_v63, %v1572_v62  ;;  %v5378_v62 = vpack.c.bf16 %v1632_v59, %v1628_v58  ;;  %v3701_v58 = vld [vmem:[#allocation11 + $0x8] sm:$0xff]  ;;  %v3718_v59 = vld [vmem:[#allocation11 + $0x90] sm:$0xff] }
 0x385   :  { %5339 = vmatpush1.bf16.msra.mxu1 %v5338_v50  ;;  %3393 = vmatprep.mubr.f32.mxu1 %v5989_v49  ;;  %v1584_v49 = vld [vmem:[#allocation5 + $0x2d30] sm:$0xff]  ;;  %v3479_v50 = vld [vmem:[#allocation8 + $0x218] sm:$0xff] }
 0x386   :  { %5341 = vmatprep.subr.bf16.mxu1 %v5340_v51  ;;  %v5354_v5 = vpack.c.bf16 %v1584_v49, %v1580_v2  ;;  %v5370_v51 = vpack.c.bf16 %v1616_v44, %v1612_v41  ;;  %v5464_v52 = vpack.c.bf16 %v3479_v50, %v3477_v47  ;;  %v5382_v2 = vpack.c.bf16 %v1640_v1, %v1636_v0  ;;  %v3478_v41 = vld [vmem:[#allocation8 + $0x210] sm:$0xff]  ;;  %v3703_v1 = vld [vmem:[#allocation11 + $0x18] sm:$0xff] }
 0x387   :  { %v3702_v0 = vld [vmem:[#allocation11 + $0x10] sm:$0xff] }
 0x388   :  { %5465 = vmatprep.subr.bf16.mxu0 %v5464_v52 }
 0x389   :  { %5343 = vmatpush1.bf16.msra.mxu1 %v5342_v55  ;;  %v1629_v55 = vld [vmem:[#allocation5 + $0x2e98] sm:$0xff] }
 0x38a   :  { %5345 = vmatprep.subr.bf16.mxu1 %v5344_v16  ;;  %v1633_v16 = vld [vmem:[#allocation5 + $0x2eb8] sm:$0xff] }
 0x38b   :  { %v5376_v57 = vpack.c.bf16 %v1633_v16, %v1629_v55  ;;  %v3716_v55 = vld [vmem:[#allocation11 + $0x80] sm:$0xff]  ;;  %v3717_v16 = vld [vmem:[#allocation11 + $0x88] sm:$0xff] }
 0x38d   :  { %5347 = vmatpush1.bf16.msra.mxu1 %v5346_v60  ;;  %v1637_v60 = vld [vmem:[#allocation5 + $0x2ed8] sm:$0xff] }
 0x38e   :  { %5349 = vmatprep.subr.bf16.mxu1 %v5348_v61  ;;  %v1641_v61 = vld [vmem:[#allocation5 + $0x2ef8] sm:$0xff] }
 0x38f   :  { %v5380_v63 = vpack.c.bf16 %v1641_v61, %v1637_v60  ;;  %v3719_v60 = vld [vmem:[#allocation11 + $0x98] sm:$0xff] }
 0x391   :  { %5351 = vmatpush1.bf16.msra.mxu1 %v5350_v33  ;;  %v1645_v33 = vld [vmem:[#allocation5 + $0x2f18] sm:$0xff] }
 0x392   :  { %5353 = vmatprep.subr.bf16.mxu1 %v5352_v19  ;;  %v1649_v19 = vld [vmem:[#allocation5 + $0x2f38] sm:$0xff] }
 0x393   :  { %v5384_v49 = vpack.c.bf16 %v1649_v19, %v1645_v33  ;;  %v3720_v33 = vld [vmem:[#allocation11 + $0xa0] sm:$0xff] }
 0x395   :  { %5355 = vmatpush1.bf16.msra.mxu1 %v5354_v5  ;;  %v1653_v5 = vld [vmem:[#allocation5 + $0x2f58] sm:$0xff] }
 0x396   :  { %5357 = vmatprep.subr.bf16.mxu1 %v5356_v6  ;;  %v1657_v6 = vld [vmem:[#allocation5 + $0x2f78] sm:$0xff] }
 0x397   :  { %v5388_v7 = vpack.c.bf16 %v1657_v6, %v1653_v5  ;;  %v3491_v5 = vld [vmem:[#allocation8 + $0x278] sm:$0xff]  ;;  %v5534_v6 = vpack.c.bf16 %v3703_v1, %v3702_v0  ;;  %v3509_v0 = vld [vmem:[#allocation8 + $0x308] sm:$0xff] }
 0x398   :  { %v3511_v1 = vld [vmem:[#allocation8 + $0x318] sm:$0xff] }
 0x399   :  { %5359 = vmatpush1.bf16.msra.mxu1 %v5358_v10  ;;  %v1661_v10 = vld [vmem:[#allocation5 + $0x2f98] sm:$0xff] }
 0x39a   :  { %5361 = vmatprep.subr.bf16.mxu1 %v5360_v14  ;;  %v5392_v13 = vpack.c.bf16 %v1665_v11, %v1661_v10  ;;  %v1660_v14 = vld [vmem:[#allocation5 + $0x2f90] sm:$0xff]  ;;  %v3723_v11 = vld [vmem:[#allocation11 + $0xb8] sm:$0xff] }
 0x39b   :  { %v5394_v21 = vpack.c.bf16 %v1664_v15, %v1660_v14  ;;  %v3722_v10 = vld [vmem:[#allocation11 + $0xb0] sm:$0xff]  ;;  %v3493_v15 = vld [vmem:[#allocation8 + $0x288] sm:$0xff] }
 0x39c   :  { %v3490_v14 = vld [vmem:[#allocation8 + $0x270] sm:$0xff] }
 0x39d   :  { %5363 = vmatpush1.bf16.msra.mxu1 %v5362_v25  ;;  %v5398_v25 = vpack.c.bf16 %v1672_v24, %v1668_v23  ;;  %v3707_v23 = vld [vmem:[#allocation11 + $0x38] sm:$0xff] }
 0x39e   :  { %5365 = vmatprep.subr.bf16.mxu1 %v5364_v30  ;;  %v6002_v30 = vld [vmem:[#allocation7] sm:$0xf] }
 0x39f   :  { %v1679_v32 = vrot.slane %v6002_v30, %v1678_v29  ;;  %v1683_v34 = vrot.slane %v6002_v30, %v1682_v31 }
 0x3a1   :  { %5367 = vmatpush1.bf16.msra.mxu1 %v5366_v39  ;;  %v1763_v35 = vadd.f32 %v5983_v43, %v1679_v32  ;;  %v3485_v43 = vld [vmem:[#allocation8 + $0x248] sm:$0xff]  ;;  %v5480_v32 = vpack.c.bf16 %v3495_v18, %v3493_v15  ;;  %v3523_v15 = vld [vmem:[#allocation8 + $0x378] sm:$0xff] }
 0x3a2   :  { %5369 = vmatprep.subr.bf16.mxu1 %v5368_v40  ;;  %v3476_v40 = vld [vmem:[#allocation8 + $0x200] sm:$0xff]  ;;  %v5472_v19 = vpack.c.bf16 %v3487_v54, %v3485_v43  ;;  %v3710_v43 = vld [vmem:[#allocation11 + $0x50] sm:$0xff] }
 0x3a3   :  { %v5466_v50 = vpack.c.bf16 %v3478_v41, %v3476_v40  ;;  %v3709_v40 = vld [vmem:[#allocation11 + $0x48] sm:$0xff]  ;;  %v3711_v54 = vld [vmem:[#allocation11 + $0x58] sm:$0xff] }
 0x3a5   :  { %5371 = vmatpush1.bf16.msra.mxu1 %v5370_v51  ;;  %v3480_v51 = vld [vmem:[#allocation8 + $0x220] sm:$0xff] }
 0x3a6   :  { %5373 = vmatprep.subr.bf16.mxu1 %v5372_v17  ;;  %v5468_v17 = vpack.c.bf16 %v3483_v46, %v3481_v45  ;;  %v5470_v61 = vpack.c.bf16 %v3482_v53, %v3480_v51  ;;  %v3727_v45 = vld [vmem:[#allocation11 + $0xd8] sm:$0xff]  ;;  %v3501_v51 = vld [vmem:[#allocation8 + $0x2c8] sm:$0xff] }
 0x3a9   :  { %5375 = vmatpush1.bf16.msra.mxu1 %v5374_v56  ;;  %v3700_v56 = vld [vmem:[#allocation11] sm:$0xff] }
 0x3aa   :  { %5377 = vmatprep.subr.bf16.mxu1 %v5376_v57  ;;  %v5528_v57 = vpack.c.bf16 %v3717_v16, %v3716_v55  ;;  %v3500_v16 = vld [vmem:[#allocation8 + $0x2c0] sm:$0xff] }
 0x3ad   :  { %5379 = vmatpush1.bf16.msra.mxu1 %v5378_v62  ;;  %v5530_v62 = vpack.c.bf16 %v3701_v58, %v3700_v56  ;;  %v3502_v56 = vld [vmem:[#allocation8 + $0x2d0] sm:$0xff]  ;;  %v3507_v58 = vld [vmem:[#allocation8 + $0x2f8] sm:$0xff] }
 0x3ae   :  { %5381 = vmatprep.subr.bf16.mxu1 %v5380_v63  ;;  %v5532_v63 = vpack.c.bf16 %v3719_v60, %v3718_v59  ;;  %v5550_v59 = vpack.c.bf16 %v3711_v54, %v3710_v43  ;;  %v5490_v60 = vpack.c.bf16 %v3502_v56, %v3500_v16  ;;  %v3538_v43 = vld [vmem:[#allocation8 + $0x3f0] sm:$0xff] }
 0x3b1   :  { %5383 = vmatpush1.bf16.msra.mxu1 %v5382_v2  ;;  %v3484_v2 = vld [vmem:[#allocation8 + $0x240] sm:$0xff] }
 0x3b2   :  { %5385 = vmatprep.subr.bf16.mxu1 %v5384_v49  ;;  %v3486_v49 = vld [vmem:[#allocation8 + $0x250] sm:$0xff] }
 0x3b3   :  { %v5474_v9 = vpack.c.bf16 %v3486_v49, %v3484_v2  ;;  %v3508_v2 = vld [vmem:[#allocation8 + $0x300] sm:$0xff]  ;;  %v3510_v49 = vld [vmem:[#allocation8 + $0x310] sm:$0xff] }
 0x3b5   :  { %5387 = vmatpush1.bf16.msra.mxu1 %v5386_v28  ;;  %v5536_v28 = vpack.c.bf16 %v3721_v3, %v3720_v33  ;;  %v3513_v3 = vld [vmem:[#allocation8 + $0x328] sm:$0xff] }
 0x3b6   :  { %5389 = vmatprep.subr.bf16.mxu1 %v5388_v7  ;;  %v3704_v7 = vld [vmem:[#allocation11 + $0x20] sm:$0xff] }
 0x3b7   :  { %v5538_v20 = vpack.c.bf16 %v3705_v8, %v3704_v7  ;;  %v3514_v7 = vld [vmem:[#allocation8 + $0x330] sm:$0xff]  ;;  %v3517_v8 = vld [vmem:[#allocation8 + $0x348] sm:$0xff] }
 0x3b9   :  { %5391 = vmatpush1.bf16.msra.mxu1 %v5390_v12  ;;  %v5476_v12 = vpack.c.bf16 %v3491_v5, %v3489_v4  ;;  %v3515_v4 = vld [vmem:[#allocation8 + $0x338] sm:$0xff]  ;;  %v5498_v5 = vpack.c.bf16 %v3510_v49, %v3508_v2  ;;  %v3712_v2 = vld [vmem:[#allocation11 + $0x60] sm:$0xff]  ;;  %v3713_v49 = vld [vmem:[#allocation11 + $0x68] sm:$0xff] }
 0x3ba   :  { %5393 = vmatprep.subr.bf16.mxu1 %v5392_v13  ;;  %v3488_v13 = vld [vmem:[#allocation8 + $0x260] sm:$0xff] }
 0x3bb   :  { %v5478_v24 = vpack.c.bf16 %v3490_v14, %v3488_v13  ;;  %v3518_v13 = vld [vmem:[#allocation8 + $0x350] sm:$0xff]  ;;  %v3521_v14 = vld [vmem:[#allocation8 + $0x368] sm:$0xff] }
 0x3bd   :  { %5395 = vmatpush1.bf16.msra.mxu1 %v5394_v21  ;;  %v5540_v21 = vpack.c.bf16 %v3723_v11, %v3722_v10 }
 0x3be   :  { %5397 = vmatprep.subr.bf16.mxu1 %v5396_v22  ;;  %v3706_v22 = vld [vmem:[#allocation11 + $0x30] sm:$0xff] }
 0x3c1   :  { %5399 = vmatpush1.bf16.msra.mxu1 %v5398_v25  ;;  %v3724_v25 = vld [vmem:[#allocation11 + $0xc0] sm:$0xff] }
 0x3c2   :  { %5529 = vmatprep.subr.bf16.mxu1 %v5528_v57  ;;  %v3505_v57 = vld [vmem:[#allocation8 + $0x2e8] sm:$0xff] }
 0x3c4   :  { %3394 = vmatmul.mubr.f32.vlgmr.msra.gmra.mrb[2].mxu1 %v5993_v42  ;;  %v1765_v42 = vadd.f32 %v5985_v48, %v1683_v34  ;;  %v3492_v34 = vld [vmem:[#allocation8 + $0x280] sm:$0xff] }
 0x3c5   :  { %5531 = vmatpush3.bf16.msra.mxu1 %v5530_v62  ;;  %v3504_v62 = vld [vmem:[#allocation8 + $0x2e0] sm:$0xff] }
 0x3c6   :  { %5533 = vmatprep.subr.bf16.mxu1 %v5532_v63  ;;  %v3506_v63 = vld [vmem:[#allocation8 + $0x2f0] sm:$0xff] }
 0x3c7   :  { %v5494_v33 = vpack.c.bf16 %v3506_v63, %v3504_v62 }
 0x3c9   :  { %5535 = vmatpush3.bf16.msra.mxu1 %v5534_v6  ;;  %v5500_v6 = vpack.c.bf16 %v3515_v4, %v3513_v3  ;;  %v5554_v3 = vpack.c.bf16 %v3713_v49, %v3712_v2  ;;  %v3731_v4 = vld [vmem:[#allocation11 + $0xf8] sm:$0xff] }
 0x3ca   :  { %5537 = vmatprep.subr.bf16.mxu1 %v5536_v28  ;;  %v3512_v28 = vld [vmem:[#allocation8 + $0x320] sm:$0xff] }
 0x3cb   :  { %v5502_v10 = vpack.c.bf16 %v3514_v7, %v3512_v28  ;;  %v3715_v28 = vld [vmem:[#allocation11 + $0x78] sm:$0xff] }
 0x3cd   :  { %5539 = vmatpush3.bf16.msra.mxu1 %v5538_v20  ;;  %v5508_v20 = vpack.c.bf16 %v3523_v15, %v3521_v14 }
 0x3ce   :  { %5541 = vmatprep.subr.bf16.mxu1 %v5540_v21  ;;  %v3520_v21 = vld [vmem:[#allocation8 + $0x360] sm:$0xff] }
 0x419   :  { %v2543_v36 = vpop.f32.mrb[0].mxu0 }
 0x41a   :  { %v5561_v37 = vadd.f32 %v2543_v36, %v1763_v35  ;;  %v2545_v38 = vpop.f32.mrb[1].mxu0  ;;  %v3494_v35 = vld [vmem:[#allocation8 + $0x290] sm:$0xff]  ;;  %v3499_v36 = vld [vmem:[#allocation8 + $0x2b8] sm:$0xff] }
 0x41b   :  { %v5563_v39 = vadd.f32 %v2545_v38, %v1765_v42  ;;  %v3497_v42 = vld [vmem:[#allocation8 + $0x2a8] sm:$0xff]  ;;  %v5544_v38 = vpack.c.bf16 %v3725_v26, %v3724_v25  ;;  %v5482_v41 = vpack.c.bf16 %v3494_v35, %v3492_v34  ;;  %v3526_v34 = vld [vmem:[#allocation8 + $0x390] sm:$0xff] }
 0x41c   :  { %v3404_v44 = vmul.f32 0.2, %v5561_v37  ;;  %vm3400_vm0 = vcmp.ge.f32.partialorder %v5561_v37, 0.0  ;;  %v5484_v46 = vpack.c.bf16 %v3499_v36, %v3497_v42  ;;  %v3529_v35 = vld [vmem:[#allocation8 + $0x3a8] sm:$0xff]  ;;  %v3531_v42 = vld [vmem:[#allocation8 + $0x3b8] sm:$0xff] }
 0x41d   :  { %v3405_v47 = vmul.f32 0.2, %v5563_v39  ;;  %vm3401_vm1 = vcmp.ge.f32.partialorder %v5563_v39, 0.0 }
 0x41e   :  { %v3408_v48 = vsel %vm3400_vm0, %v5561_v37, %v3404_v44  ;;  %v5542_v37 = vpack.c.bf16 %v3707_v23, %v3706_v22  ;;  %v3726_v44 = vld [vmem:[#allocation11 + $0xd0] sm:$0xff]  ;;  %v3525_v23 = vld [vmem:[#allocation8 + $0x388] sm:$0xff] }
 0x41f   :  { %v3409_v52 = vsel %vm3401_vm1, %v5563_v39, %v3405_v47  ;;  %v3708_v39 = vld [vmem:[#allocation11 + $0x40] sm:$0xff]  ;;  %v5548_v53 = vpack.c.bf16 %v3727_v45, %v3726_v44  ;;  %v3522_v22 = vld [vmem:[#allocation8 + $0x370] sm:$0xff] }
 0x420   :  { %3616 = vmatprep.mubr.f32.mxu0 %v3409_v52  ;;  %v3496_v47 = vld [vmem:[#allocation8 + $0x2a0] sm:$0xff]  ;;  %v3503_v52 = vld [vmem:[#allocation8 + $0x2d8] sm:$0xff]  ;;  %5543 = vmatpush3.bf16.msra.mxu1 %v5542_v37  ;;  %v5510_v25 = vpack.c.bf16 %v3522_v22, %v3520_v21  ;;  %v5516_v37 = vpack.c.bf16 %v3531_v42, %v3529_v35 }
 0x421   :  { %3617 = vmatmul.mubr.f32.vlgmr.msra.gmra.mrb[2].mxu0 %v3408_v48  ;;  %5545 = vmatprep.subr.bf16.mxu1 %v5544_v38  ;;  %v5488_v55 = vpack.c.bf16 %v3503_v52, %v3501_v51  ;;  %v3528_v38 = vld [vmem:[#allocation8 + $0x3a0] sm:$0xff]  ;;  %v3539_v51 = vld [vmem:[#allocation8 + $0x3f8] sm:$0xff] }
 0x422   :  { %5467 = vmatpush1.bf16.msra.mxu0 %v5466_v50  ;;  %v3498_v50 = vld [vmem:[#allocation8 + $0x2b0] sm:$0xff] }
 0x423   :  { %5469 = vmatprep.subr.bf16.mxu0 %v5468_v17  ;;  %v5546_v17 = vpack.c.bf16 %v3709_v40, %v3708_v39  ;;  %v5486_v48 = vpack.c.bf16 %v3498_v50, %v3496_v47  ;;  %v3530_v39 = vld [vmem:[#allocation8 + $0x3b0] sm:$0xff]  ;;  %v3533_v40 = vld [vmem:[#allocation8 + $0x3c8] sm:$0xff] }
 0x424   :  { %v5518_v44 = vpack.c.bf16 %v3530_v39, %v3528_v38  ;;  %v3534_v47 = vld [vmem:[#allocation8 + $0x3d0] sm:$0xff]  ;;  %v3537_v50 = vld [vmem:[#allocation8 + $0x3e8] sm:$0xff] }
 0x425   :  { %5547 = vmatpush3.bf16.msra.mxu1 %v5546_v17  ;;  %v5524_v17 = vpack.c.bf16 %v3539_v51, %v3537_v50 }
 0x426   :  { %5471 = vmatpush1.bf16.msra.mxu0 %v5470_v61  ;;  %5549 = vmatprep.subr.bf16.mxu1 %v5548_v53  ;;  %v5492_v61 = vpack.c.bf16 %v3507_v58, %v3505_v57  ;;  %v3536_v53 = vld [vmem:[#allocation8 + $0x3e0] sm:$0xff] }
 0x427   :  { %5473 = vmatprep.subr.bf16.mxu0 %v5472_v19  ;;  %v5496_v19 = vpack.c.bf16 %v3511_v1, %v3509_v0  ;;  %v5526_v54 = vpack.c.bf16 %v3538_v43, %v3536_v53  ;;  %v3728_v1 = vld [vmem:[#allocation11 + $0xe0] sm:$0xff] }
 0x429   :  { %5551 = vmatpush3.bf16.msra.mxu1 %v5550_v59 }
 0x42a   :  { %5475 = vmatpush1.bf16.msra.mxu0 %v5474_v9  ;;  %v3519_v9 = vld [vmem:[#allocation8 + $0x358] sm:$0xff] }
 0x42b   :  { %5477 = vmatprep.subr.bf16.mxu0 %v5476_v12  ;;  %v5504_v11 = vpack.c.bf16 %v3519_v9, %v3517_v8  ;;  %v3516_v12 = vld [vmem:[#allocation8 + $0x340] sm:$0xff] }
 0x42c   :  { %v5506_v18 = vpack.c.bf16 %v3518_v13, %v3516_v12  ;;  %v3540_v8 = vld [vmem:[#allocation10] sm:$0x3] }
 0x42d   :  { %v3545_v9 = vrot.slane %v3540_v8, %v1678_v29 }
 0x42e   :  { %5479 = vmatpush1.bf16.msra.mxu0 %v5478_v24  ;;  %v3527_v24 = vld [vmem:[#allocation8 + $0x398] sm:$0xff] }
 0x42f   :  { %5481 = vmatprep.subr.bf16.mxu0 %v5480_v32  ;;  %v5512_v26 = vpack.c.bf16 %v3527_v24, %v3525_v23  ;;  %v3524_v32 = vld [vmem:[#allocation8 + $0x380] sm:$0xff] }
 0x430   :  { %v5514_v36 = vpack.c.bf16 %v3526_v34, %v3524_v32  ;;  %v3828_v23 = vld [vmem:[#allocation13] ss:$0 sm:$0xff] }
 0x432   :  { %5483 = vmatpush1.bf16.msra.mxu0 %v5482_v41  ;;  %v3535_v41 = vld [vmem:[#allocation8 + $0x3d8] sm:$0xff] }
 0x433   :  { %5485 = vmatprep.subr.bf16.mxu0 %v5484_v46  ;;  %v5520_v45 = vpack.c.bf16 %v3535_v41, %v3533_v40  ;;  %v3532_v46 = vld [vmem:[#allocation8 + $0x3c0] sm:$0xff] }
 0x434   :  { %v5522_v52 = vpack.c.bf16 %v3534_v47, %v3532_v46 }
 0x436   :  { %5487 = vmatpush1.bf16.msra.mxu0 %v5486_v48  ;;  %v1686_v48 = vsub.s32 2, %v5999_v27 }
 0x437   :  { %5489 = vmatprep.subr.bf16.mxu0 %v5488_v55  ;;  %v1690_v55 = vsub.s32 3, %v5999_v27 }
 0x438   :  { %v1687_v16 = vrot.slane %v6002_v30, %v1686_v48 }
 0x439   :  { %v1691_v56 = vrot.slane %v6002_v30, %v1690_v55  ;;  %v3730_v30 = vld [vmem:[#allocation11 + $0xf0] sm:$0xff] }
 0x43a   :  { %5491 = vmatpush1.bf16.msra.mxu0 %v5490_v60 }
 0x43b   :  { %5493 = vmatprep.subr.bf16.mxu0 %v5492_v61 }
 0x43e   :  { %5495 = vmatpush1.bf16.msra.mxu0 %v5494_v33  ;;  %v3729_v33 = vld [vmem:[#allocation11 + $0xe8] sm:$0xff] }
 0x43f   :  { %5497 = vmatprep.subr.bf16.mxu0 %v5496_v19  ;;  %v5552_v19 = vpack.c.bf16 %v3729_v33, %v3728_v1 }
 0x441   :  { %5553 = vmatprep.subr.bf16.mxu1 %v5552_v19 }
 0x442   :  { %5499 = vmatpush1.bf16.msra.mxu0 %v5498_v5  ;;  %5555 = vmatpush3.bf16.msra.mxu1 %v5554_v3  ;;  %v5556_v5 = vpack.c.bf16 %v3731_v4, %v3730_v30 }
 0x443   :  { %5501 = vmatprep.subr.bf16.mxu0 %v5500_v6  ;;  %v3714_v6 = vld [vmem:[#allocation11 + $0x70] sm:$0xff] }
 0x444   :  { %v5558_v7 = vpack.c.bf16 %v3715_v28, %v3714_v6  ;;  %5557 = vmatprep.subr.bf16.mxu1 %v5556_v5 }
 0x446   :  { %5503 = vmatpush1.bf16.msra.mxu0 %v5502_v10  ;;  %5559 = vmatpush3.bf16.msra.mxu1 %v5558_v7  ;;  %v3549_v10 = vrot.slane %v3540_v8, %v1682_v31 }
 0x447   :  { %5505 = vmatprep.subr.bf16.mxu0 %v5504_v11 }
 0x44a   :  { %5507 = vmatpush1.bf16.msra.mxu0 %v5506_v18 }
 0x44b   :  { %5509 = vmatprep.subr.bf16.mxu0 %v5508_v20 }
 0x44e   :  { %5511 = vmatpush1.bf16.msra.mxu0 %v5510_v25 }
 0x44f   :  { %5513 = vmatprep.subr.bf16.mxu0 %v5512_v26 }
 0x452   :  { %5515 = vmatpush1.bf16.msra.mxu0 %v5514_v36 }
 0x453   :  { %5517 = vmatprep.subr.bf16.mxu0 %v5516_v37 }
 0x456   :  { %5519 = vmatpush1.bf16.msra.mxu0 %v5518_v44 }
 0x457   :  { %5521 = vmatprep.subr.bf16.mxu0 %v5520_v45 }
 0x45a   :  { %5523 = vmatpush1.bf16.msra.mxu0 %v5522_v52 }
 0x45b   :  { %5525 = vmatprep.subr.bf16.mxu0 %v5524_v17 }
 0x45e   :  { %5527 = vmatpush1.bf16.msra.mxu0 %v5526_v54 }
 0x497   :  { %v3395_v57 = vpop.f32.mrb[2].mxu1 }
 0x498   :  { %v5564_v58 = vadd.f32 %v3395_v57, %v1687_v16  ;;  %v3397_v59 = vpop.f32.mrb[3].mxu1 }
 0x499   :  { %v5565_v60 = vadd.f32 %v3397_v59, %v1691_v56 }
 0x49a   :  { %v3406_v61 = vmul.f32 0.2, %v5564_v58  ;;  %vm3402_vm2 = vcmp.ge.f32.partialorder %v5564_v58, 0.0 }
 0x49b   :  { %v3407_v62 = vmul.f32 0.2, %v5565_v60  ;;  %vm3403_vm3 = vcmp.ge.f32.partialorder %v5565_v60, 0.0 }
 0x49c   :  { %v3410_v0 = vsel %vm3402_vm2, %v5564_v58, %v3406_v61 }
 0x49d   :  { %v3411_v63 = vsel %vm3403_vm3, %v5565_v60, %v3407_v62 }
 0x49e   :  { %3687 = vmatprep.mubr.f32.mxu0 %v3411_v63 }
 0x49f   :  { %3688 = vmatmul.mubr.f32.vlgmr.msra.gmra.mrb[2].mxu0 %v3410_v0 }
 0x572   :  { %v3689_v11 = vpop.f32.mrb[2].mxu0 }
 0x573   :  { %v5566_v12 = vadd.f32 %v3689_v11, %v3545_v9  ;;  %v3691_v13 = vpop.f32.mrb[3].mxu0 }
 0x574   :  { %v5567_v14 = vadd.f32 %v3691_v13, %v3549_v10 }
 0x575   :  { %v3696_v15 = vmul.f32 0.2, %v5566_v12  ;;  %vm3694_vm4 = vcmp.ge.f32.partialorder %v5566_v12, 0.0 }
 0x576   :  { %v3697_v18 = vmul.f32 0.2, %v5567_v14  ;;  %vm3695_vm5 = vcmp.ge.f32.partialorder %v5567_v14, 0.0 }
 0x577   :  { %v3698_v21 = vsel %vm3694_vm4, %v5566_v12, %v3696_v15 }
 0x578   :  { %v3699_v20 = vsel %vm3695_vm5, %v5567_v14, %v3697_v18 }
 0x579   :  { %3803 = vmatprep.mubr.f32.mxu1 %v3699_v20 }
 0x57a   :  { %3804 = vmatmul.mubr.f32.vlgmr.msra.gmra.mrb[4].mxu1 %v3698_v21 }
 0x64d   :  { %v3861_v22 = vpop.f32.mrb[4].mxu1 }
 0x64e   :  { %v3862_v24 = vpop.f32.mrb[5].mxu1 }
 0x64f   :  { %v3863_v29 = vadd.f32 %v3862_v24, %v3861_v22 }
 0x651   :  { %v3806_v27 = vadd.f32 %v3863_v29, %v3828_v23 }
 0x653   :  { %3809 = vst [vmem:[#allocation14] sm:$0xff] %v3806_v27 }
 0x654   :  { %5808 = shalt.err (!%p5805_p4)
}
 0x655   :  { %s5809_s15 = scalar_lea.hbm %s6040_s7, 128 }
 0x656   :  { %p5810_p5 = scmp.ne.s32.totalorder %s6040_s7, %s5809_s15  ;;  %p5813_p6 = scmp.lt.u32.totalorder %s5809_s15, %s6040_s7 }
 0x658   :  { %p5815_p7 = pnand %p5813_p6, %p5810_p5 }
 0x65a   :  { %5818 = shalt.err (!%p5815_p7)
}
 0x65b   :  { %3819 = dma.vmem_to_hbm [thread:$0]  %s3817_s13, 128, %s6040_s7, [#allocation4]  }
 0x65c   :  { %5827 = dma.done.wait [#allocation4], 128  }
 0x65d   :  { %5828 = vsyncadd [#allocation4], 4294967168 }
 0x65e   :  { %3823 = vsyncpa [#allocation3], 1 }
 0x65f   :  { %3824 = vsyncpa [#allocation6], 1 }
 0x660   :  { %3825 = vsyncpa [#allocation9], 1 }
 0x661   :  { %3826 = vsyncpa [#allocation12], 1 }
 0x662   :  { %3827 = vsyncpa [#allocation4], 1 }

</bundles_post_ra>
